<compile_context>
chip_gen: v6e
topology: v6e:2x2x1
jax: 0.10.0
libtpu: 0.0.40
codegen_flags: <defaults>
</compile_context>

<pallas_src>
import jax
import jax.numpy as jnp
import numpy as np
from jax.experimental import pallas as pl
from jax.experimental.pallas import tpu as pltpu

B, C, H, W = 2, 32, 16, 16
RED = 4
CR = C // RED          # reduced channels in the SE bottleneck
K = 7                  # spatial attention conv kernel size
P = K // 2
HW = H * W

assert W & (W - 1) == 0, "fast in-kernel column-index computation assumes W is a power of two"


# ------------------------------ fused CBAM kernel -----------------------------------
# Single invocation over the full (B, C, HW) slab; HW sits on the lane axis.
def cbam_kernel(x_ref, w1t_ref, w2t_ref, wsp_ref, bsp_ref, o_ref):
    x = x_ref[...]                                            # (B, C, HW) f32

    # ---- channel attention: AdaptiveMax/AvgPool2d(1) == lane reductions ----
    mx = jnp.max(x, axis=2)                                   # (B, C)
    av = jnp.mean(x, axis=2)                                  # (B, C)
    pooled = jnp.concatenate([mx, av], axis=0)                # (2B, C) -> one fused SE dot
    h = jnp.maximum(
        jnp.dot(pooled, w1t_ref[...], preferred_element_type=jnp.float32), 0.0)  # (2B, CR)
    # second SE layer is linear & bias-free, so sum the ReLU'd halves first.
    hsum = h[:B] + h[B:]                                      # (B, CR)
    ca = jax.nn.sigmoid(
        jnp.dot(hsum, w2t_ref[...], preferred_element_type=jnp.float32))          # (B, C)
    y = x * ca[:, :, None]                                    # broadcast over lanes

    # ---- spatial attention: channel max / mean maps ----
    cmax = jnp.max(y, axis=1)                                 # (B, HW) sublane reduce
    cavg = jnp.mean(y, axis=1)                                # (B, HW)

    # Static per-pixel row/col indices from a lane iota (no div: compare vs a*W,
    # and W is a power of two so col%W is a bitwise AND).
    col = jax.lax.broadcasted_iota(jnp.int32, (1, HW), 1)     # flat pixel index p
    jj = col & (W - 1)                                        # p % W
    row_ok = [(col >= (P - ky) * W) & (col < (H + P - ky) * W) for ky in range(K)]
    col_ok = [(jj >= (P - kx)) & (jj < (W + P - kx)) for kx in range(K)]

    # 7x7 zero-padded cross-correlation as 49 taps of roll + mask + scalar FMA.
    # shifted[p] = map[p + d] with d = (ky-P)*W + (kx-P)  <=>  roll by (-d) mod HW;
    # wrap-around / out-of-image taps are exactly the masked-out positions.
    acc = jnp.zeros((B, HW), jnp.float32)
    for ky in range(K):
        for kx in range(K):
            d = (ky - P) * W + (kx - P)
            s = (-d) % HW
            rmax = cmax if s == 0 else pltpu.roll(cmax, s, axis=1)
            ravg = cavg if s == 0 else pltpu.roll(cavg, s, axis=1)
            tap = (wsp_ref[ky * K + kx] * rmax
                   + wsp_ref[K * K + ky * K + kx] * ravg)     # (B, HW)
            acc = acc + jnp.where(row_ok[ky] & col_ok[kx], tap, 0.0)
    sa = jax.nn.sigmoid(acc + bsp_ref[0])                     # (B, HW)

    o_ref[...] = y * sa[:, None, :] + x                       # spatial scale + residual


# ------------------------------------ wrapper ---------------------------------------
@jax.jit
def cbam_pallas(x_nchw, w1, w2, wconv, bconv):
    """x_nchw: (B, C, H, W) f32.
    w1: (CR, C)  -- se[0] 1x1 conv weight (squeezed), w2: (C, CR) -- se[2] weight,
    wconv: (1, 2, K, K), bconv: (1,) -- spatial conv weight / bias."""
    x3 = x_nchw.reshape(B, C, HW)          # free reshape, stays channels-first
    w1t = w1.T                             # (C, CR)  -- tiny (1 KiB) transpose
    w2t = w2.T                             # (CR, C)
    wsp = wconv.reshape(2 * K * K)         # [ch0(max) taps..., ch1(avg) taps...] -> SMEM

    out = pl.pallas_call(
        cbam_kernel,
        out_shape=jax.ShapeDtypeStruct((B, C, HW), jnp.float32),
        in_specs=[
            pl.BlockSpec(memory_space=pltpu.MemorySpace.VMEM),   # x slab (64 KiB)
            pl.BlockSpec(memory_space=pltpu.MemorySpace.VMEM),   # w1t
            pl.BlockSpec(memory_space=pltpu.MemorySpace.VMEM),   # w2t
            pl.BlockSpec(memory_space=pltpu.MemorySpace.SMEM),   # conv taps (98 scalars)
            pl.BlockSpec(memory_space=pltpu.MemorySpace.SMEM),   # conv bias
        ],
        out_specs=pl.BlockSpec(memory_space=pltpu.MemorySpace.VMEM),
    )(x3, w1t, w2t, wsp, bconv)

    return out.reshape(B, C, H, W)         # free reshape back to NCHW


# ------------------------------- pure-JAX reference ---------------------------------
def cbam_ref(x, w1, w2, wconv, bconv):
    mx = jnp.max(x, axis=(2, 3))
    av = jnp.mean(x, axis=(2, 3))

    def se(v):
        return jax.nn.relu(v @ w1.T) @ w2.T

    ca = jax.nn.sigmoid(se(mx) + se(av))[:, :, None, None]
    out = x * ca
    cmax = jnp.max(out, axis=1, keepdims=True)
    cavg = jnp.mean(out, axis=1, keepdims=True)
    cat = jnp.concatenate([cmax, cavg], axis=1)
    conv = jax.lax.conv_general_dilated(
        cat, wconv, window_strides=(1, 1), padding=[(P, P), (P, P)],
        dimension_numbers=("NCHW", "OIHW", "NCHW"))
    sa = jax.nn.sigmoid(conv + bconv[None, :, None, None])
    return out * sa + x


if __name__ == "__main__":
    key = jax.random.PRNGKey(0)
    kx_, k1, k2, k3, k4 = jax.random.split(key, 5)

    x = jax.random.normal(kx_, (B, C, H, W), dtype=jnp.float32)
    # deterministic kaiming-ish init (fan-in scaled normals)
    w1 = jax.random.normal(k1, (CR, C), dtype=jnp.float32) * (2.0 / C) ** 0.5
    w2 = jax.random.normal(k2, (C, CR), dtype=jnp.float32) * (2.0 / CR) ** 0.5
    wconv = jax.random.normal(k3, (1, 2, K, K), dtype=jnp.float32) * (2.0 / (2 * K * K)) ** 0.5
    bconv = jax.random.normal(k4, (1,), dtype=jnp.float32) * 0.1

    out = jax.block_until_ready(cbam_pallas(x, w1, w2, wconv, bconv))
    ref = jax.block_until_ready(cbam_ref(x, w1, w2, wconv, bconv))

    np.testing.assert_allclose(np.asarray(out), np.asarray(ref), rtol=2e-3, atol=2e-3)
    print("KERNEL_OK")
</pallas_src>

<mosaic_0001>
module attributes {stable_mosaic.version = 11 : i64} {
  func.func @cbam_kernel(%arg0: memref<2x32x256xf32, #tpu.memory_space<vmem>>, %arg1: memref<32x8xf32, #tpu.memory_space<vmem>>, %arg2: memref<8x32xf32, #tpu.memory_space<vmem>>, %arg3: memref<98xf32, #tpu.memory_space<smem>>, %arg4: memref<1xf32, #tpu.memory_space<smem>>, %arg5: memref<2x32x256xf32, #tpu.memory_space<vmem>>) attributes {dimension_semantics = [], scalar_prefetch = 0 : i64, scratch_operands = 0 : i64, tpu.core_type = #tpu.core_type<tc>} {
    %c0 = arith.constant 0 : index
    %c0_0 = arith.constant 0 : index
    %c0_1 = arith.constant 0 : index
    %0 = vector.load %arg0[%c0, %c0_0, %c0_1] : memref<2x32x256xf32, #tpu.memory_space<vmem>>, vector<2x32x256xf32>
    %cst = arith.constant dense<0xFF800000> : vector<2x32xf32>
    %1 = vector.multi_reduction <maximumf>, %0, %cst [2] : vector<2x32x256xf32> to vector<2x32xf32>
    %cst_2 = arith.constant dense<0.000000e+00> : vector<2x32xf32>
    %2 = vector.multi_reduction <add>, %0, %cst_2 [2] : vector<2x32x256xf32> to vector<2x32xf32>
    %cst_3 = arith.constant 2.560000e+02 : f32
    %3 = vector.broadcast %cst_3 : f32 to vector<2x32xf32>
    %4 = arith.divf %2, %3 : vector<2x32xf32>
    %5 = tpu.concatenate %1, %4 in 0 : vector<2x32xf32>, vector<2x32xf32> -> vector<4x32xf32>
    %c0_4 = arith.constant 0 : index
    %c0_5 = arith.constant 0 : index
    %6 = vector.load %arg1[%c0_4, %c0_5] : memref<32x8xf32, #tpu.memory_space<vmem>>, vector<32x8xf32>
    %cst_6 = arith.constant dense<0.000000e+00> : vector<4x8xf32>
    %7 = tpu.matmul %5, %6, %cst_6 {dimension_numbers = #tpu.dot_dimension_numbers<[1], [0], [0], [1], [0, 0, 1, 1], [], []>} : vector<4x32xf32>, vector<32x8xf32>, vector<4x8xf32> -> vector<4x8xf32>
    %cst_7 = arith.constant 0.000000e+00 : f32
    %8 = vector.broadcast %cst_7 : f32 to vector<4x8xf32>
    %9 = arith.maximumf %7, %8 : vector<4x8xf32>
    %10 = vector.extract_strided_slice %9 {offsets = [0, 0], sizes = [2, 8], strides = [1, 1]} : vector<4x8xf32> to vector<2x8xf32>
    %11 = vector.extract_strided_slice %9 {offsets = [2, 0], sizes = [2, 8], strides = [1, 1]} : vector<4x8xf32> to vector<2x8xf32>
    %12 = arith.addf %10, %11 : vector<2x8xf32>
    %c0_8 = arith.constant 0 : index
    %c0_9 = arith.constant 0 : index
    %13 = vector.load %arg2[%c0_8, %c0_9] : memref<8x32xf32, #tpu.memory_space<vmem>>, vector<8x32xf32>
    %cst_10 = arith.constant dense<0.000000e+00> : vector<2x32xf32>
    %14 = tpu.matmul %12, %13, %cst_10 {dimension_numbers = #tpu.dot_dimension_numbers<[1], [0], [0], [1], [0, 0, 1, 1], [], []>} : vector<2x8xf32>, vector<8x32xf32>, vector<2x32xf32> -> vector<2x32xf32>
    %15 = arith.negf %14 : vector<2x32xf32>
    %16 = math.exp %15 : vector<2x32xf32>
    %cst_11 = arith.constant 1.000000e+00 : f32
    %17 = vector.broadcast %cst_11 : f32 to vector<2x32xf32>
    %18 = arith.addf %17, %16 : vector<2x32xf32>
    %19 = arith.divf %17, %18 : vector<2x32xf32>
    %20 = vector.shape_cast %19 : vector<2x32xf32> to vector<2x32x1xf32>
    %21 = vector.broadcast %20 : vector<2x32x1xf32> to vector<2x32x256xf32>
    %22 = arith.mulf %0, %21 : vector<2x32x256xf32>
    %cst_12 = arith.constant dense<0xFF800000> : vector<2x256xf32>
    %23 = vector.multi_reduction <maximumf>, %22, %cst_12 [1] : vector<2x32x256xf32> to vector<2x256xf32>
    %cst_13 = arith.constant dense<0.000000e+00> : vector<2x256xf32>
    %24 = vector.multi_reduction <add>, %22, %cst_13 [1] : vector<2x32x256xf32> to vector<2x256xf32>
    %cst_14 = arith.constant 3.200000e+01 : f32
    %25 = vector.broadcast %cst_14 : f32 to vector<2x256xf32>
    %26 = arith.divf %24, %25 : vector<2x256xf32>
    %27 = tpu.iota {dimensions = array<i32: 1>} : vector<1x256xi32>
    %c15_i32 = arith.constant 15 : i32
    %28 = vector.broadcast %c15_i32 : i32 to vector<1x256xi32>
    %29 = arith.andi %27, %28 : vector<1x256xi32>
    %c48_i32 = arith.constant 48 : i32
    %30 = vector.broadcast %c48_i32 : i32 to vector<1x256xi32>
    %31 = arith.cmpi sge, %27, %30 : vector<1x256xi32>
    %c304_i32 = arith.constant 304 : i32
    %32 = vector.broadcast %c304_i32 : i32 to vector<1x256xi32>
    %33 = arith.cmpi slt, %27, %32 : vector<1x256xi32>
    %34 = arith.andi %31, %33 : vector<1x256xi1>
    %c32_i32 = arith.constant 32 : i32
    %35 = vector.broadcast %c32_i32 : i32 to vector<1x256xi32>
    %36 = arith.cmpi sge, %27, %35 : vector<1x256xi32>
    %c288_i32 = arith.constant 288 : i32
    %37 = vector.broadcast %c288_i32 : i32 to vector<1x256xi32>
    %38 = arith.cmpi slt, %27, %37 : vector<1x256xi32>
    %39 = arith.andi %36, %38 : vector<1x256xi1>
    %c16_i32 = arith.constant 16 : i32
    %40 = vector.broadcast %c16_i32 : i32 to vector<1x256xi32>
    %41 = arith.cmpi sge, %27, %40 : vector<1x256xi32>
    %c272_i32 = arith.constant 272 : i32
    %42 = vector.broadcast %c272_i32 : i32 to vector<1x256xi32>
    %43 = arith.cmpi slt, %27, %42 : vector<1x256xi32>
    %44 = arith.andi %41, %43 : vector<1x256xi1>
    %c0_i32 = arith.constant 0 : i32
    %45 = vector.broadcast %c0_i32 : i32 to vector<1x256xi32>
    %46 = arith.cmpi sge, %27, %45 : vector<1x256xi32>
    %c256_i32 = arith.constant 256 : i32
    %47 = vector.broadcast %c256_i32 : i32 to vector<1x256xi32>
    %48 = arith.cmpi slt, %27, %47 : vector<1x256xi32>
    %49 = arith.andi %46, %48 : vector<1x256xi1>
    %c-16_i32 = arith.constant -16 : i32
    %50 = vector.broadcast %c-16_i32 : i32 to vector<1x256xi32>
    %51 = arith.cmpi sge, %27, %50 : vector<1x256xi32>
    %c240_i32 = arith.constant 240 : i32
    %52 = vector.broadcast %c240_i32 : i32 to vector<1x256xi32>
    %53 = arith.cmpi slt, %27, %52 : vector<1x256xi32>
    %54 = arith.andi %51, %53 : vector<1x256xi1>
    %c-32_i32 = arith.constant -32 : i32
    %55 = vector.broadcast %c-32_i32 : i32 to vector<1x256xi32>
    %56 = arith.cmpi sge, %27, %55 : vector<1x256xi32>
    %c224_i32 = arith.constant 224 : i32
    %57 = vector.broadcast %c224_i32 : i32 to vector<1x256xi32>
    %58 = arith.cmpi slt, %27, %57 : vector<1x256xi32>
    %59 = arith.andi %56, %58 : vector<1x256xi1>
    %c-48_i32 = arith.constant -48 : i32
    %60 = vector.broadcast %c-48_i32 : i32 to vector<1x256xi32>
    %61 = arith.cmpi sge, %27, %60 : vector<1x256xi32>
    %c208_i32 = arith.constant 208 : i32
    %62 = vector.broadcast %c208_i32 : i32 to vector<1x256xi32>
    %63 = arith.cmpi slt, %27, %62 : vector<1x256xi32>
    %64 = arith.andi %61, %63 : vector<1x256xi1>
    %c3_i32 = arith.constant 3 : i32
    %65 = vector.broadcast %c3_i32 : i32 to vector<1x256xi32>
    %66 = arith.cmpi sge, %29, %65 : vector<1x256xi32>
    %c19_i32 = arith.constant 19 : i32
    %67 = vector.broadcast %c19_i32 : i32 to vector<1x256xi32>
    %68 = arith.cmpi slt, %29, %67 : vector<1x256xi32>
    %69 = arith.andi %66, %68 : vector<1x256xi1>
    %c2_i32 = arith.constant 2 : i32
    %70 = vector.broadcast %c2_i32 : i32 to vector<1x256xi32>
    %71 = arith.cmpi sge, %29, %70 : vector<1x256xi32>
    %c18_i32 = arith.constant 18 : i32
    %72 = vector.broadcast %c18_i32 : i32 to vector<1x256xi32>
    %73 = arith.cmpi slt, %29, %72 : vector<1x256xi32>
    %74 = arith.andi %71, %73 : vector<1x256xi1>
    %c1_i32 = arith.constant 1 : i32
    %75 = vector.broadcast %c1_i32 : i32 to vector<1x256xi32>
    %76 = arith.cmpi sge, %29, %75 : vector<1x256xi32>
    %c17_i32 = arith.constant 17 : i32
    %77 = vector.broadcast %c17_i32 : i32 to vector<1x256xi32>
    %78 = arith.cmpi slt, %29, %77 : vector<1x256xi32>
    %79 = arith.andi %76, %78 : vector<1x256xi1>
    %c0_i32_15 = arith.constant 0 : i32
    %80 = vector.broadcast %c0_i32_15 : i32 to vector<1x256xi32>
    %81 = arith.cmpi sge, %29, %80 : vector<1x256xi32>
    %c16_i32_16 = arith.constant 16 : i32
    %82 = vector.broadcast %c16_i32_16 : i32 to vector<1x256xi32>
    %83 = arith.cmpi slt, %29, %82 : vector<1x256xi32>
    %84 = arith.andi %81, %83 : vector<1x256xi1>
    %c-1_i32 = arith.constant -1 : i32
    %85 = vector.broadcast %c-1_i32 : i32 to vector<1x256xi32>
    %86 = arith.cmpi sge, %29, %85 : vector<1x256xi32>
    %c15_i32_17 = arith.constant 15 : i32
    %87 = vector.broadcast %c15_i32_17 : i32 to vector<1x256xi32>
    %88 = arith.cmpi slt, %29, %87 : vector<1x256xi32>
    %89 = arith.andi %86, %88 : vector<1x256xi1>
    %c-2_i32 = arith.constant -2 : i32
    %90 = vector.broadcast %c-2_i32 : i32 to vector<1x256xi32>
    %91 = arith.cmpi sge, %29, %90 : vector<1x256xi32>
    %c14_i32 = arith.constant 14 : i32
    %92 = vector.broadcast %c14_i32 : i32 to vector<1x256xi32>
    %93 = arith.cmpi slt, %29, %92 : vector<1x256xi32>
    %94 = arith.andi %91, %93 : vector<1x256xi1>
    %c-3_i32 = arith.constant -3 : i32
    %95 = vector.broadcast %c-3_i32 : i32 to vector<1x256xi32>
    %96 = arith.cmpi sge, %29, %95 : vector<1x256xi32>
    %c13_i32 = arith.constant 13 : i32
    %97 = vector.broadcast %c13_i32 : i32 to vector<1x256xi32>
    %98 = arith.cmpi slt, %29, %97 : vector<1x256xi32>
    %99 = arith.andi %96, %98 : vector<1x256xi1>
    %cst_18 = arith.constant 0.000000e+00 : f32
    %100 = vector.broadcast %cst_18 : f32 to vector<2x256xf32>
    %c51_i32 = arith.constant 51 : i32
    %101 = tpu.dynamic_rotate %23 by %c51_i32 dim 1 : vector<2x256xf32>, i32 -> vector<2x256xf32>
    %c51_i32_19 = arith.constant 51 : i32
    %102 = tpu.dynamic_rotate %26 by %c51_i32_19 dim 1 : vector<2x256xf32>, i32 -> vector<2x256xf32>
    %c0_20 = arith.constant 0 : index
    %103 = memref.load %arg3[%c0_20] : memref<98xf32, #tpu.memory_space<smem>>
    %104 = vector.broadcast %103 : f32 to vector<2x256xf32>
    %105 = arith.mulf %104, %101 : vector<2x256xf32>
    %c49 = arith.constant 49 : index
    %106 = memref.load %arg3[%c49] : memref<98xf32, #tpu.memory_space<smem>>
    %107 = vector.broadcast %106 : f32 to vector<2x256xf32>
    %108 = arith.mulf %107, %102 : vector<2x256xf32>
    %109 = arith.addf %105, %108 : vector<2x256xf32>
    %110 = arith.andi %34, %69 : vector<1x256xi1>
    %cst_21 = arith.constant 0.000000e+00 : f32
    %111 = vector.shape_cast %110 : vector<1x256xi1> to vector<1x256xi1>
    %112 = vector.broadcast %111 : vector<1x256xi1> to vector<2x256xi1>
    %113 = vector.broadcast %cst_21 : f32 to vector<2x256xf32>
    %114 = arith.select %112, %109, %113 : vector<2x256xi1>, vector<2x256xf32>
    %115 = arith.addf %100, %114 : vector<2x256xf32>
    %c50_i32 = arith.constant 50 : i32
    %116 = tpu.dynamic_rotate %23 by %c50_i32 dim 1 : vector<2x256xf32>, i32 -> vector<2x256xf32>
    %c50_i32_22 = arith.constant 50 : i32
    %117 = tpu.dynamic_rotate %26 by %c50_i32_22 dim 1 : vector<2x256xf32>, i32 -> vector<2x256xf32>
    %c1 = arith.constant 1 : index
    %118 = memref.load %arg3[%c1] : memref<98xf32, #tpu.memory_space<smem>>
    %119 = vector.broadcast %118 : f32 to vector<2x256xf32>
    %120 = arith.mulf %119, %116 : vector<2x256xf32>
    %c50 = arith.constant 50 : index
    %121 = memref.load %arg3[%c50] : memref<98xf32, #tpu.memory_space<smem>>
    %122 = vector.broadcast %121 : f32 to vector<2x256xf32>
    %123 = arith.mulf %122, %117 : vector<2x256xf32>
    %124 = arith.addf %120, %123 : vector<2x256xf32>
    %125 = arith.andi %34, %74 : vector<1x256xi1>
    %cst_23 = arith.constant 0.000000e+00 : f32
    %126 = vector.shape_cast %125 : vector<1x256xi1> to vector<1x256xi1>
    %127 = vector.broadcast %126 : vector<1x256xi1> to vector<2x256xi1>
    %128 = vector.broadcast %cst_23 : f32 to vector<2x256xf32>
    %129 = arith.select %127, %124, %128 : vector<2x256xi1>, vector<2x256xf32>
    %130 = arith.addf %115, %129 : vector<2x256xf32>
    %c49_i32 = arith.constant 49 : i32
    %131 = tpu.dynamic_rotate %23 by %c49_i32 dim 1 : vector<2x256xf32>, i32 -> vector<2x256xf32>
    %c49_i32_24 = arith.constant 49 : i32
    %132 = tpu.dynamic_rotate %26 by %c49_i32_24 dim 1 : vector<2x256xf32>, i32 -> vector<2x256xf32>
    %c2 = arith.constant 2 : index
    %133 = memref.load %arg3[%c2] : memref<98xf32, #tpu.memory_space<smem>>
    %134 = vector.broadcast %133 : f32 to vector<2x256xf32>
    %135 = arith.mulf %134, %131 : vector<2x256xf32>
    %c51 = arith.constant 51 : index
    %136 = memref.load %arg3[%c51] : memref<98xf32, #tpu.memory_space<smem>>
    %137 = vector.broadcast %136 : f32 to vector<2x256xf32>
    %138 = arith.mulf %137, %132 : vector<2x256xf32>
    %139 = arith.addf %135, %138 : vector<2x256xf32>
    %140 = arith.andi %34, %79 : vector<1x256xi1>
    %cst_25 = arith.constant 0.000000e+00 : f32
    %141 = vector.shape_cast %140 : vector<1x256xi1> to vector<1x256xi1>
    %142 = vector.broadcast %141 : vector<1x256xi1> to vector<2x256xi1>
    %143 = vector.broadcast %cst_25 : f32 to vector<2x256xf32>
    %144 = arith.select %142, %139, %143 : vector<2x256xi1>, vector<2x256xf32>
    %145 = arith.addf %130, %144 : vector<2x256xf32>
    %c48_i32_26 = arith.constant 48 : i32
    %146 = tpu.dynamic_rotate %23 by %c48_i32_26 dim 1 : vector<2x256xf32>, i32 -> vector<2x256xf32>
    %c48_i32_27 = arith.constant 48 : i32
    %147 = tpu.dynamic_rotate %26 by %c48_i32_27 dim 1 : vector<2x256xf32>, i32 -> vector<2x256xf32>
    %c3 = arith.constant 3 : index
    %148 = memref.load %arg3[%c3] : memref<98xf32, #tpu.memory_space<smem>>
    %149 = vector.broadcast %148 : f32 to vector<2x256xf32>
    %150 = arith.mulf %149, %146 : vector<2x256xf32>
    %c52 = arith.constant 52 : index
    %151 = memref.load %arg3[%c52] : memref<98xf32, #tpu.memory_space<smem>>
    %152 = vector.broadcast %151 : f32 to vector<2x256xf32>
    %153 = arith.mulf %152, %147 : vector<2x256xf32>
    %154 = arith.addf %150, %153 : vector<2x256xf32>
    %155 = arith.andi %34, %84 : vector<1x256xi1>
    %cst_28 = arith.constant 0.000000e+00 : f32
    %156 = vector.shape_cast %155 : vector<1x256xi1> to vector<1x256xi1>
    %157 = vector.broadcast %156 : vector<1x256xi1> to vector<2x256xi1>
    %158 = vector.broadcast %cst_28 : f32 to vector<2x256xf32>
    %159 = arith.select %157, %154, %158 : vector<2x256xi1>, vector<2x256xf32>
    %160 = arith.addf %145, %159 : vector<2x256xf32>
    %c47_i32 = arith.constant 47 : i32
    %161 = tpu.dynamic_rotate %23 by %c47_i32 dim 1 : vector<2x256xf32>, i32 -> vector<2x256xf32>
    %c47_i32_29 = arith.constant 47 : i32
    %162 = tpu.dynamic_rotate %26 by %c47_i32_29 dim 1 : vector<2x256xf32>, i32 -> vector<2x256xf32>
    %c4 = arith.constant 4 : index
    %163 = memref.load %arg3[%c4] : memref<98xf32, #tpu.memory_space<smem>>
    %164 = vector.broadcast %163 : f32 to vector<2x256xf32>
    %165 = arith.mulf %164, %161 : vector<2x256xf32>
    %c53 = arith.constant 53 : index
    %166 = memref.load %arg3[%c53] : memref<98xf32, #tpu.memory_space<smem>>
    %167 = vector.broadcast %166 : f32 to vector<2x256xf32>
    %168 = arith.mulf %167, %162 : vector<2x256xf32>
    %169 = arith.addf %165, %168 : vector<2x256xf32>
    %170 = arith.andi %34, %89 : vector<1x256xi1>
    %cst_30 = arith.constant 0.000000e+00 : f32
    %171 = vector.shape_cast %170 : vector<1x256xi1> to vector<1x256xi1>
    %172 = vector.broadcast %171 : vector<1x256xi1> to vector<2x256xi1>
    %173 = vector.broadcast %cst_30 : f32 to vector<2x256xf32>
    %174 = arith.select %172, %169, %173 : vector<2x256xi1>, vector<2x256xf32>
    %175 = arith.addf %160, %174 : vector<2x256xf32>
    %c46_i32 = arith.constant 46 : i32
    %176 = tpu.dynamic_rotate %23 by %c46_i32 dim 1 : vector<2x256xf32>, i32 -> vector<2x256xf32>
    %c46_i32_31 = arith.constant 46 : i32
    %177 = tpu.dynamic_rotate %26 by %c46_i32_31 dim 1 : vector<2x256xf32>, i32 -> vector<2x256xf32>
    %c5 = arith.constant 5 : index
    %178 = memref.load %arg3[%c5] : memref<98xf32, #tpu.memory_space<smem>>
    %179 = vector.broadcast %178 : f32 to vector<2x256xf32>
    %180 = arith.mulf %179, %176 : vector<2x256xf32>
    %c54 = arith.constant 54 : index
    %181 = memref.load %arg3[%c54] : memref<98xf32, #tpu.memory_space<smem>>
    %182 = vector.broadcast %181 : f32 to vector<2x256xf32>
    %183 = arith.mulf %182, %177 : vector<2x256xf32>
    %184 = arith.addf %180, %183 : vector<2x256xf32>
    %185 = arith.andi %34, %94 : vector<1x256xi1>
    %cst_32 = arith.constant 0.000000e+00 : f32
    %186 = vector.shape_cast %185 : vector<1x256xi1> to vector<1x256xi1>
    %187 = vector.broadcast %186 : vector<1x256xi1> to vector<2x256xi1>
    %188 = vector.broadcast %cst_32 : f32 to vector<2x256xf32>
    %189 = arith.select %187, %184, %188 : vector<2x256xi1>, vector<2x256xf32>
    %190 = arith.addf %175, %189 : vector<2x256xf32>
    %c45_i32 = arith.constant 45 : i32
    %191 = tpu.dynamic_rotate %23 by %c45_i32 dim 1 : vector<2x256xf32>, i32 -> vector<2x256xf32>
    %c45_i32_33 = arith.constant 45 : i32
    %192 = tpu.dynamic_rotate %26 by %c45_i32_33 dim 1 : vector<2x256xf32>, i32 -> vector<2x256xf32>
    %c6 = arith.constant 6 : index
    %193 = memref.load %arg3[%c6] : memref<98xf32, #tpu.memory_space<smem>>
    %194 = vector.broadcast %193 : f32 to vector<2x256xf32>
    %195 = arith.mulf %194, %191 : vector<2x256xf32>
    %c55 = arith.constant 55 : index
    %196 = memref.load %arg3[%c55] : memref<98xf32, #tpu.memory_space<smem>>
    %197 = vector.broadcast %196 : f32 to vector<2x256xf32>
    %198 = arith.mulf %197, %192 : vector<2x256xf32>
    %199 = arith.addf %195, %198 : vector<2x256xf32>
    %200 = arith.andi %34, %99 : vector<1x256xi1>
    %cst_34 = arith.constant 0.000000e+00 : f32
    %201 = vector.shape_cast %200 : vector<1x256xi1> to vector<1x256xi1>
    %202 = vector.broadcast %201 : vector<1x256xi1> to vector<2x256xi1>
    %203 = vector.broadcast %cst_34 : f32 to vector<2x256xf32>
    %204 = arith.select %202, %199, %203 : vector<2x256xi1>, vector<2x256xf32>
    %205 = arith.addf %190, %204 : vector<2x256xf32>
    %c35_i32 = arith.constant 35 : i32
    %206 = tpu.dynamic_rotate %23 by %c35_i32 dim 1 : vector<2x256xf32>, i32 -> vector<2x256xf32>
    %c35_i32_35 = arith.constant 35 : i32
    %207 = tpu.dynamic_rotate %26 by %c35_i32_35 dim 1 : vector<2x256xf32>, i32 -> vector<2x256xf32>
    %c7 = arith.constant 7 : index
    %208 = memref.load %arg3[%c7] : memref<98xf32, #tpu.memory_space<smem>>
    %209 = vector.broadcast %208 : f32 to vector<2x256xf32>
    %210 = arith.mulf %209, %206 : vector<2x256xf32>
    %c56 = arith.constant 56 : index
    %211 = memref.load %arg3[%c56] : memref<98xf32, #tpu.memory_space<smem>>
    %212 = vector.broadcast %211 : f32 to vector<2x256xf32>
    %213 = arith.mulf %212, %207 : vector<2x256xf32>
    %214 = arith.addf %210, %213 : vector<2x256xf32>
    %215 = arith.andi %39, %69 : vector<1x256xi1>
    %cst_36 = arith.constant 0.000000e+00 : f32
    %216 = vector.shape_cast %215 : vector<1x256xi1> to vector<1x256xi1>
    %217 = vector.broadcast %216 : vector<1x256xi1> to vector<2x256xi1>
    %218 = vector.broadcast %cst_36 : f32 to vector<2x256xf32>
    %219 = arith.select %217, %214, %218 : vector<2x256xi1>, vector<2x256xf32>
    %220 = arith.addf %205, %219 : vector<2x256xf32>
    %c34_i32 = arith.constant 34 : i32
    %221 = tpu.dynamic_rotate %23 by %c34_i32 dim 1 : vector<2x256xf32>, i32 -> vector<2x256xf32>
    %c34_i32_37 = arith.constant 34 : i32
    %222 = tpu.dynamic_rotate %26 by %c34_i32_37 dim 1 : vector<2x256xf32>, i32 -> vector<2x256xf32>
    %c8 = arith.constant 8 : index
    %223 = memref.load %arg3[%c8] : memref<98xf32, #tpu.memory_space<smem>>
    %224 = vector.broadcast %223 : f32 to vector<2x256xf32>
    %225 = arith.mulf %224, %221 : vector<2x256xf32>
    %c57 = arith.constant 57 : index
    %226 = memref.load %arg3[%c57] : memref<98xf32, #tpu.memory_space<smem>>
    %227 = vector.broadcast %226 : f32 to vector<2x256xf32>
    %228 = arith.mulf %227, %222 : vector<2x256xf32>
    %229 = arith.addf %225, %228 : vector<2x256xf32>
    %230 = arith.andi %39, %74 : vector<1x256xi1>
    %cst_38 = arith.constant 0.000000e+00 : f32
    %231 = vector.shape_cast %230 : vector<1x256xi1> to vector<1x256xi1>
    %232 = vector.broadcast %231 : vector<1x256xi1> to vector<2x256xi1>
    %233 = vector.broadcast %cst_38 : f32 to vector<2x256xf32>
    %234 = arith.select %232, %229, %233 : vector<2x256xi1>, vector<2x256xf32>
    %235 = arith.addf %220, %234 : vector<2x256xf32>
    %c33_i32 = arith.constant 33 : i32
    %236 = tpu.dynamic_rotate %23 by %c33_i32 dim 1 : vector<2x256xf32>, i32 -> vector<2x256xf32>
    %c33_i32_39 = arith.constant 33 : i32
    %237 = tpu.dynamic_rotate %26 by %c33_i32_39 dim 1 : vector<2x256xf32>, i32 -> vector<2x256xf32>
    %c9 = arith.constant 9 : index
    %238 = memref.load %arg3[%c9] : memref<98xf32, #tpu.memory_space<smem>>
    %239 = vector.broadcast %238 : f32 to vector<2x256xf32>
    %240 = arith.mulf %239, %236 : vector<2x256xf32>
    %c58 = arith.constant 58 : index
    %241 = memref.load %arg3[%c58] : memref<98xf32, #tpu.memory_space<smem>>
    %242 = vector.broadcast %241 : f32 to vector<2x256xf32>
    %243 = arith.mulf %242, %237 : vector<2x256xf32>
    %244 = arith.addf %240, %243 : vector<2x256xf32>
    %245 = arith.andi %39, %79 : vector<1x256xi1>
    %cst_40 = arith.constant 0.000000e+00 : f32
    %246 = vector.shape_cast %245 : vector<1x256xi1> to vector<1x256xi1>
    %247 = vector.broadcast %246 : vector<1x256xi1> to vector<2x256xi1>
    %248 = vector.broadcast %cst_40 : f32 to vector<2x256xf32>
    %249 = arith.select %247, %244, %248 : vector<2x256xi1>, vector<2x256xf32>
    %250 = arith.addf %235, %249 : vector<2x256xf32>
    %c32_i32_41 = arith.constant 32 : i32
    %251 = tpu.dynamic_rotate %23 by %c32_i32_41 dim 1 : vector<2x256xf32>, i32 -> vector<2x256xf32>
    %c32_i32_42 = arith.constant 32 : i32
    %252 = tpu.dynamic_rotate %26 by %c32_i32_42 dim 1 : vector<2x256xf32>, i32 -> vector<2x256xf32>
    %c10 = arith.constant 10 : index
    %253 = memref.load %arg3[%c10] : memref<98xf32, #tpu.memory_space<smem>>
    %254 = vector.broadcast %253 : f32 to vector<2x256xf32>
    %255 = arith.mulf %254, %251 : vector<2x256xf32>
    %c59 = arith.constant 59 : index
    %256 = memref.load %arg3[%c59] : memref<98xf32, #tpu.memory_space<smem>>
    %257 = vector.broadcast %256 : f32 to vector<2x256xf32>
    %258 = arith.mulf %257, %252 : vector<2x256xf32>
    %259 = arith.addf %255, %258 : vector<2x256xf32>
    %260 = arith.andi %39, %84 : vector<1x256xi1>
    %cst_43 = arith.constant 0.000000e+00 : f32
    %261 = vector.shape_cast %260 : vector<1x256xi1> to vector<1x256xi1>
    %262 = vector.broadcast %261 : vector<1x256xi1> to vector<2x256xi1>
    %263 = vector.broadcast %cst_43 : f32 to vector<2x256xf32>
    %264 = arith.select %262, %259, %263 : vector<2x256xi1>, vector<2x256xf32>
    %265 = arith.addf %250, %264 : vector<2x256xf32>
    %c31_i32 = arith.constant 31 : i32
    %266 = tpu.dynamic_rotate %23 by %c31_i32 dim 1 : vector<2x256xf32>, i32 -> vector<2x256xf32>
    %c31_i32_44 = arith.constant 31 : i32
    %267 = tpu.dynamic_rotate %26 by %c31_i32_44 dim 1 : vector<2x256xf32>, i32 -> vector<2x256xf32>
    %c11 = arith.constant 11 : index
    %268 = memref.load %arg3[%c11] : memref<98xf32, #tpu.memory_space<smem>>
    %269 = vector.broadcast %268 : f32 to vector<2x256xf32>
    %270 = arith.mulf %269, %266 : vector<2x256xf32>
    %c60 = arith.constant 60 : index
    %271 = memref.load %arg3[%c60] : memref<98xf32, #tpu.memory_space<smem>>
    %272 = vector.broadcast %271 : f32 to vector<2x256xf32>
    %273 = arith.mulf %272, %267 : vector<2x256xf32>
    %274 = arith.addf %270, %273 : vector<2x256xf32>
    %275 = arith.andi %39, %89 : vector<1x256xi1>
    %cst_45 = arith.constant 0.000000e+00 : f32
    %276 = vector.shape_cast %275 : vector<1x256xi1> to vector<1x256xi1>
    %277 = vector.broadcast %276 : vector<1x256xi1> to vector<2x256xi1>
    %278 = vector.broadcast %cst_45 : f32 to vector<2x256xf32>
    %279 = arith.select %277, %274, %278 : vector<2x256xi1>, vector<2x256xf32>
    %280 = arith.addf %265, %279 : vector<2x256xf32>
    %c30_i32 = arith.constant 30 : i32
    %281 = tpu.dynamic_rotate %23 by %c30_i32 dim 1 : vector<2x256xf32>, i32 -> vector<2x256xf32>
    %c30_i32_46 = arith.constant 30 : i32
    %282 = tpu.dynamic_rotate %26 by %c30_i32_46 dim 1 : vector<2x256xf32>, i32 -> vector<2x256xf32>
    %c12 = arith.constant 12 : index
    %283 = memref.load %arg3[%c12] : memref<98xf32, #tpu.memory_space<smem>>
    %284 = vector.broadcast %283 : f32 to vector<2x256xf32>
    %285 = arith.mulf %284, %281 : vector<2x256xf32>
    %c61 = arith.constant 61 : index
    %286 = memref.load %arg3[%c61] : memref<98xf32, #tpu.memory_space<smem>>
    %287 = vector.broadcast %286 : f32 to vector<2x256xf32>
    %288 = arith.mulf %287, %282 : vector<2x256xf32>
    %289 = arith.addf %285, %288 : vector<2x256xf32>
    %290 = arith.andi %39, %94 : vector<1x256xi1>
    %cst_47 = arith.constant 0.000000e+00 : f32
    %291 = vector.shape_cast %290 : vector<1x256xi1> to vector<1x256xi1>
    %292 = vector.broadcast %291 : vector<1x256xi1> to vector<2x256xi1>
    %293 = vector.broadcast %cst_47 : f32 to vector<2x256xf32>
    %294 = arith.select %292, %289, %293 : vector<2x256xi1>, vector<2x256xf32>
    %295 = arith.addf %280, %294 : vector<2x256xf32>
    %c29_i32 = arith.constant 29 : i32
    %296 = tpu.dynamic_rotate %23 by %c29_i32 dim 1 : vector<2x256xf32>, i32 -> vector<2x256xf32>
    %c29_i32_48 = arith.constant 29 : i32
    %297 = tpu.dynamic_rotate %26 by %c29_i32_48 dim 1 : vector<2x256xf32>, i32 -> vector<2x256xf32>
    %c13 = arith.constant 13 : index
    %298 = memref.load %arg3[%c13] : memref<98xf32, #tpu.memory_space<smem>>
    %299 = vector.broadcast %298 : f32 to vector<2x256xf32>
    %300 = arith.mulf %299, %296 : vector<2x256xf32>
    %c62 = arith.constant 62 : index
    %301 = memref.load %arg3[%c62] : memref<98xf32, #tpu.memory_space<smem>>
    %302 = vector.broadcast %301 : f32 to vector<2x256xf32>
    %303 = arith.mulf %302, %297 : vector<2x256xf32>
    %304 = arith.addf %300, %303 : vector<2x256xf32>
    %305 = arith.andi %39, %99 : vector<1x256xi1>
    %cst_49 = arith.constant 0.000000e+00 : f32
    %306 = vector.shape_cast %305 : vector<1x256xi1> to vector<1x256xi1>
    %307 = vector.broadcast %306 : vector<1x256xi1> to vector<2x256xi1>
    %308 = vector.broadcast %cst_49 : f32 to vector<2x256xf32>
    %309 = arith.select %307, %304, %308 : vector<2x256xi1>, vector<2x256xf32>
    %310 = arith.addf %295, %309 : vector<2x256xf32>
    %c19_i32_50 = arith.constant 19 : i32
    %311 = tpu.dynamic_rotate %23 by %c19_i32_50 dim 1 : vector<2x256xf32>, i32 -> vector<2x256xf32>
    %c19_i32_51 = arith.constant 19 : i32
    %312 = tpu.dynamic_rotate %26 by %c19_i32_51 dim 1 : vector<2x256xf32>, i32 -> vector<2x256xf32>
    %c14 = arith.constant 14 : index
    %313 = memref.load %arg3[%c14] : memref<98xf32, #tpu.memory_space<smem>>
    %314 = vector.broadcast %313 : f32 to vector<2x256xf32>
    %315 = arith.mulf %314, %311 : vector<2x256xf32>
    %c63 = arith.constant 63 : index
    %316 = memref.load %arg3[%c63] : memref<98xf32, #tpu.memory_space<smem>>
    %317 = vector.broadcast %316 : f32 to vector<2x256xf32>
    %318 = arith.mulf %317, %312 : vector<2x256xf32>
    %319 = arith.addf %315, %318 : vector<2x256xf32>
    %320 = arith.andi %44, %69 : vector<1x256xi1>
    %cst_52 = arith.constant 0.000000e+00 : f32
    %321 = vector.shape_cast %320 : vector<1x256xi1> to vector<1x256xi1>
    %322 = vector.broadcast %321 : vector<1x256xi1> to vector<2x256xi1>
    %323 = vector.broadcast %cst_52 : f32 to vector<2x256xf32>
    %324 = arith.select %322, %319, %323 : vector<2x256xi1>, vector<2x256xf32>
    %325 = arith.addf %310, %324 : vector<2x256xf32>
    %c18_i32_53 = arith.constant 18 : i32
    %326 = tpu.dynamic_rotate %23 by %c18_i32_53 dim 1 : vector<2x256xf32>, i32 -> vector<2x256xf32>
    %c18_i32_54 = arith.constant 18 : i32
    %327 = tpu.dynamic_rotate %26 by %c18_i32_54 dim 1 : vector<2x256xf32>, i32 -> vector<2x256xf32>
    %c15 = arith.constant 15 : index
    %328 = memref.load %arg3[%c15] : memref<98xf32, #tpu.memory_space<smem>>
    %329 = vector.broadcast %328 : f32 to vector<2x256xf32>
    %330 = arith.mulf %329, %326 : vector<2x256xf32>
    %c64 = arith.constant 64 : index
    %331 = memref.load %arg3[%c64] : memref<98xf32, #tpu.memory_space<smem>>
    %332 = vector.broadcast %331 : f32 to vector<2x256xf32>
    %333 = arith.mulf %332, %327 : vector<2x256xf32>
    %334 = arith.addf %330, %333 : vector<2x256xf32>
    %335 = arith.andi %44, %74 : vector<1x256xi1>
    %cst_55 = arith.constant 0.000000e+00 : f32
    %336 = vector.shape_cast %335 : vector<1x256xi1> to vector<1x256xi1>
    %337 = vector.broadcast %336 : vector<1x256xi1> to vector<2x256xi1>
    %338 = vector.broadcast %cst_55 : f32 to vector<2x256xf32>
    %339 = arith.select %337, %334, %338 : vector<2x256xi1>, vector<2x256xf32>
    %340 = arith.addf %325, %339 : vector<2x256xf32>
    %c17_i32_56 = arith.constant 17 : i32
    %341 = tpu.dynamic_rotate %23 by %c17_i32_56 dim 1 : vector<2x256xf32>, i32 -> vector<2x256xf32>
    %c17_i32_57 = arith.constant 17 : i32
    %342 = tpu.dynamic_rotate %26 by %c17_i32_57 dim 1 : vector<2x256xf32>, i32 -> vector<2x256xf32>
    %c16 = arith.constant 16 : index
    %343 = memref.load %arg3[%c16] : memref<98xf32, #tpu.memory_space<smem>>
    %344 = vector.broadcast %343 : f32 to vector<2x256xf32>
    %345 = arith.mulf %344, %341 : vector<2x256xf32>
    %c65 = arith.constant 65 : index
    %346 = memref.load %arg3[%c65] : memref<98xf32, #tpu.memory_space<smem>>
    %347 = vector.broadcast %346 : f32 to vector<2x256xf32>
    %348 = arith.mulf %347, %342 : vector<2x256xf32>
    %349 = arith.addf %345, %348 : vector<2x256xf32>
    %350 = arith.andi %44, %79 : vector<1x256xi1>
    %cst_58 = arith.constant 0.000000e+00 : f32
    %351 = vector.shape_cast %350 : vector<1x256xi1> to vector<1x256xi1>
    %352 = vector.broadcast %351 : vector<1x256xi1> to vector<2x256xi1>
    %353 = vector.broadcast %cst_58 : f32 to vector<2x256xf32>
    %354 = arith.select %352, %349, %353 : vector<2x256xi1>, vector<2x256xf32>
    %355 = arith.addf %340, %354 : vector<2x256xf32>
    %c16_i32_59 = arith.constant 16 : i32
    %356 = tpu.dynamic_rotate %23 by %c16_i32_59 dim 1 : vector<2x256xf32>, i32 -> vector<2x256xf32>
    %c16_i32_60 = arith.constant 16 : i32
    %357 = tpu.dynamic_rotate %26 by %c16_i32_60 dim 1 : vector<2x256xf32>, i32 -> vector<2x256xf32>
    %c17 = arith.constant 17 : index
    %358 = memref.load %arg3[%c17] : memref<98xf32, #tpu.memory_space<smem>>
    %359 = vector.broadcast %358 : f32 to vector<2x256xf32>
    %360 = arith.mulf %359, %356 : vector<2x256xf32>
    %c66 = arith.constant 66 : index
    %361 = memref.load %arg3[%c66] : memref<98xf32, #tpu.memory_space<smem>>
    %362 = vector.broadcast %361 : f32 to vector<2x256xf32>
    %363 = arith.mulf %362, %357 : vector<2x256xf32>
    %364 = arith.addf %360, %363 : vector<2x256xf32>
    %365 = arith.andi %44, %84 : vector<1x256xi1>
    %cst_61 = arith.constant 0.000000e+00 : f32
    %366 = vector.shape_cast %365 : vector<1x256xi1> to vector<1x256xi1>
    %367 = vector.broadcast %366 : vector<1x256xi1> to vector<2x256xi1>
    %368 = vector.broadcast %cst_61 : f32 to vector<2x256xf32>
    %369 = arith.select %367, %364, %368 : vector<2x256xi1>, vector<2x256xf32>
    %370 = arith.addf %355, %369 : vector<2x256xf32>
    %c15_i32_62 = arith.constant 15 : i32
    %371 = tpu.dynamic_rotate %23 by %c15_i32_62 dim 1 : vector<2x256xf32>, i32 -> vector<2x256xf32>
    %c15_i32_63 = arith.constant 15 : i32
    %372 = tpu.dynamic_rotate %26 by %c15_i32_63 dim 1 : vector<2x256xf32>, i32 -> vector<2x256xf32>
    %c18 = arith.constant 18 : index
    %373 = memref.load %arg3[%c18] : memref<98xf32, #tpu.memory_space<smem>>
    %374 = vector.broadcast %373 : f32 to vector<2x256xf32>
    %375 = arith.mulf %374, %371 : vector<2x256xf32>
    %c67 = arith.constant 67 : index
    %376 = memref.load %arg3[%c67] : memref<98xf32, #tpu.memory_space<smem>>
    %377 = vector.broadcast %376 : f32 to vector<2x256xf32>
    %378 = arith.mulf %377, %372 : vector<2x256xf32>
    %379 = arith.addf %375, %378 : vector<2x256xf32>
    %380 = arith.andi %44, %89 : vector<1x256xi1>
    %cst_64 = arith.constant 0.000000e+00 : f32
    %381 = vector.shape_cast %380 : vector<1x256xi1> to vector<1x256xi1>
    %382 = vector.broadcast %381 : vector<1x256xi1> to vector<2x256xi1>
    %383 = vector.broadcast %cst_64 : f32 to vector<2x256xf32>
    %384 = arith.select %382, %379, %383 : vector<2x256xi1>, vector<2x256xf32>
    %385 = arith.addf %370, %384 : vector<2x256xf32>
    %c14_i32_65 = arith.constant 14 : i32
    %386 = tpu.dynamic_rotate %23 by %c14_i32_65 dim 1 : vector<2x256xf32>, i32 -> vector<2x256xf32>
    %c14_i32_66 = arith.constant 14 : i32
    %387 = tpu.dynamic_rotate %26 by %c14_i32_66 dim 1 : vector<2x256xf32>, i32 -> vector<2x256xf32>
    %c19 = arith.constant 19 : index
    %388 = memref.load %arg3[%c19] : memref<98xf32, #tpu.memory_space<smem>>
    %389 = vector.broadcast %388 : f32 to vector<2x256xf32>
    %390 = arith.mulf %389, %386 : vector<2x256xf32>
    %c68 = arith.constant 68 : index
    %391 = memref.load %arg3[%c68] : memref<98xf32, #tpu.memory_space<smem>>
    %392 = vector.broadcast %391 : f32 to vector<2x256xf32>
    %393 = arith.mulf %392, %387 : vector<2x256xf32>
    %394 = arith.addf %390, %393 : vector<2x256xf32>
    %395 = arith.andi %44, %94 : vector<1x256xi1>
    %cst_67 = arith.constant 0.000000e+00 : f32
    %396 = vector.shape_cast %395 : vector<1x256xi1> to vector<1x256xi1>
    %397 = vector.broadcast %396 : vector<1x256xi1> to vector<2x256xi1>
    %398 = vector.broadcast %cst_67 : f32 to vector<2x256xf32>
    %399 = arith.select %397, %394, %398 : vector<2x256xi1>, vector<2x256xf32>
    %400 = arith.addf %385, %399 : vector<2x256xf32>
    %c13_i32_68 = arith.constant 13 : i32
    %401 = tpu.dynamic_rotate %23 by %c13_i32_68 dim 1 : vector<2x256xf32>, i32 -> vector<2x256xf32>
    %c13_i32_69 = arith.constant 13 : i32
    %402 = tpu.dynamic_rotate %26 by %c13_i32_69 dim 1 : vector<2x256xf32>, i32 -> vector<2x256xf32>
    %c20 = arith.constant 20 : index
    %403 = memref.load %arg3[%c20] : memref<98xf32, #tpu.memory_space<smem>>
    %404 = vector.broadcast %403 : f32 to vector<2x256xf32>
    %405 = arith.mulf %404, %401 : vector<2x256xf32>
    %c69 = arith.constant 69 : index
    %406 = memref.load %arg3[%c69] : memref<98xf32, #tpu.memory_space<smem>>
    %407 = vector.broadcast %406 : f32 to vector<2x256xf32>
    %408 = arith.mulf %407, %402 : vector<2x256xf32>
    %409 = arith.addf %405, %408 : vector<2x256xf32>
    %410 = arith.andi %44, %99 : vector<1x256xi1>
    %cst_70 = arith.constant 0.000000e+00 : f32
    %411 = vector.shape_cast %410 : vector<1x256xi1> to vector<1x256xi1>
    %412 = vector.broadcast %411 : vector<1x256xi1> to vector<2x256xi1>
    %413 = vector.broadcast %cst_70 : f32 to vector<2x256xf32>
    %414 = arith.select %412, %409, %413 : vector<2x256xi1>, vector<2x256xf32>
    %415 = arith.addf %400, %414 : vector<2x256xf32>
    %c3_i32_71 = arith.constant 3 : i32
    %416 = tpu.dynamic_rotate %23 by %c3_i32_71 dim 1 : vector<2x256xf32>, i32 -> vector<2x256xf32>
    %c3_i32_72 = arith.constant 3 : i32
    %417 = tpu.dynamic_rotate %26 by %c3_i32_72 dim 1 : vector<2x256xf32>, i32 -> vector<2x256xf32>
    %c21 = arith.constant 21 : index
    %418 = memref.load %arg3[%c21] : memref<98xf32, #tpu.memory_space<smem>>
    %419 = vector.broadcast %418 : f32 to vector<2x256xf32>
    %420 = arith.mulf %419, %416 : vector<2x256xf32>
    %c70 = arith.constant 70 : index
    %421 = memref.load %arg3[%c70] : memref<98xf32, #tpu.memory_space<smem>>
    %422 = vector.broadcast %421 : f32 to vector<2x256xf32>
    %423 = arith.mulf %422, %417 : vector<2x256xf32>
    %424 = arith.addf %420, %423 : vector<2x256xf32>
    %425 = arith.andi %49, %69 : vector<1x256xi1>
    %cst_73 = arith.constant 0.000000e+00 : f32
    %426 = vector.shape_cast %425 : vector<1x256xi1> to vector<1x256xi1>
    %427 = vector.broadcast %426 : vector<1x256xi1> to vector<2x256xi1>
    %428 = vector.broadcast %cst_73 : f32 to vector<2x256xf32>
    %429 = arith.select %427, %424, %428 : vector<2x256xi1>, vector<2x256xf32>
    %430 = arith.addf %415, %429 : vector<2x256xf32>
    %c2_i32_74 = arith.constant 2 : i32
    %431 = tpu.dynamic_rotate %23 by %c2_i32_74 dim 1 : vector<2x256xf32>, i32 -> vector<2x256xf32>
    %c2_i32_75 = arith.constant 2 : i32
    %432 = tpu.dynamic_rotate %26 by %c2_i32_75 dim 1 : vector<2x256xf32>, i32 -> vector<2x256xf32>
    %c22 = arith.constant 22 : index
    %433 = memref.load %arg3[%c22] : memref<98xf32, #tpu.memory_space<smem>>
    %434 = vector.broadcast %433 : f32 to vector<2x256xf32>
    %435 = arith.mulf %434, %431 : vector<2x256xf32>
    %c71 = arith.constant 71 : index
    %436 = memref.load %arg3[%c71] : memref<98xf32, #tpu.memory_space<smem>>
    %437 = vector.broadcast %436 : f32 to vector<2x256xf32>
    %438 = arith.mulf %437, %432 : vector<2x256xf32>
    %439 = arith.addf %435, %438 : vector<2x256xf32>
    %440 = arith.andi %49, %74 : vector<1x256xi1>
    %cst_76 = arith.constant 0.000000e+00 : f32
    %441 = vector.shape_cast %440 : vector<1x256xi1> to vector<1x256xi1>
    %442 = vector.broadcast %441 : vector<1x256xi1> to vector<2x256xi1>
    %443 = vector.broadcast %cst_76 : f32 to vector<2x256xf32>
    %444 = arith.select %442, %439, %443 : vector<2x256xi1>, vector<2x256xf32>
    %445 = arith.addf %430, %444 : vector<2x256xf32>
    %c1_i32_77 = arith.constant 1 : i32
    %446 = tpu.dynamic_rotate %23 by %c1_i32_77 dim 1 : vector<2x256xf32>, i32 -> vector<2x256xf32>
    %c1_i32_78 = arith.constant 1 : i32
    %447 = tpu.dynamic_rotate %26 by %c1_i32_78 dim 1 : vector<2x256xf32>, i32 -> vector<2x256xf32>
    %c23 = arith.constant 23 : index
    %448 = memref.load %arg3[%c23] : memref<98xf32, #tpu.memory_space<smem>>
    %449 = vector.broadcast %448 : f32 to vector<2x256xf32>
    %450 = arith.mulf %449, %446 : vector<2x256xf32>
    %c72 = arith.constant 72 : index
    %451 = memref.load %arg3[%c72] : memref<98xf32, #tpu.memory_space<smem>>
    %452 = vector.broadcast %451 : f32 to vector<2x256xf32>
    %453 = arith.mulf %452, %447 : vector<2x256xf32>
    %454 = arith.addf %450, %453 : vector<2x256xf32>
    %455 = arith.andi %49, %79 : vector<1x256xi1>
    %cst_79 = arith.constant 0.000000e+00 : f32
    %456 = vector.shape_cast %455 : vector<1x256xi1> to vector<1x256xi1>
    %457 = vector.broadcast %456 : vector<1x256xi1> to vector<2x256xi1>
    %458 = vector.broadcast %cst_79 : f32 to vector<2x256xf32>
    %459 = arith.select %457, %454, %458 : vector<2x256xi1>, vector<2x256xf32>
    %460 = arith.addf %445, %459 : vector<2x256xf32>
    %c24 = arith.constant 24 : index
    %461 = memref.load %arg3[%c24] : memref<98xf32, #tpu.memory_space<smem>>
    %462 = vector.broadcast %461 : f32 to vector<2x256xf32>
    %463 = arith.mulf %462, %23 : vector<2x256xf32>
    %c73 = arith.constant 73 : index
    %464 = memref.load %arg3[%c73] : memref<98xf32, #tpu.memory_space<smem>>
    %465 = vector.broadcast %464 : f32 to vector<2x256xf32>
    %466 = arith.mulf %465, %26 : vector<2x256xf32>
    %467 = arith.addf %463, %466 : vector<2x256xf32>
    %468 = arith.andi %49, %84 : vector<1x256xi1>
    %cst_80 = arith.constant 0.000000e+00 : f32
    %469 = vector.shape_cast %468 : vector<1x256xi1> to vector<1x256xi1>
    %470 = vector.broadcast %469 : vector<1x256xi1> to vector<2x256xi1>
    %471 = vector.broadcast %cst_80 : f32 to vector<2x256xf32>
    %472 = arith.select %470, %467, %471 : vector<2x256xi1>, vector<2x256xf32>
    %473 = arith.addf %460, %472 : vector<2x256xf32>
    %c255_i32 = arith.constant 255 : i32
    %474 = tpu.dynamic_rotate %23 by %c255_i32 dim 1 : vector<2x256xf32>, i32 -> vector<2x256xf32>
    %c255_i32_81 = arith.constant 255 : i32
    %475 = tpu.dynamic_rotate %26 by %c255_i32_81 dim 1 : vector<2x256xf32>, i32 -> vector<2x256xf32>
    %c25 = arith.constant 25 : index
    %476 = memref.load %arg3[%c25] : memref<98xf32, #tpu.memory_space<smem>>
    %477 = vector.broadcast %476 : f32 to vector<2x256xf32>
    %478 = arith.mulf %477, %474 : vector<2x256xf32>
    %c74 = arith.constant 74 : index
    %479 = memref.load %arg3[%c74] : memref<98xf32, #tpu.memory_space<smem>>
    %480 = vector.broadcast %479 : f32 to vector<2x256xf32>
    %481 = arith.mulf %480, %475 : vector<2x256xf32>
    %482 = arith.addf %478, %481 : vector<2x256xf32>
    %483 = arith.andi %49, %89 : vector<1x256xi1>
    %cst_82 = arith.constant 0.000000e+00 : f32
    %484 = vector.shape_cast %483 : vector<1x256xi1> to vector<1x256xi1>
    %485 = vector.broadcast %484 : vector<1x256xi1> to vector<2x256xi1>
    %486 = vector.broadcast %cst_82 : f32 to vector<2x256xf32>
    %487 = arith.select %485, %482, %486 : vector<2x256xi1>, vector<2x256xf32>
    %488 = arith.addf %473, %487 : vector<2x256xf32>
    %c254_i32 = arith.constant 254 : i32
    %489 = tpu.dynamic_rotate %23 by %c254_i32 dim 1 : vector<2x256xf32>, i32 -> vector<2x256xf32>
    %c254_i32_83 = arith.constant 254 : i32
    %490 = tpu.dynamic_rotate %26 by %c254_i32_83 dim 1 : vector<2x256xf32>, i32 -> vector<2x256xf32>
    %c26 = arith.constant 26 : index
    %491 = memref.load %arg3[%c26] : memref<98xf32, #tpu.memory_space<smem>>
    %492 = vector.broadcast %491 : f32 to vector<2x256xf32>
    %493 = arith.mulf %492, %489 : vector<2x256xf32>
    %c75 = arith.constant 75 : index
    %494 = memref.load %arg3[%c75] : memref<98xf32, #tpu.memory_space<smem>>
    %495 = vector.broadcast %494 : f32 to vector<2x256xf32>
    %496 = arith.mulf %495, %490 : vector<2x256xf32>
    %497 = arith.addf %493, %496 : vector<2x256xf32>
    %498 = arith.andi %49, %94 : vector<1x256xi1>
    %cst_84 = arith.constant 0.000000e+00 : f32
    %499 = vector.shape_cast %498 : vector<1x256xi1> to vector<1x256xi1>
    %500 = vector.broadcast %499 : vector<1x256xi1> to vector<2x256xi1>
    %501 = vector.broadcast %cst_84 : f32 to vector<2x256xf32>
    %502 = arith.select %500, %497, %501 : vector<2x256xi1>, vector<2x256xf32>
    %503 = arith.addf %488, %502 : vector<2x256xf32>
    %c253_i32 = arith.constant 253 : i32
    %504 = tpu.dynamic_rotate %23 by %c253_i32 dim 1 : vector<2x256xf32>, i32 -> vector<2x256xf32>
    %c253_i32_85 = arith.constant 253 : i32
    %505 = tpu.dynamic_rotate %26 by %c253_i32_85 dim 1 : vector<2x256xf32>, i32 -> vector<2x256xf32>
    %c27 = arith.constant 27 : index
    %506 = memref.load %arg3[%c27] : memref<98xf32, #tpu.memory_space<smem>>
    %507 = vector.broadcast %506 : f32 to vector<2x256xf32>
    %508 = arith.mulf %507, %504 : vector<2x256xf32>
    %c76 = arith.constant 76 : index
    %509 = memref.load %arg3[%c76] : memref<98xf32, #tpu.memory_space<smem>>
    %510 = vector.broadcast %509 : f32 to vector<2x256xf32>
    %511 = arith.mulf %510, %505 : vector<2x256xf32>
    %512 = arith.addf %508, %511 : vector<2x256xf32>
    %513 = arith.andi %49, %99 : vector<1x256xi1>
    %cst_86 = arith.constant 0.000000e+00 : f32
    %514 = vector.shape_cast %513 : vector<1x256xi1> to vector<1x256xi1>
    %515 = vector.broadcast %514 : vector<1x256xi1> to vector<2x256xi1>
    %516 = vector.broadcast %cst_86 : f32 to vector<2x256xf32>
    %517 = arith.select %515, %512, %516 : vector<2x256xi1>, vector<2x256xf32>
    %518 = arith.addf %503, %517 : vector<2x256xf32>
    %c243_i32 = arith.constant 243 : i32
    %519 = tpu.dynamic_rotate %23 by %c243_i32 dim 1 : vector<2x256xf32>, i32 -> vector<2x256xf32>
    %c243_i32_87 = arith.constant 243 : i32
    %520 = tpu.dynamic_rotate %26 by %c243_i32_87 dim 1 : vector<2x256xf32>, i32 -> vector<2x256xf32>
    %c28 = arith.constant 28 : index
    %521 = memref.load %arg3[%c28] : memref<98xf32, #tpu.memory_space<smem>>
    %522 = vector.broadcast %521 : f32 to vector<2x256xf32>
    %523 = arith.mulf %522, %519 : vector<2x256xf32>
    %c77 = arith.constant 77 : index
    %524 = memref.load %arg3[%c77] : memref<98xf32, #tpu.memory_space<smem>>
    %525 = vector.broadcast %524 : f32 to vector<2x256xf32>
    %526 = arith.mulf %525, %520 : vector<2x256xf32>
    %527 = arith.addf %523, %526 : vector<2x256xf32>
    %528 = arith.andi %54, %69 : vector<1x256xi1>
    %cst_88 = arith.constant 0.000000e+00 : f32
    %529 = vector.shape_cast %528 : vector<1x256xi1> to vector<1x256xi1>
    %530 = vector.broadcast %529 : vector<1x256xi1> to vector<2x256xi1>
    %531 = vector.broadcast %cst_88 : f32 to vector<2x256xf32>
    %532 = arith.select %530, %527, %531 : vector<2x256xi1>, vector<2x256xf32>
    %533 = arith.addf %518, %532 : vector<2x256xf32>
    %c242_i32 = arith.constant 242 : i32
    %534 = tpu.dynamic_rotate %23 by %c242_i32 dim 1 : vector<2x256xf32>, i32 -> vector<2x256xf32>
    %c242_i32_89 = arith.constant 242 : i32
    %535 = tpu.dynamic_rotate %26 by %c242_i32_89 dim 1 : vector<2x256xf32>, i32 -> vector<2x256xf32>
    %c29 = arith.constant 29 : index
    %536 = memref.load %arg3[%c29] : memref<98xf32, #tpu.memory_space<smem>>
    %537 = vector.broadcast %536 : f32 to vector<2x256xf32>
    %538 = arith.mulf %537, %534 : vector<2x256xf32>
    %c78 = arith.constant 78 : index
    %539 = memref.load %arg3[%c78] : memref<98xf32, #tpu.memory_space<smem>>
    %540 = vector.broadcast %539 : f32 to vector<2x256xf32>
    %541 = arith.mulf %540, %535 : vector<2x256xf32>
    %542 = arith.addf %538, %541 : vector<2x256xf32>
    %543 = arith.andi %54, %74 : vector<1x256xi1>
    %cst_90 = arith.constant 0.000000e+00 : f32
    %544 = vector.shape_cast %543 : vector<1x256xi1> to vector<1x256xi1>
    %545 = vector.broadcast %544 : vector<1x256xi1> to vector<2x256xi1>
    %546 = vector.broadcast %cst_90 : f32 to vector<2x256xf32>
    %547 = arith.select %545, %542, %546 : vector<2x256xi1>, vector<2x256xf32>
    %548 = arith.addf %533, %547 : vector<2x256xf32>
    %c241_i32 = arith.constant 241 : i32
    %549 = tpu.dynamic_rotate %23 by %c241_i32 dim 1 : vector<2x256xf32>, i32 -> vector<2x256xf32>
    %c241_i32_91 = arith.constant 241 : i32
    %550 = tpu.dynamic_rotate %26 by %c241_i32_91 dim 1 : vector<2x256xf32>, i32 -> vector<2x256xf32>
    %c30 = arith.constant 30 : index
    %551 = memref.load %arg3[%c30] : memref<98xf32, #tpu.memory_space<smem>>
    %552 = vector.broadcast %551 : f32 to vector<2x256xf32>
    %553 = arith.mulf %552, %549 : vector<2x256xf32>
    %c79 = arith.constant 79 : index
    %554 = memref.load %arg3[%c79] : memref<98xf32, #tpu.memory_space<smem>>
    %555 = vector.broadcast %554 : f32 to vector<2x256xf32>
    %556 = arith.mulf %555, %550 : vector<2x256xf32>
    %557 = arith.addf %553, %556 : vector<2x256xf32>
    %558 = arith.andi %54, %79 : vector<1x256xi1>
    %cst_92 = arith.constant 0.000000e+00 : f32
    %559 = vector.shape_cast %558 : vector<1x256xi1> to vector<1x256xi1>
    %560 = vector.broadcast %559 : vector<1x256xi1> to vector<2x256xi1>
    %561 = vector.broadcast %cst_92 : f32 to vector<2x256xf32>
    %562 = arith.select %560, %557, %561 : vector<2x256xi1>, vector<2x256xf32>
    %563 = arith.addf %548, %562 : vector<2x256xf32>
    %c240_i32_93 = arith.constant 240 : i32
    %564 = tpu.dynamic_rotate %23 by %c240_i32_93 dim 1 : vector<2x256xf32>, i32 -> vector<2x256xf32>
    %c240_i32_94 = arith.constant 240 : i32
    %565 = tpu.dynamic_rotate %26 by %c240_i32_94 dim 1 : vector<2x256xf32>, i32 -> vector<2x256xf32>
    %c31 = arith.constant 31 : index
    %566 = memref.load %arg3[%c31] : memref<98xf32, #tpu.memory_space<smem>>
    %567 = vector.broadcast %566 : f32 to vector<2x256xf32>
    %568 = arith.mulf %567, %564 : vector<2x256xf32>
    %c80 = arith.constant 80 : index
    %569 = memref.load %arg3[%c80] : memref<98xf32, #tpu.memory_space<smem>>
    %570 = vector.broadcast %569 : f32 to vector<2x256xf32>
    %571 = arith.mulf %570, %565 : vector<2x256xf32>
    %572 = arith.addf %568, %571 : vector<2x256xf32>
    %573 = arith.andi %54, %84 : vector<1x256xi1>
    %cst_95 = arith.constant 0.000000e+00 : f32
    %574 = vector.shape_cast %573 : vector<1x256xi1> to vector<1x256xi1>
    %575 = vector.broadcast %574 : vector<1x256xi1> to vector<2x256xi1>
    %576 = vector.broadcast %cst_95 : f32 to vector<2x256xf32>
    %577 = arith.select %575, %572, %576 : vector<2x256xi1>, vector<2x256xf32>
    %578 = arith.addf %563, %577 : vector<2x256xf32>
    %c239_i32 = arith.constant 239 : i32
    %579 = tpu.dynamic_rotate %23 by %c239_i32 dim 1 : vector<2x256xf32>, i32 -> vector<2x256xf32>
    %c239_i32_96 = arith.constant 239 : i32
    %580 = tpu.dynamic_rotate %26 by %c239_i32_96 dim 1 : vector<2x256xf32>, i32 -> vector<2x256xf32>
    %c32 = arith.constant 32 : index
    %581 = memref.load %arg3[%c32] : memref<98xf32, #tpu.memory_space<smem>>
    %582 = vector.broadcast %581 : f32 to vector<2x256xf32>
    %583 = arith.mulf %582, %579 : vector<2x256xf32>
    %c81 = arith.constant 81 : index
    %584 = memref.load %arg3[%c81] : memref<98xf32, #tpu.memory_space<smem>>
    %585 = vector.broadcast %584 : f32 to vector<2x256xf32>
    %586 = arith.mulf %585, %580 : vector<2x256xf32>
    %587 = arith.addf %583, %586 : vector<2x256xf32>
    %588 = arith.andi %54, %89 : vector<1x256xi1>
    %cst_97 = arith.constant 0.000000e+00 : f32
    %589 = vector.shape_cast %588 : vector<1x256xi1> to vector<1x256xi1>
    %590 = vector.broadcast %589 : vector<1x256xi1> to vector<2x256xi1>
    %591 = vector.broadcast %cst_97 : f32 to vector<2x256xf32>
    %592 = arith.select %590, %587, %591 : vector<2x256xi1>, vector<2x256xf32>
    %593 = arith.addf %578, %592 : vector<2x256xf32>
    %c238_i32 = arith.constant 238 : i32
    %594 = tpu.dynamic_rotate %23 by %c238_i32 dim 1 : vector<2x256xf32>, i32 -> vector<2x256xf32>
    %c238_i32_98 = arith.constant 238 : i32
    %595 = tpu.dynamic_rotate %26 by %c238_i32_98 dim 1 : vector<2x256xf32>, i32 -> vector<2x256xf32>
    %c33 = arith.constant 33 : index
    %596 = memref.load %arg3[%c33] : memref<98xf32, #tpu.memory_space<smem>>
    %597 = vector.broadcast %596 : f32 to vector<2x256xf32>
    %598 = arith.mulf %597, %594 : vector<2x256xf32>
    %c82 = arith.constant 82 : index
    %599 = memref.load %arg3[%c82] : memref<98xf32, #tpu.memory_space<smem>>
    %600 = vector.broadcast %599 : f32 to vector<2x256xf32>
    %601 = arith.mulf %600, %595 : vector<2x256xf32>
    %602 = arith.addf %598, %601 : vector<2x256xf32>
    %603 = arith.andi %54, %94 : vector<1x256xi1>
    %cst_99 = arith.constant 0.000000e+00 : f32
    %604 = vector.shape_cast %603 : vector<1x256xi1> to vector<1x256xi1>
    %605 = vector.broadcast %604 : vector<1x256xi1> to vector<2x256xi1>
    %606 = vector.broadcast %cst_99 : f32 to vector<2x256xf32>
    %607 = arith.select %605, %602, %606 : vector<2x256xi1>, vector<2x256xf32>
    %608 = arith.addf %593, %607 : vector<2x256xf32>
    %c237_i32 = arith.constant 237 : i32
    %609 = tpu.dynamic_rotate %23 by %c237_i32 dim 1 : vector<2x256xf32>, i32 -> vector<2x256xf32>
    %c237_i32_100 = arith.constant 237 : i32
    %610 = tpu.dynamic_rotate %26 by %c237_i32_100 dim 1 : vector<2x256xf32>, i32 -> vector<2x256xf32>
    %c34 = arith.constant 34 : index
    %611 = memref.load %arg3[%c34] : memref<98xf32, #tpu.memory_space<smem>>
    %612 = vector.broadcast %611 : f32 to vector<2x256xf32>
    %613 = arith.mulf %612, %609 : vector<2x256xf32>
    %c83 = arith.constant 83 : index
    %614 = memref.load %arg3[%c83] : memref<98xf32, #tpu.memory_space<smem>>
    %615 = vector.broadcast %614 : f32 to vector<2x256xf32>
    %616 = arith.mulf %615, %610 : vector<2x256xf32>
    %617 = arith.addf %613, %616 : vector<2x256xf32>
    %618 = arith.andi %54, %99 : vector<1x256xi1>
    %cst_101 = arith.constant 0.000000e+00 : f32
    %619 = vector.shape_cast %618 : vector<1x256xi1> to vector<1x256xi1>
    %620 = vector.broadcast %619 : vector<1x256xi1> to vector<2x256xi1>
    %621 = vector.broadcast %cst_101 : f32 to vector<2x256xf32>
    %622 = arith.select %620, %617, %621 : vector<2x256xi1>, vector<2x256xf32>
    %623 = arith.addf %608, %622 : vector<2x256xf32>
    %c227_i32 = arith.constant 227 : i32
    %624 = tpu.dynamic_rotate %23 by %c227_i32 dim 1 : vector<2x256xf32>, i32 -> vector<2x256xf32>
    %c227_i32_102 = arith.constant 227 : i32
    %625 = tpu.dynamic_rotate %26 by %c227_i32_102 dim 1 : vector<2x256xf32>, i32 -> vector<2x256xf32>
    %c35 = arith.constant 35 : index
    %626 = memref.load %arg3[%c35] : memref<98xf32, #tpu.memory_space<smem>>
    %627 = vector.broadcast %626 : f32 to vector<2x256xf32>
    %628 = arith.mulf %627, %624 : vector<2x256xf32>
    %c84 = arith.constant 84 : index
    %629 = memref.load %arg3[%c84] : memref<98xf32, #tpu.memory_space<smem>>
    %630 = vector.broadcast %629 : f32 to vector<2x256xf32>
    %631 = arith.mulf %630, %625 : vector<2x256xf32>
    %632 = arith.addf %628, %631 : vector<2x256xf32>
    %633 = arith.andi %59, %69 : vector<1x256xi1>
    %cst_103 = arith.constant 0.000000e+00 : f32
    %634 = vector.shape_cast %633 : vector<1x256xi1> to vector<1x256xi1>
    %635 = vector.broadcast %634 : vector<1x256xi1> to vector<2x256xi1>
    %636 = vector.broadcast %cst_103 : f32 to vector<2x256xf32>
    %637 = arith.select %635, %632, %636 : vector<2x256xi1>, vector<2x256xf32>
    %638 = arith.addf %623, %637 : vector<2x256xf32>
    %c226_i32 = arith.constant 226 : i32
    %639 = tpu.dynamic_rotate %23 by %c226_i32 dim 1 : vector<2x256xf32>, i32 -> vector<2x256xf32>
    %c226_i32_104 = arith.constant 226 : i32
    %640 = tpu.dynamic_rotate %26 by %c226_i32_104 dim 1 : vector<2x256xf32>, i32 -> vector<2x256xf32>
    %c36 = arith.constant 36 : index
    %641 = memref.load %arg3[%c36] : memref<98xf32, #tpu.memory_space<smem>>
    %642 = vector.broadcast %641 : f32 to vector<2x256xf32>
    %643 = arith.mulf %642, %639 : vector<2x256xf32>
    %c85 = arith.constant 85 : index
    %644 = memref.load %arg3[%c85] : memref<98xf32, #tpu.memory_space<smem>>
    %645 = vector.broadcast %644 : f32 to vector<2x256xf32>
    %646 = arith.mulf %645, %640 : vector<2x256xf32>
    %647 = arith.addf %643, %646 : vector<2x256xf32>
    %648 = arith.andi %59, %74 : vector<1x256xi1>
    %cst_105 = arith.constant 0.000000e+00 : f32
    %649 = vector.shape_cast %648 : vector<1x256xi1> to vector<1x256xi1>
    %650 = vector.broadcast %649 : vector<1x256xi1> to vector<2x256xi1>
    %651 = vector.broadcast %cst_105 : f32 to vector<2x256xf32>
    %652 = arith.select %650, %647, %651 : vector<2x256xi1>, vector<2x256xf32>
    %653 = arith.addf %638, %652 : vector<2x256xf32>
    %c225_i32 = arith.constant 225 : i32
    %654 = tpu.dynamic_rotate %23 by %c225_i32 dim 1 : vector<2x256xf32>, i32 -> vector<2x256xf32>
    %c225_i32_106 = arith.constant 225 : i32
    %655 = tpu.dynamic_rotate %26 by %c225_i32_106 dim 1 : vector<2x256xf32>, i32 -> vector<2x256xf32>
    %c37 = arith.constant 37 : index
    %656 = memref.load %arg3[%c37] : memref<98xf32, #tpu.memory_space<smem>>
    %657 = vector.broadcast %656 : f32 to vector<2x256xf32>
    %658 = arith.mulf %657, %654 : vector<2x256xf32>
    %c86 = arith.constant 86 : index
    %659 = memref.load %arg3[%c86] : memref<98xf32, #tpu.memory_space<smem>>
    %660 = vector.broadcast %659 : f32 to vector<2x256xf32>
    %661 = arith.mulf %660, %655 : vector<2x256xf32>
    %662 = arith.addf %658, %661 : vector<2x256xf32>
    %663 = arith.andi %59, %79 : vector<1x256xi1>
    %cst_107 = arith.constant 0.000000e+00 : f32
    %664 = vector.shape_cast %663 : vector<1x256xi1> to vector<1x256xi1>
    %665 = vector.broadcast %664 : vector<1x256xi1> to vector<2x256xi1>
    %666 = vector.broadcast %cst_107 : f32 to vector<2x256xf32>
    %667 = arith.select %665, %662, %666 : vector<2x256xi1>, vector<2x256xf32>
    %668 = arith.addf %653, %667 : vector<2x256xf32>
    %c224_i32_108 = arith.constant 224 : i32
    %669 = tpu.dynamic_rotate %23 by %c224_i32_108 dim 1 : vector<2x256xf32>, i32 -> vector<2x256xf32>
    %c224_i32_109 = arith.constant 224 : i32
    %670 = tpu.dynamic_rotate %26 by %c224_i32_109 dim 1 : vector<2x256xf32>, i32 -> vector<2x256xf32>
    %c38 = arith.constant 38 : index
    %671 = memref.load %arg3[%c38] : memref<98xf32, #tpu.memory_space<smem>>
    %672 = vector.broadcast %671 : f32 to vector<2x256xf32>
    %673 = arith.mulf %672, %669 : vector<2x256xf32>
    %c87 = arith.constant 87 : index
    %674 = memref.load %arg3[%c87] : memref<98xf32, #tpu.memory_space<smem>>
    %675 = vector.broadcast %674 : f32 to vector<2x256xf32>
    %676 = arith.mulf %675, %670 : vector<2x256xf32>
    %677 = arith.addf %673, %676 : vector<2x256xf32>
    %678 = arith.andi %59, %84 : vector<1x256xi1>
    %cst_110 = arith.constant 0.000000e+00 : f32
    %679 = vector.shape_cast %678 : vector<1x256xi1> to vector<1x256xi1>
    %680 = vector.broadcast %679 : vector<1x256xi1> to vector<2x256xi1>
    %681 = vector.broadcast %cst_110 : f32 to vector<2x256xf32>
    %682 = arith.select %680, %677, %681 : vector<2x256xi1>, vector<2x256xf32>
    %683 = arith.addf %668, %682 : vector<2x256xf32>
    %c223_i32 = arith.constant 223 : i32
    %684 = tpu.dynamic_rotate %23 by %c223_i32 dim 1 : vector<2x256xf32>, i32 -> vector<2x256xf32>
    %c223_i32_111 = arith.constant 223 : i32
    %685 = tpu.dynamic_rotate %26 by %c223_i32_111 dim 1 : vector<2x256xf32>, i32 -> vector<2x256xf32>
    %c39 = arith.constant 39 : index
    %686 = memref.load %arg3[%c39] : memref<98xf32, #tpu.memory_space<smem>>
    %687 = vector.broadcast %686 : f32 to vector<2x256xf32>
    %688 = arith.mulf %687, %684 : vector<2x256xf32>
    %c88 = arith.constant 88 : index
    %689 = memref.load %arg3[%c88] : memref<98xf32, #tpu.memory_space<smem>>
    %690 = vector.broadcast %689 : f32 to vector<2x256xf32>
    %691 = arith.mulf %690, %685 : vector<2x256xf32>
    %692 = arith.addf %688, %691 : vector<2x256xf32>
    %693 = arith.andi %59, %89 : vector<1x256xi1>
    %cst_112 = arith.constant 0.000000e+00 : f32
    %694 = vector.shape_cast %693 : vector<1x256xi1> to vector<1x256xi1>
    %695 = vector.broadcast %694 : vector<1x256xi1> to vector<2x256xi1>
    %696 = vector.broadcast %cst_112 : f32 to vector<2x256xf32>
    %697 = arith.select %695, %692, %696 : vector<2x256xi1>, vector<2x256xf32>
    %698 = arith.addf %683, %697 : vector<2x256xf32>
    %c222_i32 = arith.constant 222 : i32
    %699 = tpu.dynamic_rotate %23 by %c222_i32 dim 1 : vector<2x256xf32>, i32 -> vector<2x256xf32>
    %c222_i32_113 = arith.constant 222 : i32
    %700 = tpu.dynamic_rotate %26 by %c222_i32_113 dim 1 : vector<2x256xf32>, i32 -> vector<2x256xf32>
    %c40 = arith.constant 40 : index
    %701 = memref.load %arg3[%c40] : memref<98xf32, #tpu.memory_space<smem>>
    %702 = vector.broadcast %701 : f32 to vector<2x256xf32>
    %703 = arith.mulf %702, %699 : vector<2x256xf32>
    %c89 = arith.constant 89 : index
    %704 = memref.load %arg3[%c89] : memref<98xf32, #tpu.memory_space<smem>>
    %705 = vector.broadcast %704 : f32 to vector<2x256xf32>
    %706 = arith.mulf %705, %700 : vector<2x256xf32>
    %707 = arith.addf %703, %706 : vector<2x256xf32>
    %708 = arith.andi %59, %94 : vector<1x256xi1>
    %cst_114 = arith.constant 0.000000e+00 : f32
    %709 = vector.shape_cast %708 : vector<1x256xi1> to vector<1x256xi1>
    %710 = vector.broadcast %709 : vector<1x256xi1> to vector<2x256xi1>
    %711 = vector.broadcast %cst_114 : f32 to vector<2x256xf32>
    %712 = arith.select %710, %707, %711 : vector<2x256xi1>, vector<2x256xf32>
    %713 = arith.addf %698, %712 : vector<2x256xf32>
    %c221_i32 = arith.constant 221 : i32
    %714 = tpu.dynamic_rotate %23 by %c221_i32 dim 1 : vector<2x256xf32>, i32 -> vector<2x256xf32>
    %c221_i32_115 = arith.constant 221 : i32
    %715 = tpu.dynamic_rotate %26 by %c221_i32_115 dim 1 : vector<2x256xf32>, i32 -> vector<2x256xf32>
    %c41 = arith.constant 41 : index
    %716 = memref.load %arg3[%c41] : memref<98xf32, #tpu.memory_space<smem>>
    %717 = vector.broadcast %716 : f32 to vector<2x256xf32>
    %718 = arith.mulf %717, %714 : vector<2x256xf32>
    %c90 = arith.constant 90 : index
    %719 = memref.load %arg3[%c90] : memref<98xf32, #tpu.memory_space<smem>>
    %720 = vector.broadcast %719 : f32 to vector<2x256xf32>
    %721 = arith.mulf %720, %715 : vector<2x256xf32>
    %722 = arith.addf %718, %721 : vector<2x256xf32>
    %723 = arith.andi %59, %99 : vector<1x256xi1>
    %cst_116 = arith.constant 0.000000e+00 : f32
    %724 = vector.shape_cast %723 : vector<1x256xi1> to vector<1x256xi1>
    %725 = vector.broadcast %724 : vector<1x256xi1> to vector<2x256xi1>
    %726 = vector.broadcast %cst_116 : f32 to vector<2x256xf32>
    %727 = arith.select %725, %722, %726 : vector<2x256xi1>, vector<2x256xf32>
    %728 = arith.addf %713, %727 : vector<2x256xf32>
    %c211_i32 = arith.constant 211 : i32
    %729 = tpu.dynamic_rotate %23 by %c211_i32 dim 1 : vector<2x256xf32>, i32 -> vector<2x256xf32>
    %c211_i32_117 = arith.constant 211 : i32
    %730 = tpu.dynamic_rotate %26 by %c211_i32_117 dim 1 : vector<2x256xf32>, i32 -> vector<2x256xf32>
    %c42 = arith.constant 42 : index
    %731 = memref.load %arg3[%c42] : memref<98xf32, #tpu.memory_space<smem>>
    %732 = vector.broadcast %731 : f32 to vector<2x256xf32>
    %733 = arith.mulf %732, %729 : vector<2x256xf32>
    %c91 = arith.constant 91 : index
    %734 = memref.load %arg3[%c91] : memref<98xf32, #tpu.memory_space<smem>>
    %735 = vector.broadcast %734 : f32 to vector<2x256xf32>
    %736 = arith.mulf %735, %730 : vector<2x256xf32>
    %737 = arith.addf %733, %736 : vector<2x256xf32>
    %738 = arith.andi %64, %69 : vector<1x256xi1>
    %cst_118 = arith.constant 0.000000e+00 : f32
    %739 = vector.shape_cast %738 : vector<1x256xi1> to vector<1x256xi1>
    %740 = vector.broadcast %739 : vector<1x256xi1> to vector<2x256xi1>
    %741 = vector.broadcast %cst_118 : f32 to vector<2x256xf32>
    %742 = arith.select %740, %737, %741 : vector<2x256xi1>, vector<2x256xf32>
    %743 = arith.addf %728, %742 : vector<2x256xf32>
    %c210_i32 = arith.constant 210 : i32
    %744 = tpu.dynamic_rotate %23 by %c210_i32 dim 1 : vector<2x256xf32>, i32 -> vector<2x256xf32>
    %c210_i32_119 = arith.constant 210 : i32
    %745 = tpu.dynamic_rotate %26 by %c210_i32_119 dim 1 : vector<2x256xf32>, i32 -> vector<2x256xf32>
    %c43 = arith.constant 43 : index
    %746 = memref.load %arg3[%c43] : memref<98xf32, #tpu.memory_space<smem>>
    %747 = vector.broadcast %746 : f32 to vector<2x256xf32>
    %748 = arith.mulf %747, %744 : vector<2x256xf32>
    %c92 = arith.constant 92 : index
    %749 = memref.load %arg3[%c92] : memref<98xf32, #tpu.memory_space<smem>>
    %750 = vector.broadcast %749 : f32 to vector<2x256xf32>
    %751 = arith.mulf %750, %745 : vector<2x256xf32>
    %752 = arith.addf %748, %751 : vector<2x256xf32>
    %753 = arith.andi %64, %74 : vector<1x256xi1>
    %cst_120 = arith.constant 0.000000e+00 : f32
    %754 = vector.shape_cast %753 : vector<1x256xi1> to vector<1x256xi1>
    %755 = vector.broadcast %754 : vector<1x256xi1> to vector<2x256xi1>
    %756 = vector.broadcast %cst_120 : f32 to vector<2x256xf32>
    %757 = arith.select %755, %752, %756 : vector<2x256xi1>, vector<2x256xf32>
    %758 = arith.addf %743, %757 : vector<2x256xf32>
    %c209_i32 = arith.constant 209 : i32
    %759 = tpu.dynamic_rotate %23 by %c209_i32 dim 1 : vector<2x256xf32>, i32 -> vector<2x256xf32>
    %c209_i32_121 = arith.constant 209 : i32
    %760 = tpu.dynamic_rotate %26 by %c209_i32_121 dim 1 : vector<2x256xf32>, i32 -> vector<2x256xf32>
    %c44 = arith.constant 44 : index
    %761 = memref.load %arg3[%c44] : memref<98xf32, #tpu.memory_space<smem>>
    %762 = vector.broadcast %761 : f32 to vector<2x256xf32>
    %763 = arith.mulf %762, %759 : vector<2x256xf32>
    %c93 = arith.constant 93 : index
    %764 = memref.load %arg3[%c93] : memref<98xf32, #tpu.memory_space<smem>>
    %765 = vector.broadcast %764 : f32 to vector<2x256xf32>
    %766 = arith.mulf %765, %760 : vector<2x256xf32>
    %767 = arith.addf %763, %766 : vector<2x256xf32>
    %768 = arith.andi %64, %79 : vector<1x256xi1>
    %cst_122 = arith.constant 0.000000e+00 : f32
    %769 = vector.shape_cast %768 : vector<1x256xi1> to vector<1x256xi1>
    %770 = vector.broadcast %769 : vector<1x256xi1> to vector<2x256xi1>
    %771 = vector.broadcast %cst_122 : f32 to vector<2x256xf32>
    %772 = arith.select %770, %767, %771 : vector<2x256xi1>, vector<2x256xf32>
    %773 = arith.addf %758, %772 : vector<2x256xf32>
    %c208_i32_123 = arith.constant 208 : i32
    %774 = tpu.dynamic_rotate %23 by %c208_i32_123 dim 1 : vector<2x256xf32>, i32 -> vector<2x256xf32>
    %c208_i32_124 = arith.constant 208 : i32
    %775 = tpu.dynamic_rotate %26 by %c208_i32_124 dim 1 : vector<2x256xf32>, i32 -> vector<2x256xf32>
    %c45 = arith.constant 45 : index
    %776 = memref.load %arg3[%c45] : memref<98xf32, #tpu.memory_space<smem>>
    %777 = vector.broadcast %776 : f32 to vector<2x256xf32>
    %778 = arith.mulf %777, %774 : vector<2x256xf32>
    %c94 = arith.constant 94 : index
    %779 = memref.load %arg3[%c94] : memref<98xf32, #tpu.memory_space<smem>>
    %780 = vector.broadcast %779 : f32 to vector<2x256xf32>
    %781 = arith.mulf %780, %775 : vector<2x256xf32>
    %782 = arith.addf %778, %781 : vector<2x256xf32>
    %783 = arith.andi %64, %84 : vector<1x256xi1>
    %cst_125 = arith.constant 0.000000e+00 : f32
    %784 = vector.shape_cast %783 : vector<1x256xi1> to vector<1x256xi1>
    %785 = vector.broadcast %784 : vector<1x256xi1> to vector<2x256xi1>
    %786 = vector.broadcast %cst_125 : f32 to vector<2x256xf32>
    %787 = arith.select %785, %782, %786 : vector<2x256xi1>, vector<2x256xf32>
    %788 = arith.addf %773, %787 : vector<2x256xf32>
    %c207_i32 = arith.constant 207 : i32
    %789 = tpu.dynamic_rotate %23 by %c207_i32 dim 1 : vector<2x256xf32>, i32 -> vector<2x256xf32>
    %c207_i32_126 = arith.constant 207 : i32
    %790 = tpu.dynamic_rotate %26 by %c207_i32_126 dim 1 : vector<2x256xf32>, i32 -> vector<2x256xf32>
    %c46 = arith.constant 46 : index
    %791 = memref.load %arg3[%c46] : memref<98xf32, #tpu.memory_space<smem>>
    %792 = vector.broadcast %791 : f32 to vector<2x256xf32>
    %793 = arith.mulf %792, %789 : vector<2x256xf32>
    %c95 = arith.constant 95 : index
    %794 = memref.load %arg3[%c95] : memref<98xf32, #tpu.memory_space<smem>>
    %795 = vector.broadcast %794 : f32 to vector<2x256xf32>
    %796 = arith.mulf %795, %790 : vector<2x256xf32>
    %797 = arith.addf %793, %796 : vector<2x256xf32>
    %798 = arith.andi %64, %89 : vector<1x256xi1>
    %cst_127 = arith.constant 0.000000e+00 : f32
    %799 = vector.shape_cast %798 : vector<1x256xi1> to vector<1x256xi1>
    %800 = vector.broadcast %799 : vector<1x256xi1> to vector<2x256xi1>
    %801 = vector.broadcast %cst_127 : f32 to vector<2x256xf32>
    %802 = arith.select %800, %797, %801 : vector<2x256xi1>, vector<2x256xf32>
    %803 = arith.addf %788, %802 : vector<2x256xf32>
    %c206_i32 = arith.constant 206 : i32
    %804 = tpu.dynamic_rotate %23 by %c206_i32 dim 1 : vector<2x256xf32>, i32 -> vector<2x256xf32>
    %c206_i32_128 = arith.constant 206 : i32
    %805 = tpu.dynamic_rotate %26 by %c206_i32_128 dim 1 : vector<2x256xf32>, i32 -> vector<2x256xf32>
    %c47 = arith.constant 47 : index
    %806 = memref.load %arg3[%c47] : memref<98xf32, #tpu.memory_space<smem>>
    %807 = vector.broadcast %806 : f32 to vector<2x256xf32>
    %808 = arith.mulf %807, %804 : vector<2x256xf32>
    %c96 = arith.constant 96 : index
    %809 = memref.load %arg3[%c96] : memref<98xf32, #tpu.memory_space<smem>>
    %810 = vector.broadcast %809 : f32 to vector<2x256xf32>
    %811 = arith.mulf %810, %805 : vector<2x256xf32>
    %812 = arith.addf %808, %811 : vector<2x256xf32>
    %813 = arith.andi %64, %94 : vector<1x256xi1>
    %cst_129 = arith.constant 0.000000e+00 : f32
    %814 = vector.shape_cast %813 : vector<1x256xi1> to vector<1x256xi1>
    %815 = vector.broadcast %814 : vector<1x256xi1> to vector<2x256xi1>
    %816 = vector.broadcast %cst_129 : f32 to vector<2x256xf32>
    %817 = arith.select %815, %812, %816 : vector<2x256xi1>, vector<2x256xf32>
    %818 = arith.addf %803, %817 : vector<2x256xf32>
    %c205_i32 = arith.constant 205 : i32
    %819 = tpu.dynamic_rotate %23 by %c205_i32 dim 1 : vector<2x256xf32>, i32 -> vector<2x256xf32>
    %c205_i32_130 = arith.constant 205 : i32
    %820 = tpu.dynamic_rotate %26 by %c205_i32_130 dim 1 : vector<2x256xf32>, i32 -> vector<2x256xf32>
    %c48 = arith.constant 48 : index
    %821 = memref.load %arg3[%c48] : memref<98xf32, #tpu.memory_space<smem>>
    %822 = vector.broadcast %821 : f32 to vector<2x256xf32>
    %823 = arith.mulf %822, %819 : vector<2x256xf32>
    %c97 = arith.constant 97 : index
    %824 = memref.load %arg3[%c97] : memref<98xf32, #tpu.memory_space<smem>>
    %825 = vector.broadcast %824 : f32 to vector<2x256xf32>
    %826 = arith.mulf %825, %820 : vector<2x256xf32>
    %827 = arith.addf %823, %826 : vector<2x256xf32>
    %828 = arith.andi %64, %99 : vector<1x256xi1>
    %cst_131 = arith.constant 0.000000e+00 : f32
    %829 = vector.shape_cast %828 : vector<1x256xi1> to vector<1x256xi1>
    %830 = vector.broadcast %829 : vector<1x256xi1> to vector<2x256xi1>
    %831 = vector.broadcast %cst_131 : f32 to vector<2x256xf32>
    %832 = arith.select %830, %827, %831 : vector<2x256xi1>, vector<2x256xf32>
    %833 = arith.addf %818, %832 : vector<2x256xf32>
    %c0_132 = arith.constant 0 : index
    %834 = memref.load %arg4[%c0_132] : memref<1xf32, #tpu.memory_space<smem>>
    %835 = vector.broadcast %834 : f32 to vector<2x256xf32>
    %836 = arith.addf %833, %835 : vector<2x256xf32>
    %837 = arith.negf %836 : vector<2x256xf32>
    %838 = math.exp %837 : vector<2x256xf32>
    %cst_133 = arith.constant 1.000000e+00 : f32
    %839 = vector.broadcast %cst_133 : f32 to vector<2x256xf32>
    %840 = arith.addf %839, %838 : vector<2x256xf32>
    %841 = arith.divf %839, %840 : vector<2x256xf32>
    %842 = vector.shape_cast %841 : vector<2x256xf32> to vector<2x1x256xf32>
    %843 = vector.broadcast %842 : vector<2x1x256xf32> to vector<2x32x256xf32>
    %844 = arith.mulf %22, %843 : vector<2x32x256xf32>
    %845 = arith.addf %844, %0 : vector<2x32x256xf32>
    %c0_134 = arith.constant 0 : index
    %c0_135 = arith.constant 0 : index
    %c0_136 = arith.constant 0 : index
    %846 = vector.load %arg5[%c0_134, %c0_135, %c0_136] : memref<2x32x256xf32, #tpu.memory_space<vmem>>, vector<2x32x256xf32>
    tpu.vector_store %arg5[%c0_134, %c0_135, %c0_136], %845 {strides = array<i32>} : memref<2x32x256xf32, #tpu.memory_space<vmem>>, vector<2x32x256xf32>,
    return
  }
}

</mosaic_0001>

<bundles_post_ra>
// kernel: cbam_pallas.1
= control target key start
LH: loop header
LB: loop body
LE: loop exit
PB: predicated region body
PF: predicated region fallthrough
CT: control target
= control target key end

     0   :  { %11 = vsyncpa [#allocation4], 0  ;;  %s5448_s0 = inlined_call_operand.vmem [shape: f32[2,32,256], index: 0, kind: input, shape index: {}]   ;;  %s5449_s1 = inlined_call_operand.vmem [shape: f32[32,8], index: 1, kind: input, shape index: {}]   ;;  %s5450_s2 = inlined_call_operand.vmem [shape: f32[8,32], index: 2, kind: input, shape index: {}]   ;;  %s5451_s3 = inlined_call_operand.vmem [shape: f32[98], index: 3, kind: input, shape index: {}]   ;;  %s5452_s4 = inlined_call_operand.<no memory space> [shape: f32[1], index: 4, kind: input, shape index: {}]   ;;  %s5453_s5 = inlined_call_operand.vmem [shape: f32[2,32,256], index: 5, kind: output, shape index: {}]  }
   0x1   :  { %s24_s20 = sshll.u32 %s5451_s3, 4  ;;  %s25_s20 = int_to_ptr.vmem [resolvable:$true] %s24_s20 }
   0x2   :  { %s2550_s21 = scalar_lea.vmem %s25_s20, 16  ;;  %p2555_p1 = scmp.lt.s32.totalorder %s25_s20, %s25_s20 }
   0x3   :  { %p2551_p0 = scmp.ne.s32.totalorder %s25_s20, %s2550_s21  ;;  %p2556_p2 = scmp.lt.s32.totalorder %s2550_s21, %s2550_s21 }
   0x5   :  { %p2557_p3 = por %p2556_p2, %p2555_p1 }
   0x7   :  { %p2558_p4 = pnand %p2557_p3, %p2551_p0 }
   0x9   :  { %2561 = shalt.err (!%p2558_p4)
}
   0xa   :  { %s2564_s22 = smov [#allocation3]  }
   0xb   :  { %27 = dma.vmem_to_smem %s25_s20, 16, %s2564_s22, [#allocation4]  }
   0xc   :  { %2562 = dma.done.wait [#allocation4], 16  }
   0xd   :  { %2563 = vsyncadd [#allocation4], 4294967280 }
   0xe   :  { %33 = sfence }
   0xf   :  { %v2652_v0 = vld [vmem:[%s5448_s0 + $0x40] sm:$0xff]  ;;  %v2657_v1 = vld [vmem:[%s5448_s0 + $0x48] sm:$0xff]  ;;  %v2674_v5 = vld [vmem:[%s5448_s0 + $0x50] sm:$0xff]  ;;  %v2565_v32 = vmov 0.0   ;;  %vm2566_vm0 = vmmov 0   ;;  %v115_v42 = vlaneseq  ;;  %vm126_vm1 = vcmask 130112  }
  0x10   :  { %v2662_v2 = vld [vmem:[%s5448_s0] sm:$0xff]  ;;  %v86_v3 = vadd.f32 %v2657_v1, %v2652_v0  ;;  %v2669_v4 = vld [vmem:[%s5448_s0 + $0x8] sm:$0xff]  ;;  %v2679_v6 = vld [vmem:[%s5448_s0 + $0x58] sm:$0xff]  ;;  %v62_v21 = vmax.f32 %v2652_v0, %v2657_v1  ;;  %2454 = vmatprep.subr.mxu0 %v2565_v32  ;;  %2465 = vmatprep.subr.mxu1 %v2565_v32  ;;  %vm133_vm2 = vcmask 195712   ;;  %vm140_vm3 = vcmask 261312   ;;  %s2870_s12 = sld [smem:[#allocation3 + $0x49]] }
  0x11   :  { %v74_v7 = vadd.f32 %v2669_v4, %v2662_v2  ;;  %v2686_v8 = vld [vmem:[%s5448_s0 + $0x10] sm:$0xff]  ;;  %v2691_v9 = vld [vmem:[%s5448_s0 + $0x18] sm:$0xff]  ;;  %v89_v10 = vadd.f32 %v2679_v6, %v2674_v5  ;;  %v2700_v12 = vld [vmem:[%s5448_s0 + $0x60] sm:$0xff]  ;;  %v50_v19 = vmax.f32 %v2662_v2, %v2669_v4  ;;  %v65_v20 = vmax.f32 %v2674_v5, %v2679_v6  ;;  %2462 = vmatprep.mubr.msk.f32.mxu0 %vm2566_vm0, %v2565_v32  ;;  %s2567_s13 = smov 51   ;;  %s2568_s14 = smov 50  }
  0x12   :  { %87 = vadd.xlane.f32.xlu1 %v86_v3  ;;  %v77_v11 = vadd.f32 %v2691_v9, %v2686_v8  ;;  %v2705_v13 = vld [vmem:[%s5448_s0 + $0x68] sm:$0xff]  ;;  %v2710_v14 = vld [vmem:[%s5448_s0 + $0x20] sm:$0xff]  ;;  %v53_v18 = vmax.f32 %v2686_v8, %v2691_v9  ;;  %v2732_v22 = vld [vmem:[%s5448_s0 + $0x70] sm:$0xff]  ;;  %2467 = vmatprep.mubr.msk.f32.mxu1 %vm2566_vm0, %v2565_v32  ;;  %v2773_v45 = vand.u32 127, %v115_v42  ;;  %v2775_v47 = vshrl.u32 %v115_v42, 7  ;;  %s2569_s15 = smov 49  }
  0x13   :  { %75 = vadd.xlane.f32.xlu0 %v74_v7  ;;  %v2715_v15 = vld [vmem:[%s5448_s0 + $0x28] sm:$0xff]  ;;  %v92_v16 = vadd.f32 %v2705_v13, %v2700_v12  ;;  %v2737_v23 = vld [vmem:[%s5448_s0 + $0x78] sm:$0xff]  ;;  %v2742_v24 = vld [vmem:[%s5448_s0 + $0x30] sm:$0xff]  ;;  %v68_v28 = vmax.f32 %v2700_v12, %v2705_v13  ;;  %vm161_vm4 = vcmask 1041409   ;;  %vm210_vm5 = vcmask 1043459   ;;  %s2570_s16 = smov 48  }
  0x14   :  { %v80_v17 = vadd.f32 %v2715_v15, %v2710_v14  ;;  %v2747_v25 = vld [vmem:[%s5448_s0 + $0x38] sm:$0xff]  ;;  %v95_v26 = vadd.f32 %v2737_v23, %v2732_v22  ;;  %v56_v29 = vmax.f32 %v2710_v14, %v2715_v15  ;;  %v71_v30 = vmax.f32 %v2732_v22, %v2737_v23  ;;  %v217_v34 = vld [vmem:[%s5449_s1 + $0x10] sm:$0xff]  ;;  %v216_v35 = vld [vmem:[%s5449_s1 + $0x8] sm:$0xff]  ;;  %5584 = vst [vmem:[#allocation6_spill] sm:$0xff] %v2775_v47  ;;  %s2571_s17 = smov 47   ;;  %s2572_s18 = smov 46  }
  0x15   :  { %v83_v27 = vadd.f32 %v2747_v25, %v2742_v24  ;;  %v59_v31 = vmax.f32 %v2742_v24, %v2747_v25  ;;  %v218_v33 = vld [vmem:[%s5449_s1 + $0x18] sm:$0xff]  ;;  %v215_v36 = vld [vmem:[%s5449_s1] sm:$0xff]  ;;  %v121_v48 = vadd.s32 4294967288, %v2773_v45  ;;  %v128_v49 = vadd.s32 4294967280, %v2773_v45  ;;  %s2573_s19 = smov 45   ;;  %s2574_s20 = smov 35  }
  0x16   :  { %90 = vadd.xlane.f32.xlu1 %v89_v10  ;;  %2455 = vmatpush3.msra.mxu0 %v218_v33  ;;  %v135_v52 = vadd.s32 4294967272, %v2773_v45  ;;  %v119_v53 = vsub.s32 %v2773_v45, %v2775_v47  ;;  %vm213_vm6 = vcmask 1041408   ;;  %vm219_vm7 = vcmask 261120   ;;  %s2575_s21 = smov 34   ;;  %s2576_s22 = smov 33  }
  0x17   :  { %78 = vadd.xlane.f32.xlu0 %v77_v11  ;;  %2456 = vmatprep.subr.mxu0 %v2565_v32  ;;  %v124_v54 = vsub.s32 %v121_v48, %v2775_v47  ;;  %v131_v56 = vsub.s32 %v128_v49, %v2775_v47  ;;  %vm299_vm8 = vcmask 64512   ;;  %s2577_s23 = smov 32   ;;  %s2578_s24 = smov 31   ;;  %vm609_vm9 = vcmp.lt.s32.totalorder %v2773_v45, 51 }
  0x18   :  { %2457 = vmatpush3.msra.mxu0 %v217_v34  ;;  %v138_v3 = vsub.s32 %v135_v52, %v2775_v47  ;;  %s2579_s25 = smov 30   ;;  %s2580_s3 = smov 29   ;;  %vm5566_vm10 = vcmp.lt.s32.totalorder %v2773_v45, 77  ;;  %vm650_vm11 = vcmp.lt.s32.totalorder %v2773_v45, 50  ;;  %vm683_vm12 = vcmp.lt.s32.totalorder %v2773_v45, 49 }
  0x19   :  { %2458 = vmatprep.subr.mxu0 %v2565_v32  ;;  %s2581_s26 = smov 19   ;;  %s2582_s27 = smov 18   ;;  %vm716_vm13 = vcmp.lt.s32.totalorder %v2773_v45, 48  ;;  %vm749_vm14 = vcmp.lt.s32.totalorder %v2773_v45, 47  ;;  %vm782_vm15 = vcmp.lt.s32.totalorder %v2773_v45, 46  ;;  %vm513_vm0 = vcmp.ge.s32.totalorder %v2773_v45, 48 }
  0x1a   :  { %93 = vadd.xlane.f32.xlu1 %v92_v16  ;;  %2459 = vmatpush3.msra.mxu0 %v216_v35  ;;  %s2583_s28 = smov 17   ;;  %s2584_s29 = smov 16  }
  0x1b   :  { %81 = vadd.xlane.f32.xlu0 %v80_v17  ;;  %2460 = vmatprep.subr.mxu0 %v2565_v32  ;;  %s2585_s30 = smov 15   ;;  %s2586_s6 = smov 14  }
  0x1c   :  { %2461 = vmatpush3.msra.mxu0 %v215_v36  ;;  %s2587_s7 = smov 13   ;;  %s2588_s8 = smov 3  }
  0x1d   :  { %s2589_s9 = smov 2   ;;  %s2590_s10 = smov 1  }
  0x1e   :  { %54 = vmax.xlane.f32.xlu1 %v53_v18  ;;  %s5454_s1 = smov 127   ;;  %s5456_s11 = smov 126  }
  0x1f   :  { %51 = vmax.xlane.f32.xlu0 %v50_v19 }
  0x22   :  { %66 = vmax.xlane.f32.xlu1 %v65_v20 }
  0x23   :  { %63 = vmax.xlane.f32.xlu0 %v62_v21 }
  0x26   :  { %96 = vadd.xlane.f32.xlu1 %v95_v26 }
  0x27   :  { %84 = vadd.xlane.f32.xlu0 %v83_v27 }
  0x2a   :  { %69 = vmax.xlane.f32.xlu1 %v68_v28 }
  0x2b   :  { %57 = vmax.xlane.f32.xlu0 %v56_v29 }
  0x2e   :  { %72 = vmax.xlane.f32.xlu1 %v71_v30 }
  0x2f   :  { %60 = vmax.xlane.f32.xlu0 %v59_v31 }
  0x9b   :  { %v88_v37 = vpop.xlane.xlu1 %87 }
  0x9c   :  { %v76_v38 = vpop.xlane.xlu0 %75  ;;  %v103_v57 = vmul.f32 0.00390625, %v88_v37 }
  0x9d   :  { %v99_v63 = vmul.f32 0.00390625, %v76_v38 }
  0x9e   :  { %v194_v16 = vrot.slane %v103_v57, %v119_v53 }
  0x9f   :  { %v91_v39 = vpop.xlane.xlu1 %90  ;;  %v175_v30 = vrot.slane %v99_v63, %v119_v53 }
  0xa0   :  { %v79_v40 = vpop.xlane.xlu0 %78  ;;  %v104_v55 = vmul.f32 0.00390625, %v91_v39 }
  0xa1   :  { %v100_v58 = vmul.f32 0.00390625, %v79_v40 }
  0xa2   :  { %v198_v11 = vrot.slane %v104_v55, %v124_v54 }
  0xa3   :  { %v94_v41 = vpop.xlane.xlu1 %93  ;;  %v179_v17 = vrot.slane %v100_v58, %v124_v54 }
  0xa4   :  { %v82_v43 = vpop.xlane.xlu0 %81  ;;  %v105_v59 = vmul.f32 0.00390625, %v94_v41  ;;  %v199_v34 = vsel %vm126_vm1, %v198_v11, %v194_v16  ;;  %v2803_v11 = vsub.s32 0, %v2775_v47 }
  0xa5   :  { %v101_v60 = vmul.f32 0.00390625, %v82_v43  ;;  %v180_v36 = vsel %vm126_vm1, %v179_v17, %v175_v30 }
  0xa6   :  { %v203_v18 = vrot.slane %v105_v59, %v131_v56  ;;  %5585 = vst [vmem:[#allocation7_spill] sm:$0xff] %v2803_v11 }
  0xa7   :  { %v55_v44 = vpop.xlane.xlu1 %54  ;;  %v184_v19 = vrot.slane %v101_v60, %v131_v56 }
  0xa8   :  { %v52_v46 = vpop.xlane.xlu0 %51  ;;  %v125_v21 = vrot.slane %v55_v44, %v124_v54  ;;  %v204_v37 = vsel %vm133_vm2, %v203_v18, %v199_v34  ;;  %v2807_v18 = vsub.s32 1, %v2775_v47 }
  0xa9   :  { %v120_v26 = vrot.slane %v52_v46, %v119_v53  ;;  %v185_v39 = vsel %vm133_vm2, %v184_v19, %v180_v36 }
  0xaa   :  { %5586 = vst [vmem:[#allocation8_spill] sm:$0xff] %v2807_v18 }
  0xab   :  { %v67_v50 = vpop.xlane.xlu1 %66  ;;  %v127_v40 = vsel %vm126_vm1, %v125_v21, %v120_v26 }
  0xac   :  { %v64_v51 = vpop.xlane.xlu0 %63  ;;  %v149_v27 = vrot.slane %v67_v50, %v124_v54 }
  0xad   :  { %v145_v28 = vrot.slane %v64_v51, %v119_v53 }
  0xaf   :  { %v97_v61 = vpop.xlane.xlu1 %96  ;;  %v150_v41 = vsel %vm126_vm1, %v149_v27, %v145_v28 }
  0xb0   :  { %v85_v62 = vpop.xlane.xlu0 %84  ;;  %v106_v7 = vmul.f32 0.00390625, %v97_v61 }
  0xb1   :  { %v102_v10 = vmul.f32 0.00390625, %v85_v62 }
  0xb2   :  { %v208_v31 = vrot.slane %v106_v7, %v138_v3 }
  0xb3   :  { %v70_v20 = vpop.xlane.xlu1 %69  ;;  %v189_v32 = vrot.slane %v102_v10, %v138_v3 }
  0xb4   :  { %v58_v29 = vpop.xlane.xlu0 %57  ;;  %v154_v33 = vrot.slane %v70_v20, %v131_v56  ;;  %v209_v49 = vsel %vm140_vm3, %v208_v31, %v204_v37 }
  0xb5   :  { %v132_v35 = vrot.slane %v58_v29, %v131_v56  ;;  %v190_v48 = vsel %vm140_vm3, %v189_v32, %v185_v39  ;;  %v298_v56 = vld [vmem:[%s5450_s2] sm:$0xff]  ;;  %s2395_s2 = sld [smem:[#allocation3 + $0x18]] }
  0xb6   :  { %v155_v44 = vsel %vm133_vm2, %v154_v33, %v150_v41  ;;  %v211_v54 = vsel %vm210_vm5, %v209_v49, %v190_v48  ;;  %2466 = vmatpush3.msra.mxu1 %v298_v56 }
  0xb7   :  { %v73_v38 = vpop.xlane.xlu1 %72  ;;  %v134_v50 = vsel %vm133_vm2, %v132_v35, %v127_v40 }
  0xb8   :  { %v159_v42 = vrot.slane %v73_v38, %v138_v3  ;;  %v61_v43 = vpop.xlane.xlu0 %60 }
  0xb9   :  { %v139_v46 = vrot.slane %v61_v43, %v138_v3 }
  0xba   :  { %v160_v51 = vsel %vm140_vm3, %v159_v42, %v155_v44 }
  0xbb   :  { %v141_v52 = vsel %vm140_vm3, %v139_v46, %v134_v50  ;;  %vm815_vm3 = vcmp.lt.s32.totalorder %v2773_v45, 45 }
  0xbc   :  { %v162_v53 = vsel %vm161_vm4, %v160_v51, %v141_v52 }
  0xbd   :  { %v214_v55 = vsel %vm213_vm6, %v162_v53, %v211_v54 }
  0xbe   :  { %2463 = vmatmul.mubr.msk.f32.vlgmr.msra.gmra.mxu0 %vm219_vm7, %v214_v55 }
 0x17e   :  { %v289_v57 = vpop.f32.mrf.mxu0 }
 0x17f   :  { %v293_v58 = vmax.f32 %v289_v57, 0.0 }
 0x180   :  { %v2464_v59 = vpop.f32.mrf.mxu0 }
 0x181   :  { %v295_v60 = vrot.slane %v293_v58, 2 }
 0x183   :  { %v297_v61 = vadd.f32 %v295_v60, %v293_v58 }
 0x185   :  { %2468 = vmatmul.mubr.msk.f32.vlgmr.msra.gmra.mxu1 %vm299_vm8, %v297_v61 }
 0x245   :  { %v369_v62 = vpop.f32.mrf.mxu1 }
 0x246   :  { %v2347_v63 = vmul.f32 -1.442695, %v369_v62 }
 0x247   :  { %v2469_v3 = vpop.f32.mrf.mxu1 }
 0x248   :  { %2522 = vpow2.f32 %v2347_v63 }
 0x255   :  { %v2523_v7 = vpop.eup %2522 }
 0x256   :  { %v376_v10 = vadd.f32 1.0, %v2523_v7 }
 0x258   :  { %2524 = vrcp.f32 %v376_v10 }
 0x265   :  { %v2525_v16 = vpop.eup %2524 }
 0x266   :  { %v382_v17 = vrot.slane %v2525_v16, %v2803_v11  ;;  %v401_v19 = vrot.slane %v2525_v16, %v2807_v18 }
 0x268   :  { %388 = vbcast.lane.b32.xlu1 %v382_v17, 264  ;;  %384 = vbcast.lane.b32.xlu0 %v382_v17, 256 }
 0x26c   :  { %392 = vbcast.lane.b32.xlu1 %v382_v17, 272  ;;  %403 = vbcast.lane.b32.xlu0 %v401_v19, 256 }
 0x270   :  { %396 = vbcast.lane.b32.xlu1 %v382_v17, 280  ;;  %411 = vbcast.lane.b32.xlu0 %v401_v19, 272 }
 0x274   :  { %407 = vbcast.lane.b32.xlu1 %v401_v19, 264 }
 0x278   :  { %415 = vbcast.lane.b32.xlu1 %v401_v19, 280 }
 0x2da   :  { %v389_v20 = vpop.permute.xlu1 %388  ;;  %v385_v21 = vpop.permute.xlu0 %384 }
 0x2db   :  { %v2811_v26 = vmul.f32 %v389_v20, %v2686_v8  ;;  %v2814_v27 = vmul.f32 %v389_v20, %v2691_v9  ;;  %v2817_v28 = vmul.f32 %v385_v21, %v2662_v2  ;;  %v2820_v29 = vmul.f32 %v385_v21, %v2669_v4 }
 0x2dd   :  { %5587 = vst [vmem:[#allocation9_spill] sm:$0xff] %v2811_v26  ;;  %5588 = vst [vmem:[#allocation10_spill] sm:$0xff] %v2814_v27  ;;  %v433_v8 = vmax.f32 %v2817_v28, %v2811_v26  ;;  %v442_v9 = vmax.f32 %v2820_v29, %v2814_v27  ;;  %v469_v2 = vadd.f32 %v2811_v26, %v2817_v28 }
 0x2de   :  { %5589 = vst [vmem:[#allocation11_spill] sm:$0xff] %v2817_v28  ;;  %5590 = vst [vmem:[#allocation12_spill] sm:$0xff] %v2820_v29  ;;  %v393_v30 = vpop.permute.xlu1 %392  ;;  %v404_v33 = vpop.permute.xlu0 %403  ;;  %v478_v4 = vadd.f32 %v2814_v27, %v2820_v29 }
 0x2df   :  { %v2823_v31 = vmul.f32 %v393_v30, %v2710_v14  ;;  %v2826_v32 = vmul.f32 %v393_v30, %v2715_v15  ;;  %v2851_v44 = vmul.f32 %v404_v33, %v2652_v0  ;;  %v2854_v46 = vmul.f32 %v404_v33, %v2657_v1 }
 0x2e1   :  { %5591 = vst [vmem:[#allocation13_spill] sm:$0xff] %v2823_v31  ;;  %5592 = vst [vmem:[#allocation14_spill] sm:$0xff] %v2826_v32  ;;  %v434_v34 = vmax.f32 %v433_v8, %v2823_v31  ;;  %v443_v14 = vmax.f32 %v442_v9, %v2826_v32  ;;  %v470_v15 = vadd.f32 %v469_v2, %v2823_v31 }
 0x2e2   :  { %v397_v35 = vpop.permute.xlu1 %396  ;;  %v479_v36 = vadd.f32 %v478_v4, %v2826_v32  ;;  %v412_v43 = vpop.permute.xlu0 %411  ;;  %5595 = vst [vmem:[#allocation17_spill] sm:$0xff] %v2851_v44  ;;  %5596 = vst [vmem:[#allocation18_spill] sm:$0xff] %v2854_v46 }
 0x2e3   :  { %v2841_v37 = vmul.f32 %v397_v35, %v2742_v24  ;;  %v2844_v38 = vmul.f32 %v397_v35, %v2747_v25  ;;  %v2856_v24 = vstv %s2395_s2  ;;  %v2859_v52 = vmul.f32 %v412_v43, %v2700_v12  ;;  %s2593_s2 = smov 125  }
 0x2e4   :  { %v2862_v53 = vmul.f32 %v412_v43, %v2705_v13 }
 0x2e5   :  { %5593 = vst [vmem:[#allocation15_spill] sm:$0xff] %v2841_v37  ;;  %5594 = vst [vmem:[#allocation16_spill] sm:$0xff] %v2844_v38  ;;  %v435_v39 = vmax.f32 %v434_v34, %v2841_v37  ;;  %v444_v40 = vmax.f32 %v443_v14, %v2844_v38  ;;  %v471_v41 = vadd.f32 %v470_v15, %v2841_v37  ;;  %v1412_v15 = vstv %s2870_s12  ;;  %s5458_s12 = smov 115  }
 0x2e6   :  { %v480_v42 = vadd.f32 %v479_v36, %v2844_v38  ;;  %v408_v48 = vpop.permute.xlu1 %407  ;;  %5597 = vst [vmem:[#allocation19_spill] sm:$0xff] %v2859_v52  ;;  %5598 = vst [vmem:[#allocation20_spill] sm:$0xff] %v2862_v53 }
 0x2e7   :  { %v436_v25 = vrot.slane %v435_v39, 4  ;;  %v445_v49 = vrot.slane %v444_v40, 4  ;;  %v472_v50 = vrot.slane %v471_v41, 4  ;;  %v2865_v54 = vmul.f32 %v408_v48, %v2674_v5 }
 0x2e8   :  { %v481_v51 = vrot.slane %v480_v42, 4  ;;  %v2868_v0 = vmul.f32 %v408_v48, %v2679_v6 }
 0x2e9   :  { %5599 = vst [vmem:[#allocation21_spill] sm:$0xff] %v2865_v54  ;;  %v437_v1 = vmax.f32 %v435_v39, %v436_v25  ;;  %v446_v55 = vmax.f32 %v444_v40, %v445_v49  ;;  %v473_v56 = vadd.f32 %v472_v50, %v471_v41  ;;  %v451_v58 = vmax.f32 %v2851_v44, %v2865_v54 }
 0x2ea   :  { %5600 = vst [vmem:[#allocation22_spill] sm:$0xff] %v2868_v0  ;;  %v482_v57 = vadd.f32 %v481_v51, %v480_v42  ;;  %v460_v12 = vmax.f32 %v2854_v46, %v2868_v0  ;;  %v487_v13 = vadd.f32 %v2865_v54, %v2851_v44  ;;  %v496_v5 = vadd.f32 %v2868_v0, %v2854_v46  ;;  %v416_v6 = vpop.permute.xlu1 %415 }
 0x2eb   :  { %v438_v59 = vrot.slane %v437_v1, 2  ;;  %v447_v60 = vrot.slane %v446_v55, 2  ;;  %v474_v61 = vrot.slane %v473_v56, 2  ;;  %v2881_v63 = vmul.f32 %v416_v6, %v2732_v22 }
 0x2ec   :  { %v483_v62 = vrot.slane %v482_v57, 2  ;;  %v2884_v3 = vmul.f32 %v416_v6, %v2737_v23  ;;  %v452_v7 = vmax.f32 %v451_v58, %v2859_v52  ;;  %v461_v10 = vmax.f32 %v460_v12, %v2862_v53 }
 0x2ed   :  { %5601 = vst [vmem:[#allocation23_spill] sm:$0xff] %v2881_v63  ;;  %v439_v16 = vmax.f32 %v437_v1, %v438_v59  ;;  %v448_v17 = vmax.f32 %v446_v55, %v447_v60  ;;  %v475_v19 = vadd.f32 %v474_v61, %v473_v56  ;;  %v488_v33 = vadd.f32 %v487_v13, %v2859_v52 }
 0x2ee   :  { %5602 = vst [vmem:[#allocation24_spill] sm:$0xff] %v2884_v3  ;;  %v484_v20 = vadd.f32 %v483_v62, %v482_v57  ;;  %v453_v21 = vmax.f32 %v452_v7, %v2881_v63  ;;  %v462_v30 = vmax.f32 %v461_v10, %v2884_v3  ;;  %v497_v22 = vadd.f32 %v496_v5, %v2862_v53 }
 0x2ef   :  { %v440_v8 = vrot.slane %v439_v16, 1  ;;  %v449_v23 = vrot.slane %v448_v17, 1  ;;  %v476_v9 = vrot.slane %v475_v19, 1  ;;  %v489_v14 = vadd.f32 %v488_v33, %v2881_v63 }
 0x2f0   :  { %v485_v2 = vrot.slane %v484_v20, 1  ;;  %v454_v4 = vrot.slane %v453_v21, 4  ;;  %v463_v34 = vrot.slane %v462_v30, 4  ;;  %v498_v35 = vadd.f32 %v497_v22, %v2884_v3 }
 0x2f1   :  { %v441_v36 = vmax.f32 %v439_v16, %v440_v8  ;;  %v477_v39 = vadd.f32 %v476_v9, %v475_v19  ;;  %v490_v43 = vrot.slane %v489_v14, 4  ;;  %v450_v25 = vmax.f32 %v448_v17, %v449_v23 }
 0x2f2   :  { %v486_v40 = vadd.f32 %v485_v2, %v484_v20  ;;  %v455_v41 = vmax.f32 %v453_v21, %v454_v4  ;;  %v464_v42 = vmax.f32 %v462_v30, %v463_v34  ;;  %v499_v48 = vrot.slane %v498_v35, 4 }
 0x2f3   :  { %v2895_v49 = vmul.f32 0.03125, %v477_v39  ;;  %v491_v55 = vadd.f32 %v490_v43, %v489_v14  ;;  %v1407_v57 = vmul.f32 %v2856_v24, %v441_v36  ;;  %v1408_v60 = vmul.f32 %v2856_v24, %v450_v25 }
 0x2f4   :  { %v2897_v50 = vmul.f32 0.03125, %v486_v40  ;;  %v456_v51 = vrot.slane %v455_v41, 2  ;;  %v465_v1 = vrot.slane %v464_v42, 2  ;;  %v500_v56 = vadd.f32 %v499_v48, %v498_v35 }
 0x2f5   :  { %v1413_v58 = vmul.f32 %v1412_v15, %v2895_v49  ;;  %v492_v6 = vrot.slane %v491_v55, 2 }
 0x2f6   :  { %v1414_v12 = vmul.f32 %v1412_v15, %v2897_v50  ;;  %v457_v13 = vmax.f32 %v455_v41, %v456_v51  ;;  %v466_v5 = vmax.f32 %v464_v42, %v465_v1  ;;  %v501_v59 = vrot.slane %v500_v56, 2 }
 0x2f7   :  { %v1417_v61 = vadd.f32 %v1413_v58, %v1407_v57  ;;  %v493_v10 = vadd.f32 %v492_v6, %v491_v55 }
 0x2f8   :  { %v458_v62 = vrot.slane %v457_v13, 1  ;;  %v467_v7 = vrot.slane %v466_v5, 1  ;;  %v502_v16 = vadd.f32 %v501_v59, %v500_v56  ;;  %v1418_v17 = vadd.f32 %v1414_v12, %v1408_v60 }
 0x2f9   :  { %v494_v21 = vrot.slane %v493_v10, 1 }
 0x2fa   :  { %v459_v19 = vmax.f32 %v457_v13, %v458_v62  ;;  %v468_v20 = vmax.f32 %v466_v5, %v467_v7  ;;  %v503_v30 = vrot.slane %v502_v16, 1 }
 0x2fb   :  { %v495_v33 = vadd.f32 %v494_v21, %v493_v10 }
 0x2fc   :  { %v504_v22 = vadd.f32 %v503_v30, %v502_v16  ;;  %v2904_v8 = vsel %vm161_vm4, %v459_v19, %v441_v36  ;;  %v2907_v23 = vsel %vm161_vm4, %v468_v20, %v450_v25  ;;  %v1409_v4 = vmul.f32 %v2856_v24, %v459_v19 }
 0x2fd   :  { %607 = vrot.lane.b32.xlu1 %v2907_v23, %s2567_s13  ;;  %605 = vrot.lane.b32.xlu0 %v2904_v8, %s2567_s13  ;;  %v2913_v9 = vmul.f32 0.03125, %v495_v33  ;;  %v1410_v34 = vmul.f32 %v2856_v24, %v468_v20 }
 0x2fe   :  { %v2915_v2 = vmul.f32 0.03125, %v504_v22 }
 0x2ff   :  { %v1415_v14 = vmul.f32 %v1412_v15, %v2913_v9  ;;  %v3198_v0 = vsel %vm161_vm4, %v2913_v9, %v2895_v49 }
 0x300   :  { %v1416_v35 = vmul.f32 %v1412_v15, %v2915_v2  ;;  %v3203_v54 = vsel %vm161_vm4, %v2915_v2, %v2897_v50 }
 0x301   :  { %648 = vrot.lane.b32.xlu1 %v2907_v23, %s2568_s14  ;;  %646 = vrot.lane.b32.xlu0 %v2904_v8, %s2568_s14  ;;  %v1419_v36 = vadd.f32 %v1415_v14, %v1409_v4 }
 0x302   :  { %v1420_v39 = vadd.f32 %v1416_v35, %v1410_v34 }
 0x303   :  { %v2926_v40 = vsel %vm161_vm4, %v1419_v36, %v1417_v61 }
 0x304   :  { %5603 = vst [vmem:[#allocation25_spill] sm:$0xff] %v2926_v40  ;;  %v2929_v41 = vsel %vm161_vm4, %v1420_v39, %v1418_v17 }
 0x305   :  { %5604 = vst [vmem:[#allocation26_spill] sm:$0xff] %v2929_v41  ;;  %681 = vrot.lane.b32.xlu1 %v2907_v23, %s2569_s15  ;;  %679 = vrot.lane.b32.xlu0 %v2904_v8, %s2569_s15 }
 0x309   :  { %714 = vrot.lane.b32.xlu1 %v2907_v23, %s2570_s16  ;;  %712 = vrot.lane.b32.xlu0 %v2904_v8, %s2570_s16 }
 0x30d   :  { %747 = vrot.lane.b32.xlu1 %v2907_v23, %s2571_s17  ;;  %745 = vrot.lane.b32.xlu0 %v2904_v8, %s2571_s17 }
 0x311   :  { %780 = vrot.lane.b32.xlu1 %v2907_v23, %s2572_s18  ;;  %778 = vrot.lane.b32.xlu0 %v2904_v8, %s2572_s18 }
 0x315   :  { %813 = vrot.lane.b32.xlu1 %v2907_v23, %s2573_s19  ;;  %811 = vrot.lane.b32.xlu0 %v2904_v8, %s2573_s19 }
 0x319   :  { %846 = vrot.lane.b32.xlu1 %v2907_v23, %s2574_s20  ;;  %844 = vrot.lane.b32.xlu0 %v2904_v8, %s2574_s20 }
 0x31d   :  { %879 = vrot.lane.b32.xlu1 %v2907_v23, %s2575_s21  ;;  %877 = vrot.lane.b32.xlu0 %v2904_v8, %s2575_s21 }
 0x321   :  { %912 = vrot.lane.b32.xlu1 %v2907_v23, %s2576_s22  ;;  %910 = vrot.lane.b32.xlu0 %v2904_v8, %s2576_s22 }
 0x325   :  { %945 = vrot.lane.b32.xlu1 %v2907_v23, %s2577_s23  ;;  %943 = vrot.lane.b32.xlu0 %v2904_v8, %s2577_s23 }
 0x329   :  { %978 = vrot.lane.b32.xlu1 %v2907_v23, %s2578_s24  ;;  %976 = vrot.lane.b32.xlu0 %v2904_v8, %s2578_s24 }
 0x32d   :  { %1011 = vrot.lane.b32.xlu1 %v2907_v23, %s2579_s25  ;;  %1009 = vrot.lane.b32.xlu0 %v2904_v8, %s2579_s25 }
 0x331   :  { %1044 = vrot.lane.b32.xlu1 %v2907_v23, %s2580_s3  ;;  %1042 = vrot.lane.b32.xlu0 %v2904_v8, %s2580_s3 }
 0x335   :  { %1077 = vrot.lane.b32.xlu1 %v2907_v23, %s2581_s26  ;;  %1075 = vrot.lane.b32.xlu0 %v2904_v8, %s2581_s26 }
 0x339   :  { %1110 = vrot.lane.b32.xlu1 %v2907_v23, %s2582_s27  ;;  %1108 = vrot.lane.b32.xlu0 %v2904_v8, %s2582_s27 }
 0x33d   :  { %1143 = vrot.lane.b32.xlu1 %v2907_v23, %s2583_s28  ;;  %1141 = vrot.lane.b32.xlu0 %v2904_v8, %s2583_s28 }
 0x341   :  { %1176 = vrot.lane.b32.xlu1 %v2907_v23, %s2584_s29  ;;  %1174 = vrot.lane.b32.xlu0 %v2904_v8, %s2584_s29 }
 0x345   :  { %1209 = vrot.lane.b32.xlu1 %v2907_v23, %s2585_s30  ;;  %1207 = vrot.lane.b32.xlu0 %v2904_v8, %s2585_s30 }
 0x349   :  { %1242 = vrot.lane.b32.xlu1 %v2907_v23, %s2586_s6  ;;  %1240 = vrot.lane.b32.xlu0 %v2904_v8, %s2586_s6 }
 0x34d   :  { %1275 = vrot.lane.b32.xlu1 %v2907_v23, %s2587_s7  ;;  %1273 = vrot.lane.b32.xlu0 %v2904_v8, %s2587_s7 }
 0x351   :  { %1308 = vrot.lane.b32.xlu1 %v2907_v23, %s2588_s8  ;;  %1306 = vrot.lane.b32.xlu0 %v2904_v8, %s2588_s8 }
 0x355   :  { %1341 = vrot.lane.b32.xlu1 %v2907_v23, %s2589_s9  ;;  %1339 = vrot.lane.b32.xlu0 %v2904_v8, %s2589_s9 }
 0x359   :  { %1374 = vrot.lane.b32.xlu1 %v2907_v23, %s2590_s10  ;;  %1372 = vrot.lane.b32.xlu0 %v2904_v8, %s2590_s10 }
 0x35d   :  { %1441 = vrot.lane.b32.xlu1 %v2907_v23, %s5454_s1  ;;  %1439 = vrot.lane.b32.xlu0 %v2904_v8, %s5454_s1  ;;  %s5460_s1 = smov 114  }
 0x361   :  { %1474 = vrot.lane.b32.xlu1 %v2907_v23, %s5456_s11  ;;  %1472 = vrot.lane.b32.xlu0 %v2904_v8, %s5456_s11  ;;  %s5462_s11 = smov 113  }
 0x365   :  { %1507 = vrot.lane.b32.xlu1 %v2907_v23, %s2593_s2  ;;  %1505 = vrot.lane.b32.xlu0 %v2904_v8, %s2593_s2 }
 0x369   :  { %1540 = vrot.lane.b32.xlu1 %v2907_v23, %s5458_s12  ;;  %1538 = vrot.lane.b32.xlu0 %v2904_v8, %s5458_s12  ;;  %s5464_s12 = smov 112  }
 0x36d   :  { %1573 = vrot.lane.b32.xlu1 %v2907_v23, %s5460_s1  ;;  %1571 = vrot.lane.b32.xlu0 %v2904_v8, %s5460_s1  ;;  %s5466_s1 = smov 111  }
 0x36f   :  { %v3039_v24 = vpop.permute.xlu1 %607  ;;  %v3041_v15 = vpop.permute.xlu0 %605 }
 0x371   :  { %1606 = vrot.lane.b32.xlu1 %v2907_v23, %s5462_s11  ;;  %1604 = vrot.lane.b32.xlu0 %v2904_v8, %s5462_s11  ;;  %s5468_s11 = smov 110  }
 0x373   :  { %v3047_v42 = vpop.permute.xlu1 %648  ;;  %v3049_v43 = vpop.permute.xlu0 %646 }
 0x375   :  { %1639 = vrot.lane.b32.xlu1 %v2907_v23, %s5464_s12  ;;  %1637 = vrot.lane.b32.xlu0 %v2904_v8, %s5464_s12  ;;  %s5470_s12 = smov 109  }
 0x377   :  { %v3055_v48 = vpop.permute.xlu1 %681  ;;  %v3057_v25 = vpop.permute.xlu0 %679 }
 0x379   :  { %1672 = vrot.lane.b32.xlu1 %v2907_v23, %s5466_s1  ;;  %1670 = vrot.lane.b32.xlu0 %v2904_v8, %s5466_s1  ;;  %s5472_s1 = smov 99  }
 0x37b   :  { %v3063_v51 = vpop.permute.xlu1 %714  ;;  %v3065_v1 = vpop.permute.xlu0 %712 }
 0x37d   :  { %1705 = vrot.lane.b32.xlu1 %v2907_v23, %s5468_s11  ;;  %1703 = vrot.lane.b32.xlu0 %v2904_v8, %s5468_s11  ;;  %s5474_s11 = smov 98  }
 0x37f   :  { %v3071_v55 = vpop.permute.xlu1 %747  ;;  %v3073_v56 = vpop.permute.xlu0 %745 }
 0x381   :  { %1738 = vrot.lane.b32.xlu1 %v2907_v23, %s5470_s12  ;;  %1736 = vrot.lane.b32.xlu0 %v2904_v8, %s5470_s12  ;;  %s5476_s12 = smov 97  }
 0x383   :  { %v3079_v57 = vpop.permute.xlu1 %780  ;;  %v3081_v58 = vpop.permute.xlu0 %778 }
 0x385   :  { %1771 = vrot.lane.b32.xlu1 %v2907_v23, %s5472_s1  ;;  %1769 = vrot.lane.b32.xlu0 %v2904_v8, %s5472_s1  ;;  %s5478_s1 = smov 96  }
 0x387   :  { %v3087_v12 = vpop.permute.xlu1 %813  ;;  %v3089_v13 = vpop.permute.xlu0 %811 }
 0x389   :  { %1804 = vrot.lane.b32.xlu1 %v2907_v23, %s5474_s11  ;;  %1802 = vrot.lane.b32.xlu0 %v2904_v8, %s5474_s11  ;;  %s5480_s11 = smov 95  }
 0x38b   :  { %v3095_v5 = vpop.permute.xlu1 %846  ;;  %v3097_v6 = vpop.permute.xlu0 %844 }
 0x38d   :  { %1837 = vrot.lane.b32.xlu1 %v2907_v23, %s5476_s12  ;;  %1835 = vrot.lane.b32.xlu0 %v2904_v8, %s5476_s12  ;;  %s5482_s12 = smov 94  }
 0x38f   :  { %v3103_v59 = vpop.permute.xlu1 %879  ;;  %v3105_v60 = vpop.permute.xlu0 %877 }
 0x391   :  { %1870 = vrot.lane.b32.xlu1 %v2907_v23, %s5478_s1  ;;  %1868 = vrot.lane.b32.xlu0 %v2904_v8, %s5478_s1  ;;  %s5484_s1 = smov 93  }
 0x393   :  { %v3111_v61 = vpop.permute.xlu1 %912  ;;  %v3113_v62 = vpop.permute.xlu0 %910 }
 0x395   :  { %1903 = vrot.lane.b32.xlu1 %v2907_v23, %s5480_s11  ;;  %1901 = vrot.lane.b32.xlu0 %v2904_v8, %s5480_s11  ;;  %s5486_s11 = smov 83  }
 0x397   :  { %v3119_v7 = vpop.permute.xlu1 %945  ;;  %v3121_v10 = vpop.permute.xlu0 %943 }
 0x399   :  { %1936 = vrot.lane.b32.xlu1 %v2907_v23, %s5482_s12  ;;  %1934 = vrot.lane.b32.xlu0 %v2904_v8, %s5482_s12  ;;  %s5488_s12 = smov 82  }
 0x39b   :  { %v3127_v16 = vpop.permute.xlu1 %978  ;;  %v3129_v17 = vpop.permute.xlu0 %976 }
 0x39d   :  { %1969 = vrot.lane.b32.xlu1 %v2907_v23, %s5484_s1  ;;  %1967 = vrot.lane.b32.xlu0 %v2904_v8, %s5484_s1  ;;  %s5490_s1 = smov 81  }
 0x39f   :  { %v3135_v19 = vpop.permute.xlu1 %1011  ;;  %v3137_v20 = vpop.permute.xlu0 %1009 }
 0x3a1   :  { %2002 = vrot.lane.b32.xlu1 %v2907_v23, %s5486_s11  ;;  %2000 = vrot.lane.b32.xlu0 %v2904_v8, %s5486_s11  ;;  %s5494_s11 = smov 80  }
 0x3a3   :  { %v3143_v21 = vpop.permute.xlu1 %1044  ;;  %v3145_v30 = vpop.permute.xlu0 %1042 }
 0x3a5   :  { %2035 = vrot.lane.b32.xlu1 %v2907_v23, %s5488_s12  ;;  %2033 = vrot.lane.b32.xlu0 %v2904_v8, %s5488_s12  ;;  %s2612_s12 = smov 79  }
 0x3a7   :  { %v3151_v33 = vpop.permute.xlu1 %1077  ;;  %v3153_v22 = vpop.permute.xlu0 %1075 }
 0x3a9   :  { %2068 = vrot.lane.b32.xlu1 %v2907_v23, %s5490_s1  ;;  %2066 = vrot.lane.b32.xlu0 %v2904_v8, %s5490_s1  ;;  %s2613_s1 = smov 78  }
 0x3ab   :  { %v3159_v4 = vpop.permute.xlu1 %1110  ;;  %v3161_v34 = vpop.permute.xlu0 %1108 }
 0x3ad   :  { %2101 = vrot.lane.b32.xlu1 %v2907_v23, %s5494_s11  ;;  %2099 = vrot.lane.b32.xlu0 %v2904_v8, %s5494_s11  ;;  %s2614_s11 = smov 77  }
 0x3af   :  { %v3167_v14 = vpop.permute.xlu1 %1143  ;;  %v3169_v35 = vpop.permute.xlu0 %1141 }
 0x3b1   :  { %2134 = vrot.lane.b32.xlu1 %v2907_v23, %s2612_s12  ;;  %2132 = vrot.lane.b32.xlu0 %v2904_v8, %s2612_s12 }
 0x3b3   :  { %v3175_v36 = vpop.permute.xlu1 %1176  ;;  %v3177_v39 = vpop.permute.xlu0 %1174 }
 0x3b5   :  { %2167 = vrot.lane.b32.xlu1 %v2907_v23, %s2613_s1  ;;  %2165 = vrot.lane.b32.xlu0 %v2904_v8, %s2613_s1 }
 0x3b7   :  { %v3183_v3 = vpop.permute.xlu1 %1209  ;;  %v3185_v63 = vpop.permute.xlu0 %1207 }
 0x3b9   :  { %2200 = vrot.lane.b32.xlu1 %v2907_v23, %s2614_s11  ;;  %2198 = vrot.lane.b32.xlu0 %v2904_v8, %s2614_s11 }
 0x3bb   :  { %v3191_v53 = vpop.permute.xlu1 %1242  ;;  %v3193_v52 = vpop.permute.xlu0 %1240 }
 0x3bd   :  { %622 = vrot.lane.b32.xlu1 %v3203_v54, %s2567_s13  ;;  %620 = vrot.lane.b32.xlu0 %v3198_v0, %s2567_s13  ;;  %s3397_s13 = sld [smem:[#allocation3]] }
 0x3bf   :  { %v3209_v8 = vpop.permute.xlu1 %1275  ;;  %v3211_v23 = vpop.permute.xlu0 %1273 }
 0x3c1   :  { %655 = vrot.lane.b32.xlu1 %v3203_v54, %s2568_s14  ;;  %653 = vrot.lane.b32.xlu0 %v3198_v0, %s2568_s14  ;;  %s3399_s14 = sld [smem:[#allocation3 + $0x1]] }
 0x3c3   :  { %v3217_v49 = vpop.permute.xlu1 %1308  ;;  %v3219_v50 = vpop.permute.xlu0 %1306 }
 0x3c5   :  { %688 = vrot.lane.b32.xlu1 %v3203_v54, %s2569_s15  ;;  %686 = vrot.lane.b32.xlu0 %v3198_v0, %s2569_s15  ;;  %s5648_s15 = smov 127  }
 0x3c7   :  { %v3225_v9 = vpop.permute.xlu1 %1341  ;;  %v3227_v2 = vpop.permute.xlu0 %1339 }
 0x3c8   :  { %5605 = vst [vmem:[#allocation27_spill] sm:$0xff] %v3227_v2 }
 0x3c9   :  { %721 = vrot.lane.b32.xlu1 %v3203_v54, %s2570_s16  ;;  %719 = vrot.lane.b32.xlu0 %v3198_v0, %s2570_s16  ;;  %s3405_s16 = sld [smem:[#allocation3 + $0x2]] }
 0x3cb   :  { %v3233_v46 = vpop.permute.xlu1 %1374  ;;  %v3235_v44 = vpop.permute.xlu0 %1372 }
 0x3cc   :  { %5606 = vst [vmem:[#allocation28_spill] sm:$0xff] %v3233_v46  ;;  %5607 = vst [vmem:[#allocation29_spill] sm:$0xff] %v3235_v44  ;;  %v651_v46 = vsel %vm650_vm11, %v3049_v43, %v3047_v42 }
 0x3cd   :  { %754 = vrot.lane.b32.xlu1 %v3203_v54, %s2571_s17  ;;  %752 = vrot.lane.b32.xlu0 %v3198_v0, %s2571_s17  ;;  %s3407_s17 = sld [smem:[#allocation3 + $0x3]] }
 0x3cf   :  { %v3241_v38 = vpop.permute.xlu1 %1441  ;;  %v3243_v37 = vpop.permute.xlu0 %1439 }
 0x3d0   :  { %5608 = vst [vmem:[#allocation30_spill] sm:$0xff] %v3241_v38  ;;  %5609 = vst [vmem:[#allocation31_spill] sm:$0xff] %v3243_v37  ;;  %v611_v37 = vsel %vm609_vm9, %v3039_v24, %v3041_v15 }
 0x3d1   :  { %787 = vrot.lane.b32.xlu1 %v3203_v54, %s2572_s18  ;;  %785 = vrot.lane.b32.xlu0 %v3198_v0, %s2572_s18  ;;  %s3413_s18 = sld [smem:[#allocation3 + $0x4]] }
 0x3d3   :  { %v3249_v32 = vpop.permute.xlu1 %1474  ;;  %v3251_v31 = vpop.permute.xlu0 %1472 }
 0x3d4   :  { %5610 = vst [vmem:[#allocation32_spill] sm:$0xff] %v3249_v32  ;;  %5611 = vst [vmem:[#allocation33_spill] sm:$0xff] %v3251_v31  ;;  %v610_v32 = vsel %vm609_vm9, %v3041_v15, %v3039_v24  ;;  %v3486_v24 = vadd.s32 128, %v2773_v45  ;;  %v652_v15 = vsel %vm650_vm11, %v3047_v42, %v3049_v43  ;;  %v684_v42 = vsel %vm683_vm12, %v3057_v25, %v3055_v48 }
 0x3d5   :  { %820 = vrot.lane.b32.xlu1 %v3203_v54, %s2573_s19  ;;  %818 = vrot.lane.b32.xlu0 %v3198_v0, %s2573_s19  ;;  %s3415_s19 = sld [smem:[#allocation3 + $0x5]]  ;;  %v718_v43 = vsel %vm716_vm13, %v3063_v51, %v3065_v1 }
 0x3d6   :  { %5660 = vst [vmem:[#allocation78_spill] sm:$0xff] %v3486_v24 }
 0x3d7   :  { %v3257_v27 = vpop.permute.xlu1 %1507  ;;  %v3259_v26 = vpop.permute.xlu0 %1505 }
 0x3d8   :  { %5612 = vst [vmem:[#allocation34_spill] sm:$0xff] %v3257_v27  ;;  %5613 = vst [vmem:[#allocation35_spill] sm:$0xff] %v3259_v26 }
 0x3d9   :  { %853 = vrot.lane.b32.xlu1 %v3203_v54, %s2574_s20  ;;  %851 = vrot.lane.b32.xlu0 %v3198_v0, %s2574_s20  ;;  %s5651_s20 = smov 126  }
 0x3db   :  { %v3265_v29 = vpop.permute.xlu1 %1540  ;;  %v3267_v28 = vpop.permute.xlu0 %1538 }
 0x3dc   :  { %5614 = vst [vmem:[#allocation36_spill] sm:$0xff] %v3265_v29  ;;  %5615 = vst [vmem:[#allocation37_spill] sm:$0xff] %v3267_v28 }
 0x3dd   :  { %886 = vrot.lane.b32.xlu1 %v3203_v54, %s2575_s21  ;;  %884 = vrot.lane.b32.xlu0 %v3198_v0, %s2575_s21  ;;  %s3421_s21 = sld [smem:[#allocation3 + $0x6]] }
 0x3df   :  { %v3273_v18 = vpop.permute.xlu1 %1573  ;;  %v3275_v11 = vpop.permute.xlu0 %1571 }
 0x3e0   :  { %5616 = vst [vmem:[#allocation38_spill] sm:$0xff] %v3273_v18  ;;  %5617 = vst [vmem:[#allocation39_spill] sm:$0xff] %v3275_v11 }
 0x3e1   :  { %919 = vrot.lane.b32.xlu1 %v3203_v54, %s2576_s22  ;;  %917 = vrot.lane.b32.xlu0 %v3198_v0, %s2576_s22  ;;  %s3423_s22 = sld [smem:[#allocation3 + $0x7]] }
 0x3e3   :  { %v3281_v47 = vpop.permute.xlu1 %1606  ;;  %v3283_v29 = vpop.permute.xlu0 %1604 }
 0x3e4   :  { %5618 = vst [vmem:[#allocation40_spill] sm:$0xff] %v3281_v47  ;;  %5619 = vst [vmem:[#allocation41_spill] sm:$0xff] %v3283_v29 }
 0x3e5   :  { %952 = vrot.lane.b32.xlu1 %v3203_v54, %s2577_s23  ;;  %950 = vrot.lane.b32.xlu0 %v3198_v0, %s2577_s23  ;;  %s3429_s23 = sld [smem:[#allocation3 + $0x8]] }
 0x3e7   :  { %v3289_v28 = vpop.permute.xlu1 %1639  ;;  %v3291_v18 = vpop.permute.xlu0 %1637 }
 0x3e8   :  { %5620 = vst [vmem:[#allocation42_spill] sm:$0xff] %v3289_v28  ;;  %5621 = vst [vmem:[#allocation43_spill] sm:$0xff] %v3291_v18 }
 0x3e9   :  { %985 = vrot.lane.b32.xlu1 %v3203_v54, %s2578_s24  ;;  %983 = vrot.lane.b32.xlu0 %v3198_v0, %s2578_s24  ;;  %s3431_s24 = sld [smem:[#allocation3 + $0x9]] }
 0x3eb   :  { %v3297_v11 = vpop.permute.xlu1 %1672  ;;  %v3299_v47 = vpop.permute.xlu0 %1670 }
 0x3ec   :  { %5622 = vst [vmem:[#allocation44_spill] sm:$0xff] %v3297_v11  ;;  %5623 = vst [vmem:[#allocation45_spill] sm:$0xff] %v3299_v47 }
 0x3ed   :  { %1018 = vrot.lane.b32.xlu1 %v3203_v54, %s2579_s25  ;;  %1016 = vrot.lane.b32.xlu0 %v3198_v0, %s2579_s25  ;;  %s3437_s25 = sld [smem:[#allocation3 + $0x31]] }
 0x3ef   :  { %v3305_v29 = vpop.permute.xlu1 %1705  ;;  %v3307_v28 = vpop.permute.xlu0 %1703 }
 0x3f0   :  { %5624 = vst [vmem:[#allocation46_spill] sm:$0xff] %v3305_v29  ;;  %5625 = vst [vmem:[#allocation47_spill] sm:$0xff] %v3307_v28 }
 0x3f1   :  { %1051 = vrot.lane.b32.xlu1 %v3203_v54, %s2580_s3  ;;  %1049 = vrot.lane.b32.xlu0 %v3198_v0, %s2580_s3  ;;  %s3439_s3 = sld [smem:[#allocation3 + $0xa]] }
 0x3f3   :  { %v3313_v18 = vpop.permute.xlu1 %1738  ;;  %v3315_v11 = vpop.permute.xlu0 %1736 }
 0x3f4   :  { %5626 = vst [vmem:[#allocation48_spill] sm:$0xff] %v3313_v18  ;;  %5627 = vst [vmem:[#allocation49_spill] sm:$0xff] %v3315_v11 }
 0x3f5   :  { %1084 = vrot.lane.b32.xlu1 %v3203_v54, %s2581_s26  ;;  %1082 = vrot.lane.b32.xlu0 %v3198_v0, %s2581_s26  ;;  %s5656_s26 = smov 115  }
 0x3f7   :  { %v3321_v47 = vpop.permute.xlu1 %1771  ;;  %v3323_v29 = vpop.permute.xlu0 %1769 }
 0x3f8   :  { %5628 = vst [vmem:[#allocation50_spill] sm:$0xff] %v3321_v47  ;;  %5629 = vst [vmem:[#allocation51_spill] sm:$0xff] %v3323_v29 }
 0x3f9   :  { %1117 = vrot.lane.b32.xlu1 %v3203_v54, %s2582_s27  ;;  %1115 = vrot.lane.b32.xlu0 %v3198_v0, %s2582_s27  ;;  %s3456_s27 = sld [smem:[#allocation3 + $0x32]] }
 0x3fb   :  { %v3329_v28 = vpop.permute.xlu1 %1804  ;;  %v3331_v18 = vpop.permute.xlu0 %1802 }
 0x3fc   :  { %5630 = vst [vmem:[#allocation52_spill] sm:$0xff] %v3329_v28  ;;  %5631 = vst [vmem:[#allocation53_spill] sm:$0xff] %v3331_v18 }
 0x3fd   :  { %1150 = vrot.lane.b32.xlu1 %v3203_v54, %s2583_s28  ;;  %1148 = vrot.lane.b32.xlu0 %v3198_v0, %s2583_s28  ;;  %s5659_s28 = smov 114  }
 0x3ff   :  { %v3337_v11 = vpop.permute.xlu1 %1837  ;;  %v3339_v47 = vpop.permute.xlu0 %1835 }
 0x400   :  { %5632 = vst [vmem:[#allocation54_spill] sm:$0xff] %v3337_v11  ;;  %5633 = vst [vmem:[#allocation55_spill] sm:$0xff] %v3339_v47 }
 0x401   :  { %1183 = vrot.lane.b32.xlu1 %v3203_v54, %s2584_s29  ;;  %1181 = vrot.lane.b32.xlu0 %v3198_v0, %s2584_s29  ;;  %s3497_s29 = sld [smem:[#allocation3 + $0x33]] }
 0x403   :  { %v3345_v29 = vpop.permute.xlu1 %1870  ;;  %v3347_v28 = vpop.permute.xlu0 %1868 }
 0x404   :  { %5634 = vst [vmem:[#allocation56_spill] sm:$0xff] %v3345_v29  ;;  %5635 = vst [vmem:[#allocation57_spill] sm:$0xff] %v3347_v28 }
 0x405   :  { %1216 = vrot.lane.b32.xlu1 %v3203_v54, %s2585_s30  ;;  %1214 = vrot.lane.b32.xlu0 %v3198_v0, %s2585_s30  ;;  %s5661_s30 = smov 113  }
 0x407   :  { %v3353_v18 = vpop.permute.xlu1 %1903  ;;  %v3355_v11 = vpop.permute.xlu0 %1901 }
 0x408   :  { %5636 = vst [vmem:[#allocation58_spill] sm:$0xff] %v3353_v18  ;;  %5637 = vst [vmem:[#allocation59_spill] sm:$0xff] %v3355_v11 }
 0x409   :  { %1249 = vrot.lane.b32.xlu1 %v3203_v54, %s2586_s6  ;;  %1247 = vrot.lane.b32.xlu0 %v3198_v0, %s2586_s6  ;;  %s3528_s6 = sld [smem:[#allocation3 + $0x34]] }
 0x40b   :  { %v3361_v47 = vpop.permute.xlu1 %1936  ;;  %v3363_v29 = vpop.permute.xlu0 %1934 }
 0x40c   :  { %5638 = vst [vmem:[#allocation60_spill] sm:$0xff] %v3361_v47  ;;  %5639 = vst [vmem:[#allocation61_spill] sm:$0xff] %v3363_v29 }
 0x40d   :  { %1282 = vrot.lane.b32.xlu1 %v3203_v54, %s2587_s7  ;;  %1280 = vrot.lane.b32.xlu0 %v3198_v0, %s2587_s7  ;;  %s5664_s7 = smov 112  }
 0x40f   :  { %v3369_v28 = vpop.permute.xlu1 %1969  ;;  %v3371_v18 = vpop.permute.xlu0 %1967 }
 0x410   :  { %5640 = vst [vmem:[#allocation62_spill] sm:$0xff] %v3369_v28  ;;  %5641 = vst [vmem:[#allocation63_spill] sm:$0xff] %v3371_v18 }
 0x411   :  { %1315 = vrot.lane.b32.xlu1 %v3203_v54, %s2588_s8  ;;  %1313 = vrot.lane.b32.xlu0 %v3198_v0, %s2588_s8  ;;  %s3569_s8 = sld [smem:[#allocation3 + $0x35]] }
 0x413   :  { %v3377_v11 = vpop.permute.xlu1 %2002  ;;  %v3379_v47 = vpop.permute.xlu0 %2000 }
 0x414   :  { %5642 = vst [vmem:[#allocation64_spill] sm:$0xff] %v3377_v11  ;;  %5643 = vst [vmem:[#allocation65_spill] sm:$0xff] %v3379_v47  ;;  %v631_v47 = vstv %s3437_s25  ;;  %s5690_s25 = smov 97  }
 0x415   :  { %1348 = vrot.lane.b32.xlu1 %v3203_v54, %s2589_s9  ;;  %1346 = vrot.lane.b32.xlu0 %v3198_v0, %s2589_s9  ;;  %s5668_s9 = smov 111  }
 0x417   :  { %v3385_v29 = vpop.permute.xlu1 %2035  ;;  %v3387_v28 = vpop.permute.xlu0 %2033 }
 0x418   :  { %5644 = vst [vmem:[#allocation66_spill] sm:$0xff] %v3385_v29  ;;  %5645 = vst [vmem:[#allocation67_spill] sm:$0xff] %v3387_v28 }
 0x419   :  { %1381 = vrot.lane.b32.xlu1 %v3203_v54, %s2590_s10  ;;  %1379 = vrot.lane.b32.xlu0 %v3198_v0, %s2590_s10  ;;  %s3603_s10 = sld [smem:[#allocation3 + $0x36]] }
 0x41b   :  { %v3393_v18 = vpop.permute.xlu1 %2068  ;;  %v3395_v11 = vpop.permute.xlu0 %2066 }
 0x41c   :  { %5646 = vst [vmem:[#allocation68_spill] sm:$0xff] %v3393_v18  ;;  %5647 = vst [vmem:[#allocation69_spill] sm:$0xff] %v3395_v11  ;;  %v660_v18 = vstv %s3399_s14  ;;  %s5676_s14 = smov 109  }
 0x41d   :  { %1448 = vrot.lane.b32.xlu1 %v3203_v54, %s5648_s15  ;;  %1446 = vrot.lane.b32.xlu0 %v3198_v0, %s5648_s15  ;;  %s3668_s15 = sld [smem:[#allocation3 + $0x38]] }
 0x41f   :  { %v3409_v28 = vpop.permute.xlu1 %2101  ;;  %v3411_v29 = vpop.permute.xlu0 %2099 }
 0x420   :  { %5649 = vst [vmem:[#allocation70_spill] sm:$0xff] %v3409_v28  ;;  %5650 = vst [vmem:[#allocation71_spill] sm:$0xff] %v3411_v29  ;;  %v627_v29 = vstv %s3397_s13  ;;  %s3632_s13 = sld [smem:[#allocation3 + $0x37]] }
 0x421   :  { %1481 = vrot.lane.b32.xlu1 %v3203_v54, %s5651_s20  ;;  %1479 = vrot.lane.b32.xlu0 %v3198_v0, %s5651_s20  ;;  %v628_v38 = vmul.f32 %v627_v29, %v611_v37  ;;  %v3515_v37 = vand.u32 15, %v3486_v24  ;;  %s5686_s20 = smov 98  }
 0x423   :  { %v3425_v11 = vpop.permute.xlu1 %2134  ;;  %v3427_v28 = vpop.permute.xlu0 %2132  ;;  %vm5577_vm4 = vcmp.ge.s32.totalorder %v3515_v37, 3  ;;  %vm5575_vm6 = vcmp.ge.s32.totalorder %v3515_v37, 2 }
 0x424   :  { %5652 = vst [vmem:[#allocation72_spill] sm:$0xff] %v3425_v11  ;;  %5653 = vst [vmem:[#allocation73_spill] sm:$0xff] %v3427_v28 }
 0x425   :  { %1514 = vrot.lane.b32.xlu1 %v3203_v54, %s2593_s2  ;;  %1512 = vrot.lane.b32.xlu0 %v3198_v0, %s2593_s2  ;;  %s5673_s2 = smov 110  }
 0x427   :  { %v3441_v11 = vpop.permute.xlu1 %2167  ;;  %v3443_v28 = vpop.permute.xlu0 %2165 }
 0x428   :  { %5654 = vst [vmem:[#allocation74_spill] sm:$0xff] %v3441_v11  ;;  %5655 = vst [vmem:[#allocation75_spill] sm:$0xff] %v3443_v28  ;;  %v693_v11 = vstv %s3405_s16  ;;  %s3686_s16 = sld [smem:[#allocation3 + $0xb]] }
 0x429   :  { %1547 = vrot.lane.b32.xlu1 %v3203_v54, %s5656_s26  ;;  %1545 = vrot.lane.b32.xlu0 %v3198_v0, %s5656_s26  ;;  %s3780_s26 = sld [smem:[#allocation3 + $0x3b]] }
 0x42b   :  { %v2201_v27 = vpop.permute.xlu1 %2200  ;;  %v2199_v31 = vpop.permute.xlu0 %2198 }
 0x42c   :  { %v3472_v28 = vsel %vm5566_vm10, %v2199_v31, %v2201_v27  ;;  %v3476_v26 = vsel %vm5566_vm10, %v2201_v27, %v2199_v31  ;;  %v3494_v31 = vand.u32 15, %v2773_v45  ;;  %v685_v27 = vsel %vm683_vm12, %v3055_v48, %v3057_v25 }
 0x42d   :  { %5657 = vst [vmem:[#allocation76_spill] sm:$0xff] %v3472_v28  ;;  %5658 = vst [vmem:[#allocation77_spill] sm:$0xff] %v3476_v26  ;;  %1580 = vrot.lane.b32.xlu1 %v3203_v54, %s5659_s28  ;;  %1578 = vrot.lane.b32.xlu0 %v3198_v0, %s5659_s28  ;;  %v629_v26 = vmul.f32 %v627_v29, %v610_v32  ;;  %v661_v32 = vmul.f32 %v660_v18, %v652_v15  ;;  %vm914_vm10 = vcmp.lt.s32.totalorder %v2773_v45, 33  ;;  %s3831_s28 = sld [smem:[#allocation3 + $0xe]] }
 0x42e   :  { %vm5571_vm1 = vcmp.ge.s32.totalorder %v3494_v31, 3  ;;  %vm5572_vm2 = vcmp.ge.s32.totalorder %v3494_v31, 2  ;;  %vm5573_vm8 = vcmp.ge.s32.totalorder %v3494_v31, 1 }
 0x42f   :  { %v623_v40 = vpop.permute.xlu1 %622  ;;  %v621_v44 = vpop.permute.xlu0 %620  ;;  %vm3545_vm5 = vmand %vm513_vm0, %vm5571_vm1 }
 0x430   :  { %v624_v2 = vsel %vm609_vm9, %v621_v44, %v623_v40  ;;  %v625_v29 = vsel %vm609_vm9, %v623_v40, %v621_v44  ;;  %v664_v44 = vstv %s3456_s27  ;;  %v662_v40 = vmul.f32 %v660_v18, %v651_v46  ;;  %vm3564_vm7 = vmand %vm513_vm0, %vm5572_vm2  ;;  %s3817_s27 = sld [smem:[#allocation3 + $0x3c]] }
 0x431   :  { %v632_v41 = vmul.f32 %v631_v47, %v625_v29  ;;  %v633_v28 = vmul.f32 %v631_v47, %v624_v2  ;;  %1613 = vrot.lane.b32.xlu1 %v3203_v54, %s5661_s30  ;;  %1611 = vrot.lane.b32.xlu0 %v3198_v0, %s5661_s30  ;;  %v694_v47 = vmul.f32 %v693_v11, %v685_v27  ;;  %vm848_vm9 = vcmp.lt.s32.totalorder %v2773_v45, 35  ;;  %s3858_s30 = sld [smem:[#allocation3 + $0x3d]] }
 0x432   :  { %v695_v46 = vmul.f32 %v693_v11, %v684_v42  ;;  %v717_v11 = vsel %vm716_vm13, %v3065_v1, %v3063_v51  ;;  %v751_v51 = vsel %vm749_vm14, %v3071_v55, %v3073_v56  ;;  %v5671_v42 = vstv %s3407_s17 }
 0x433   :  { %v656_v2 = vpop.permute.xlu1 %655  ;;  %v654_v15 = vpop.permute.xlu0 %653  ;;  %v634_v48 = vadd.f32 %v632_v41, %v628_v38  ;;  %v635_v25 = vadd.f32 %v633_v28, %v629_v26  ;;  %v5665_v38 = vstv %s3407_s17  ;;  %s5681_s17 = smov 99  }
 0x434   :  { %v657_v29 = vsel %vm650_vm11, %v654_v15, %v656_v2  ;;  %v658_v18 = vsel %vm650_vm11, %v656_v2, %v654_v15  ;;  %v727_v41 = vmul.f32 %v5665_v38, %v718_v43  ;;  %vm5574_vm11 = vcmp.ge.s32.totalorder %v3515_v37, 1 }
 0x435   :  { %v665_v26 = vmul.f32 %v664_v44, %v658_v18  ;;  %v666_v28 = vmul.f32 %v664_v44, %v657_v29  ;;  %1646 = vrot.lane.b32.xlu1 %v3203_v54, %s5664_s7  ;;  %1644 = vrot.lane.b32.xlu0 %v3198_v0, %s5664_s7  ;;  %v697_v44 = vstv %s3497_s29  ;;  %v642_v29 = vsel %vm3545_vm5, %v634_v48, 0.0  ;;  %s5700_s29 = smov 95   ;;  %s3888_s7 = sld [smem:[#allocation3 + $0x3e]] }
 0x436   :  { %v643_v18 = vsel %vm5577_vm4, %v635_v25, 0.0  ;;  %vm881_vm5 = vcmp.lt.s32.totalorder %v2773_v45, 34 }
 0x437   :  { %v667_v1 = vadd.f32 %v665_v26, %v661_v32  ;;  %v668_v43 = vadd.f32 %v666_v28, %v662_v40  ;;  %v689_v2 = vpop.permute.xlu1 %688  ;;  %v687_v15 = vpop.permute.xlu0 %686  ;;  %v783_v28 = vsel %vm782_vm15, %v3081_v58, %v3079_v57 }
 0x438   :  { %v690_v38 = vsel %vm683_vm12, %v687_v15, %v689_v2  ;;  %v691_v24 = vsel %vm683_vm12, %v689_v2, %v687_v15  ;;  %vm3598_vm12 = vmand %vm513_vm0, %vm5573_vm8 }
 0x439   :  { %v675_v32 = vsel %vm3564_vm7, %v667_v1, 0.0  ;;  %v676_v40 = vsel %vm5575_vm6, %v668_v43, 0.0  ;;  %v698_v27 = vmul.f32 %v697_v44, %v691_v24  ;;  %v699_v48 = vmul.f32 %v697_v44, %v690_v38  ;;  %1679 = vrot.lane.b32.xlu1 %v3203_v54, %s5668_s9  ;;  %1677 = vrot.lane.b32.xlu0 %v3198_v0, %s5668_s9  ;;  %s5706_s9 = smov 93  }
 0x43a   :  { %v677_v25 = vadd.f32 %v675_v32, %v642_v29  ;;  %v678_v26 = vadd.f32 %v676_v40, %v643_v18  ;;  %v730_v24 = vstv %s3528_s6  ;;  %v728_v44 = vmul.f32 %v5671_v42, %v717_v11  ;;  %s5705_s6 = smov 94  }
 0x43b   :  { %v750_v1 = vsel %vm749_vm14, %v3073_v56, %v3071_v55  ;;  %v700_v43 = vadd.f32 %v698_v27, %v694_v47  ;;  %v701_v2 = vadd.f32 %v699_v48, %v695_v46  ;;  %v722_v15 = vpop.permute.xlu1 %721  ;;  %v720_v29 = vpop.permute.xlu0 %719  ;;  %v5672_v18 = vstv %s3413_s18  ;;  %s3706_s18 = sld [smem:[#allocation3 + $0x39]] }
 0x43c   :  { %v760_v38 = vmul.f32 %v5672_v18, %v751_v51  ;;  %v784_v32 = vsel %vm782_vm15, %v3079_v57, %v3081_v58  ;;  %v723_v11 = vsel %vm716_vm13, %v720_v29, %v722_v15  ;;  %v724_v40 = vsel %vm716_vm13, %v722_v15, %v720_v29 }
 0x43d   :  { %v708_v55 = vsel %vm3598_vm12, %v700_v43, 0.0  ;;  %v709_v56 = vsel %vm5574_vm11, %v701_v2, 0.0  ;;  %v731_v47 = vmul.f32 %v730_v24, %v724_v40  ;;  %v732_v46 = vmul.f32 %v730_v24, %v723_v11  ;;  %1712 = vrot.lane.b32.xlu1 %v3203_v54, %s5673_s2  ;;  %1710 = vrot.lane.b32.xlu0 %v3198_v0, %s5673_s2  ;;  %s3944_s2 = sld [smem:[#allocation3 + $0x12]] }
 0x43e   :  { %v5674_v51 = vmov %v5672_v18  ;;  %v710_v48 = vadd.f32 %v708_v55, %v677_v25  ;;  %v711_v42 = vadd.f32 %v709_v56, %v678_v26  ;;  %v763_v15 = vstv %s3569_s8  ;;  %s3906_s8 = sld [smem:[#allocation3 + $0x11]] }
 0x43f   :  { %v761_v27 = vmul.f32 %v5674_v51, %v750_v1  ;;  %v733_v43 = vadd.f32 %v731_v47, %v727_v41  ;;  %v734_v24 = vadd.f32 %v732_v46, %v728_v44  ;;  %v755_v2 = vpop.permute.xlu1 %754  ;;  %vm5570_vm13 = vcmp.lt.s32.totalorder %v3494_v31, 15  ;;  %v753_v29 = vpop.permute.xlu0 %752 }
 0x440   :  { %v5675_v18 = vstv %s3415_s19  ;;  %v817_v25 = vsel %vm815_vm3, %v3087_v12, %v3089_v13  ;;  %v756_v26 = vsel %vm749_vm14, %v753_v29, %v755_v2  ;;  %v757_v57 = vsel %vm749_vm14, %v755_v2, %v753_v29  ;;  %vm3663_vm7 = vmand %vm513_vm0, %vm5570_vm13  ;;  %s3722_s19 = sld [smem:[#allocation3 + $0xc]] }
 0x441   :  { %v793_v1 = vmul.f32 %v5675_v18, %v784_v32  ;;  %v741_v58 = vsel %vm513_vm0, %v733_v43, 0.0  ;;  %v744_v41 = vadd.f32 %v734_v24, %v711_v42  ;;  %v764_v44 = vmul.f32 %v763_v15, %v757_v57  ;;  %1745 = vrot.lane.b32.xlu1 %v3203_v54, %s5676_s14  ;;  %1743 = vrot.lane.b32.xlu0 %v3198_v0, %s5676_s14  ;;  %s3956_s14 = sld [smem:[#allocation3 + $0x13]] }
 0x442   :  { %v765_v32 = vmul.f32 %v763_v15, %v756_v26  ;;  %v5677_v11 = vmov %v5675_v18  ;;  %v743_v55 = vadd.f32 %v741_v58, %v710_v48  ;;  %vm5567_vm14 = vcmp.lt.s32.totalorder %v3515_v37, 15 }
 0x443   :  { %v794_v40 = vmul.f32 %v5677_v11, %v783_v28  ;;  %v796_v47 = vstv %s3603_s10  ;;  %v816_v46 = vsel %vm815_vm3, %v3089_v13, %v3087_v12  ;;  %v766_v51 = vadd.f32 %v764_v44, %v760_v38  ;;  %v788_v42 = vpop.permute.xlu1 %787  ;;  %v786_v15 = vpop.permute.xlu0 %785  ;;  %s3925_s10 = sld [smem:[#allocation3 + $0x3f]] }
 0x444   :  { %v767_v48 = vadd.f32 %v765_v32, %v761_v27  ;;  %vm5568_vm12 = vcmp.lt.s32.totalorder %v3494_v31, 14  ;;  %v5680_v28 = vstv %s3421_s21  ;;  %v850_v24 = vsel %vm848_vm9, %v3095_v5, %v3097_v6  ;;  %s3742_s21 = sld [smem:[#allocation3 + $0x3a]] }
 0x445   :  { %v826_v43 = vmul.f32 %v5680_v28, %v817_v25  ;;  %v789_v2 = vsel %vm782_vm15, %v786_v15, %v788_v42  ;;  %v790_v12 = vsel %vm782_vm15, %v788_v42, %v786_v15  ;;  %v774_v13 = vsel %vm3663_vm7, %v766_v51, 0.0  ;;  %1778 = vrot.lane.b32.xlu1 %v3203_v54, %s5681_s17  ;;  %1776 = vrot.lane.b32.xlu0 %v3198_v0, %s5681_s17  ;;  %vm3701_vm7 = vmand %vm513_vm0, %vm5568_vm12  ;;  %s3988_s17 = sld [smem:[#allocation3 + $0x16]] }
 0x446   :  { %v775_v38 = vsel %vm5567_vm14, %v767_v48, 0.0  ;;  %v797_v27 = vmul.f32 %v796_v47, %v790_v12  ;;  %v798_v29 = vmul.f32 %v796_v47, %v789_v2  ;;  %v776_v18 = vadd.f32 %v774_v13, %v743_v55 }
 0x447   :  { %v777_v25 = vadd.f32 %v775_v38, %v744_v41  ;;  %vm5569_vm15 = vcmp.lt.s32.totalorder %v3515_v37, 14  ;;  %v829_v57 = vstv %s3632_s13  ;;  %v5684_v58 = vmov %v5680_v28  ;;  %v821_v56 = vpop.permute.xlu1 %820  ;;  %v819_v41 = vpop.permute.xlu0 %818  ;;  %s5710_s13 = smov 83  }
 0x448   :  { %v827_v44 = vmul.f32 %v5684_v58, %v816_v46  ;;  %v799_v32 = vadd.f32 %v797_v27, %v793_v1  ;;  %v800_v11 = vadd.f32 %v798_v29, %v794_v40  ;;  %vm5578_vm14 = vcmp.lt.s32.totalorder %v3494_v31, 13 }
 0x449   :  { %v849_v55 = vsel %vm848_vm9, %v3097_v6, %v3095_v5  ;;  %v5685_v47 = vstv %s3423_s22  ;;  %v822_v48 = vsel %vm815_vm3, %v819_v41, %v821_v56  ;;  %v823_v1 = vsel %vm815_vm3, %v821_v56, %v819_v41  ;;  %1811 = vrot.lane.b32.xlu1 %v3203_v54, %s5686_s20  ;;  %1809 = vrot.lane.b32.xlu0 %v3198_v0, %s5686_s20  ;;  %s3760_s22 = sld [smem:[#allocation3 + $0xd]] }
 0x44a   :  { %v859_v51 = vmul.f32 %v5685_v47, %v850_v24  ;;  %vm947_vm12 = vcmp.lt.s32.totalorder %v2773_v45, 32  ;;  %v807_v40 = vsel %vm3701_vm7, %v799_v32, 0.0  ;;  %v808_v5 = vsel %vm5569_vm15, %v800_v11, 0.0  ;;  %vm3737_vm7 = vmand %vm513_vm0, %vm5578_vm14  ;;  %s4011_s20 = sld [smem:[#allocation3 + $0x19]] }
 0x44b   :  { %v830_v6 = vmul.f32 %v829_v57, %v823_v1  ;;  %v831_v46 = vmul.f32 %v829_v57, %v822_v48  ;;  %v809_v42 = vadd.f32 %v807_v40, %v776_v18  ;;  %v810_v15 = vadd.f32 %v808_v5, %v777_v25  ;;  %v854_v27 = vpop.permute.xlu1 %853  ;;  %v852_v29 = vpop.permute.xlu0 %851 }
 0x44c   :  { %vm5576_vm3 = vcmp.lt.s32.totalorder %v3515_v37, 13  ;;  %v862_v24 = vstv %s3668_s15  ;;  %v5689_v2 = vmov %v5685_v47  ;;  %vm519_vm15 = vcmp.ge.s32.totalorder %v2773_v45, 32  ;;  %s3972_s15 = sld [smem:[#allocation3 + $0x14]] }
 0x44d   :  { %v860_v12 = vmul.f32 %v5689_v2, %v849_v55  ;;  %v832_v13 = vadd.f32 %v830_v6, %v826_v43  ;;  %v833_v38 = vadd.f32 %v831_v46, %v827_v44  ;;  %v882_v18 = vsel %vm881_vm5, %v3105_v60, %v3103_v59  ;;  %1844 = vrot.lane.b32.xlu1 %v3203_v54, %s5690_s25 }
 0x44e   :  { %v883_v25 = vsel %vm881_vm5, %v3103_v59, %v3105_v60  ;;  %v855_v43 = vsel %vm848_vm9, %v852_v29, %v854_v27  ;;  %v856_v26 = vsel %vm848_vm9, %v854_v27, %v852_v29  ;;  %vm980_vm0 = vcmp.lt.s32.totalorder %v2773_v45, 31  ;;  %1842 = vrot.lane.b32.xlu0 %v3198_v0, %s5690_s25  ;;  %vm3775_vm9 = vmand %vm519_vm15, %vm5571_vm1  ;;  %s5718_s25 = smov 81  }
 0x44f   :  { %v840_v57 = vsel %vm3737_vm7, %v832_v13, 0.0  ;;  %v841_v58 = vsel %vm5576_vm3, %v833_v38, 0.0  ;;  %v863_v44 = vmul.f32 %v862_v24, %v856_v26  ;;  %v864_v59 = vmul.f32 %v862_v24, %v855_v43  ;;  %v887_v6 = vpop.permute.xlu1 %886  ;;  %v885_v46 = vpop.permute.xlu0 %884 }
 0x450   :  { %v990_v60 = vstv %s3686_s16  ;;  %v842_v32 = vadd.f32 %v840_v57, %v809_v42  ;;  %v843_v11 = vadd.f32 %v841_v58, %v810_v15  ;;  %v895_v41 = vstv %s3706_s18  ;;  %s3982_s16 = sld [smem:[#allocation3 + $0x15]]  ;;  %s5715_s18 = smov 82  }
 0x451   :  { %v5693_v55 = vstv %s3429_s23  ;;  %v865_v40 = vadd.f32 %v863_v44, %v859_v51  ;;  %v866_v5 = vadd.f32 %v864_v59, %v860_v12  ;;  %v915_v42 = vsel %vm914_vm10, %v3113_v62, %v3111_v61  ;;  %s5695_s23 = smov 96  }
 0x452   :  { %v892_v47 = vmul.f32 %v5693_v55, %v883_v25  ;;  %v5694_v48 = vmov %v5693_v55  ;;  %v916_v15 = vsel %vm914_vm10, %v3111_v61, %v3113_v62  ;;  %v888_v28 = vsel %vm881_vm5, %v885_v46, %v887_v6  ;;  %1877 = vrot.lane.b32.xlu1 %v3203_v54, %s5695_s23  ;;  %1875 = vrot.lane.b32.xlu0 %v3198_v0, %s5695_s23  ;;  %s4063_s23 = sld [smem:[#allocation3 + $0x1b]] }
 0x453   :  { %v893_v1 = vmul.f32 %v5694_v48, %v882_v18  ;;  %v889_v51 = vsel %vm881_vm5, %v887_v6, %v885_v46  ;;  %vm1013_vm7 = vcmp.lt.s32.totalorder %v2773_v45, 30  ;;  %v873_v24 = vsel %vm3775_vm9, %v865_v40, 0.0  ;;  %vm3812_vm5 = vmand %vm519_vm15, %vm5572_vm2  ;;  %v920_v44 = vpop.permute.xlu1 %919  ;;  %v918_v59 = vpop.permute.xlu0 %917 }
 0x454   :  { %v874_v2 = vsel %vm5577_vm4, %v866_v5, 0.0  ;;  %v896_v12 = vmul.f32 %v895_v41, %v889_v51  ;;  %v897_v13 = vmul.f32 %v895_v41, %v888_v28  ;;  %v1023_v61 = vstv %s3722_s19  ;;  %s3999_s19 = sld [smem:[#allocation3 + $0x17]] }
 0x455   :  { %v875_v62 = vadd.f32 %v873_v24, %v842_v32  ;;  %v876_v38 = vadd.f32 %v874_v2, %v843_v11  ;;  %v928_v29 = vstv %s3742_s21  ;;  %v5698_v18 = vstv %s3431_s24  ;;  %s3838_s24 = sld [smem:[#allocation3 + $0xf]] }
 0x456   :  { %v925_v25 = vmul.f32 %v5698_v18, %v916_v15  ;;  %v5699_v43 = vmov %v5698_v18  ;;  %v898_v57 = vadd.f32 %v896_v12, %v892_v47  ;;  %v899_v58 = vadd.f32 %v897_v13, %v893_v1  ;;  %1910 = vrot.lane.b32.xlu1 %v3203_v54, %s5700_s29  ;;  %1908 = vrot.lane.b32.xlu0 %v3198_v0, %s5700_s29  ;;  %s4022_s21 = sld [smem:[#allocation3 + $0x40]] }
 0x457   :  { %v926_v26 = vmul.f32 %v5699_v43, %v915_v42  ;;  %v948_v32 = vsel %vm947_vm12, %v3121_v10, %v3119_v7  ;;  %v949_v11 = vsel %vm947_vm12, %v3119_v7, %v3121_v10  ;;  %v921_v56 = vsel %vm914_vm10, %v918_v59, %v920_v44  ;;  %v953_v2 = vpop.permute.xlu1 %952  ;;  %v951_v12 = vpop.permute.xlu0 %950  ;;  %s4169_s29 = sld [smem:[#allocation3 + $0x45]] }
 0x458   :  { %v922_v41 = vsel %vm914_vm10, %v920_v44, %v918_v59  ;;  %vm1046_vm9 = vcmp.lt.s32.totalorder %v2773_v45, 29  ;;  %v906_v55 = vsel %vm3812_vm5, %v898_v57, 0.0  ;;  %v907_v7 = vsel %vm5575_vm6, %v899_v58, 0.0  ;;  %vm3853_vm10 = vmand %vm519_vm15, %vm5573_vm8 }
 0x459   :  { %v929_v10 = vmul.f32 %v928_v29, %v922_v41  ;;  %v930_v47 = vmul.f32 %v928_v29, %v921_v56  ;;  %v1056_v48 = vstv %s3760_s22  ;;  %v908_v1 = vadd.f32 %v906_v55, %v875_v62  ;;  %s4024_s22 = sld [smem:[#allocation3 + $0x1a]] }
 0x45a   :  { %v909_v40 = vadd.f32 %v907_v7, %v876_v38  ;;  %v961_v6 = vstv %s3780_s26  ;;  %v5703_v46 = vstv %s3439_s3  ;;  %v981_v13 = vsel %vm980_vm0, %v3129_v17, %v3127_v16  ;;  %s3876_s3 = sld [smem:[#allocation3 + $0x10]]  ;;  %1943 = vrot.lane.b32.xlu1 %v3203_v54, %s5705_s6  ;;  %1941 = vrot.lane.b32.xlu0 %v3198_v0, %s5705_s6 }
 0x45b   :  { %v958_v42 = vmul.f32 %v5703_v46, %v949_v11  ;;  %v5704_v15 = vmov %v5703_v46  ;;  %v931_v51 = vadd.f32 %v929_v10, %v925_v25  ;;  %v932_v24 = vadd.f32 %v930_v47, %v926_v26  ;;  %v984_v11 = vpop.permute.xlu0 %983  ;;  %s4046_s26 = sld [smem:[#allocation3 + $0x41]] }
 0x45c   :  { %v959_v28 = vmul.f32 %v5704_v15, %v948_v32  ;;  %v982_v62 = vsel %vm980_vm0, %v3127_v16, %v3129_v17  ;;  %v954_v38 = vsel %vm947_vm12, %v951_v12, %v953_v2  ;;  %v955_v27 = vsel %vm947_vm12, %v953_v2, %v951_v12  ;;  %v986_v32 = vpop.permute.xlu1 %985  ;;  %vm3920_vm12 = vmand %vm519_vm15, %vm5570_vm13  ;;  %s4242_s6 = sld [smem:[#allocation3 + $0x1f]] }
 0x45d   :  { %v939_v29 = vsel %vm3853_vm10, %v931_v51, 0.0  ;;  %v940_v18 = vsel %vm5574_vm11, %v932_v24, 0.0  ;;  %v962_v25 = vmul.f32 %v961_v6, %v955_v27  ;;  %v963_v43 = vmul.f32 %v961_v6, %v954_v38 }
 0x45e   :  { %vm1079_vm5 = vcmp.lt.s32.totalorder %v2773_v45, 19  ;;  %v941_v16 = vadd.f32 %v939_v29, %v908_v1  ;;  %v942_v17 = vadd.f32 %v940_v18, %v909_v40  ;;  %v994_v26 = vstv %s3817_s27  ;;  %1976 = vrot.lane.b32.xlu1 %v3203_v54, %s5706_s9  ;;  %1974 = vrot.lane.b32.xlu0 %v3198_v0, %s5706_s9  ;;  %s5721_s27 = smov 80   ;;  %s4268_s9 = sld [smem:[#allocation3 + $0x21]] }
 0x45f   :  { %v991_v57 = vmul.f32 %v990_v60, %v982_v62  ;;  %v992_v58 = vmul.f32 %v990_v60, %v981_v13  ;;  %v964_v44 = vadd.f32 %v962_v25, %v958_v42  ;;  %v965_v59 = vadd.f32 %v963_v43, %v959_v28  ;;  %v1017_v24 = vpop.permute.xlu0 %1016 }
 0x460   :  { %v1014_v56 = vsel %vm1013_vm7, %v3137_v20, %v3135_v19  ;;  %v1015_v41 = vsel %vm1013_vm7, %v3135_v19, %v3137_v20  ;;  %v987_v60 = vsel %vm980_vm0, %v984_v11, %v986_v32  ;;  %v988_v55 = vsel %vm980_vm0, %v986_v32, %v984_v11  ;;  %v1019_v51 = vpop.permute.xlu1 %1018 }
 0x461   :  { %v972_v7 = vsel %vm519_vm15, %v964_v44, 0.0  ;;  %v975_v10 = vadd.f32 %v965_v59, %v942_v17  ;;  %v995_v47 = vmul.f32 %v994_v26, %v988_v55  ;;  %v996_v1 = vmul.f32 %v994_v26, %v987_v60 }
 0x462   :  { %v1089_v19 = vstv %s3831_s28  ;;  %v1122_v20 = vstv %s3838_s24  ;;  %v974_v40 = vadd.f32 %v972_v7, %v941_v16  ;;  %v1027_v6 = vstv %s3858_s30  ;;  %2009 = vrot.lane.b32.xlu1 %v3203_v54, %s5710_s13  ;;  %s4100_s28 = sld [smem:[#allocation3 + $0x42]] }
 0x463   :  { %v1024_v46 = vmul.f32 %v1023_v61, %v1015_v41  ;;  %v1025_v42 = vmul.f32 %v1023_v61, %v1014_v56  ;;  %v997_v15 = vadd.f32 %v995_v47, %v991_v57  ;;  %v998_v28 = vadd.f32 %v996_v1, %v992_v58  ;;  %2007 = vrot.lane.b32.xlu0 %v3198_v0, %s5710_s13  ;;  %v1050_v44 = vpop.permute.xlu0 %1049  ;;  %s4117_s24 = sld [smem:[#allocation3 + $0x43]] }
 0x464   :  { %v1047_v2 = vsel %vm1046_vm9, %v3145_v30, %v3143_v21  ;;  %v1048_v12 = vsel %vm1046_vm9, %v3143_v21, %v3145_v30  ;;  %v1020_v13 = vsel %vm1013_vm7, %v1017_v24, %v1019_v51  ;;  %v1021_v61 = vsel %vm1013_vm7, %v1019_v51, %v1017_v24  ;;  %v1052_v58 = vpop.permute.xlu1 %1051  ;;  %s4201_s30 = sld [smem:[#allocation3 + $0x1d]] }
 0x465   :  { %vm1112_vm0 = vcmp.lt.s32.totalorder %v2773_v45, 18  ;;  %v1005_v62 = vsel %vm3920_vm12, %v997_v15, 0.0  ;;  %vm5709_vm10 = vcmp.lt.s32.totalorder %v3515_v37, 15  ;;  %v1028_v21 = vmul.f32 %v1027_v6, %v1021_v61  ;;  %s4302_s13 = sld [smem:[#allocation3 + $0x48]] }
 0x466   :  { %v1006_v38 = vsel %vm5709_vm10, %v998_v28, 0.0  ;;  %v1029_v30 = vmul.f32 %v1027_v6, %v1020_v13  ;;  %vm1145_vm7 = vcmp.lt.s32.totalorder %v2773_v45, 17  ;;  %v1155_v27 = vstv %s3876_s3  ;;  %2042 = vrot.lane.b32.xlu1 %v3203_v54, %s5715_s18  ;;  %s4228_s3 = sld [smem:[#allocation3 + $0x1e]] }
 0x467   :  { %v1007_v29 = vadd.f32 %v1005_v62, %v974_v40  ;;  %v1008_v18 = vadd.f32 %v1006_v38, %v975_v10  ;;  %vm5711_vm12 = vcmp.lt.s32.totalorder %v3494_v31, 14  ;;  %v1060_v43 = vstv %s3888_s7  ;;  %2040 = vrot.lane.b32.xlu0 %v3198_v0, %s5715_s18  ;;  %v1083_v6 = vpop.permute.xlu0 %1082  ;;  %s4258_s7 = sld [smem:[#allocation3 + $0x20]] }
 0x468   :  { %vm3962_vm10 = vmand %vm519_vm15, %vm5711_vm12  ;;  %v1057_v16 = vmul.f32 %v1056_v48, %v1048_v12  ;;  %v1058_v17 = vmul.f32 %v1056_v48, %v1047_v2  ;;  %vm1178_vm13 = vcmp.lt.s32.totalorder %v2773_v45, 16  ;;  %v1030_v26 = vadd.f32 %v1028_v21, %v1024_v46  ;;  %v1085_v5 = vpop.permute.xlu1 %1084  ;;  %s4345_s18 = sld [smem:[#allocation3 + $0x28]] }
 0x469   :  { %v1031_v57 = vadd.f32 %v1029_v30, %v1025_v42  ;;  %v1080_v59 = vsel %vm1079_vm5, %v3153_v22, %v3151_v33  ;;  %v1081_v32 = vsel %vm1079_vm5, %v3151_v33, %v3153_v22  ;;  %v1053_v48 = vsel %vm1046_vm9, %v1050_v44, %v1052_v58 }
 0x46a   :  { %v1054_v11 = vsel %vm1046_vm9, %v1052_v58, %v1050_v44  ;;  %v1038_v56 = vsel %vm3962_vm10, %v1030_v26, 0.0  ;;  %vm5714_vm12 = vcmp.lt.s32.totalorder %v3515_v37, 14  ;;  %v1062_v55 = vmul.f32 %v1060_v43, %v1053_v48  ;;  %vm4005_vm9 = vmand %vm519_vm15, %vm5578_vm14  ;;  %2075 = vrot.lane.b32.xlu1 %v3203_v54, %s5718_s25 }
 0x46b   :  { %v1039_v41 = vsel %vm5714_vm12, %v1031_v57, 0.0  ;;  %v1061_v60 = vmul.f32 %v1060_v43, %v1054_v11  ;;  %v1188_v33 = vstv %s3906_s8  ;;  %v1040_v22 = vadd.f32 %v1038_v56, %v1007_v29  ;;  %2073 = vrot.lane.b32.xlu0 %v3198_v0, %s5718_s25  ;;  %s4266_s8 = sld [smem:[#allocation3 + $0x47]] }
 0x46c   :  { %v1041_v7 = vadd.f32 %v1039_v41, %v1008_v18  ;;  %v1093_v47 = vstv %s3925_s10  ;;  %vm1211_vm10 = vcmp.lt.s32.totalorder %v2773_v45, 15  ;;  %v1064_v40 = vadd.f32 %v1062_v55, %v1058_v17  ;;  %v1118_v29 = vpop.permute.xlu1 %1117  ;;  %v1116_v18 = vpop.permute.xlu0 %1115  ;;  %s4273_s10 = sld [smem:[#allocation3 + $0x22]] }
 0x46d   :  { %v1063_v1 = vadd.f32 %v1061_v60, %v1057_v16  ;;  %vm525_vm12 = vcmp.ge.s32.totalorder %v2773_v45, 16  ;;  %v1090_v46 = vmul.f32 %v1089_v19, %v1081_v32  ;;  %v1091_v42 = vmul.f32 %v1089_v19, %v1080_v59  ;;  %s4358_s25 = sld [smem:[#allocation3 + $0x2a]] }
 0x46e   :  { %v1086_v15 = vsel %vm1079_vm5, %v1083_v6, %v1085_v5  ;;  %v1087_v28 = vsel %vm1079_vm5, %v1085_v5, %v1083_v6  ;;  %v1072_v24 = vsel %vm5576_vm3, %v1064_v40, 0.0  ;;  %v1221_v19 = vstv %s3944_s2  ;;  %vm4040_vm5 = vmand %vm525_vm12, %vm5571_vm1  ;;  %2108 = vrot.lane.b32.xlu1 %v3203_v54, %s5721_s27  ;;  %s4285_s2 = sld [smem:[#allocation3 + $0x23]] }
 0x46f   :  { %v1071_v51 = vsel %vm4005_vm9, %v1063_v1, 0.0  ;;  %v1094_v2 = vmul.f32 %v1093_v47, %v1087_v28  ;;  %v1095_v12 = vmul.f32 %v1093_v47, %v1086_v15  ;;  %vm1244_vm15 = vcmp.lt.s32.totalorder %v2773_v45, 14  ;;  %2106 = vrot.lane.b32.xlu0 %v3198_v0, %s5721_s27  ;;  %s4370_s27 = sld [smem:[#allocation3 + $0x2c]] }
 0x470   :  { %v1073_v13 = vadd.f32 %v1071_v51, %v1040_v22  ;;  %v1074_v61 = vadd.f32 %v1072_v24, %v1041_v7  ;;  %v1254_v38 = vstv %s3956_s14  ;;  %vm1277_vm9 = vcmp.lt.s32.totalorder %v2773_v45, 13  ;;  %v1149_v56 = vpop.permute.xlu0 %1148  ;;  %s4304_s14 = sld [smem:[#allocation3 + $0x24]] }
 0x471   :  { %v1096_v21 = vadd.f32 %v1094_v2, %v1090_v46  ;;  %v1097_v30 = vadd.f32 %v1095_v12, %v1091_v42  ;;  %v1114_v25 = vsel %vm1112_vm0, %v3159_v4, %v3161_v34  ;;  %v1287_v43 = vstv %s3972_s15  ;;  %s4310_s15 = sld [smem:[#allocation3 + $0x25]] }
 0x472   :  { %vm1310_vm1 = vcmp.lt.s32.totalorder %v2773_v45, 3  ;;  %v1320_v16 = vstv %s3982_s16  ;;  %v1113_v17 = vsel %vm1112_vm0, %v3161_v34, %v3159_v4  ;;  %v1147_v26 = vsel %vm1145_vm7, %v3167_v14, %v3169_v35  ;;  %2141 = vrot.lane.b32.xlu1 %v3203_v54, %s2612_s12  ;;  %s4328_s16 = sld [smem:[#allocation3 + $0x26]] }
 0x473   :  { %v1104_v57 = vsel %vm4040_vm5, %v1096_v21, 0.0  ;;  %v1105_v58 = vsel %vm5577_vm4, %v1097_v30, 0.0  ;;  %v1146_v4 = vsel %vm1145_vm7, %v3169_v35, %v3167_v14  ;;  %v1180_v34 = vsel %vm1178_vm13, %v3175_v36, %v3177_v39  ;;  %v1151_v35 = vpop.permute.xlu1 %1150  ;;  %2139 = vrot.lane.b32.xlu0 %v3198_v0, %s2612_s12  ;;  %s4135_s12 = sld [smem:[#allocation3 + $0x44]] }
 0x474   :  { %vm1343_vm5 = vcmp.lt.s32.totalorder %v2773_v45, 2  ;;  %v4082_v44 = vadd.f32 %v1104_v57, %v1073_v13  ;;  %v4084_v59 = vadd.f32 %v1105_v58, %v1074_v61  ;;  %v4088_v32 = vmul.f32 %v1122_v20, %v1114_v25  ;;  %v1182_v46 = vpop.permute.xlu0 %1181 }
 0x475   :  { %v1353_v48 = vstv %s3988_s17  ;;  %v1386_v11 = vstv %s3999_s19  ;;  %v1453_v14 = vstv %s4011_s20  ;;  %v1124_v41 = vmul.f32 %v1122_v20, %v1113_v17  ;;  %s4334_s17 = sld [smem:[#allocation3 + $0x27]] }
 0x476   :  { %v1156_v60 = vmul.f32 %v1155_v27, %v1147_v26  ;;  %v1126_v55 = vstv %s4022_s21  ;;  %v1119_v22 = vsel %vm1112_vm0, %v1116_v18, %v1118_v29  ;;  %v1157_v7 = vmul.f32 %v1155_v27, %v1146_v4  ;;  %2174 = vrot.lane.b32.xlu1 %v3203_v54, %s2613_s1  ;;  %s4352_s21 = sld [smem:[#allocation3 + $0x29]] }
 0x477   :  { %v1179_v10 = vsel %vm1178_vm13, %v3177_v39, %v3175_v36  ;;  %v4110_v47 = vmul.f32 %v1188_v33, %v1180_v34  ;;  %v1486_v20 = vstv %s4024_s22  ;;  %v1212_v27 = vsel %vm1211_vm10, %v3185_v63, %v3183_v3  ;;  %2172 = vrot.lane.b32.xlu0 %v3198_v0, %s2613_s1  ;;  %s4192_s1 = sld [smem:[#allocation3 + $0x1c]] }
 0x478   :  { %v1213_v36 = vsel %vm1211_vm10, %v3183_v3, %v3185_v63  ;;  %v1245_v39 = vsel %vm1244_vm15, %v3193_v52, %v3191_v53  ;;  %v1246_v1 = vsel %vm1244_vm15, %v3191_v53, %v3193_v52  ;;  %v1120_v40 = vsel %vm1112_vm0, %v1118_v29, %v1116_v18  ;;  %v1184_v3 = vpop.permute.xlu1 %1183  ;;  %v1215_v30 = vpop.permute.xlu0 %1214  ;;  %s4379_s19 = sld [smem:[#allocation3 + $0x2d]] }
 0x479   :  { %v1128_v5 = vmul.f32 %v1126_v55, %v1119_v22  ;;  %v1159_v6 = vstv %s4046_s26  ;;  %v1153_v63 = vsel %vm1145_vm7, %v1151_v35, %v1149_v56  ;;  %v4144_v42 = vmul.f32 %v1188_v33, %v1179_v10  ;;  %s4367_s26 = sld [smem:[#allocation3 + $0x2b]] }
 0x47a   :  { %v1278_v52 = vsel %vm1277_vm9, %v3211_v23, %v3209_v8  ;;  %v1279_v53 = vsel %vm1277_vm9, %v3209_v8, %v3211_v23  ;;  %v1152_v15 = vsel %vm1145_vm7, %v1149_v56, %v1151_v35  ;;  %v4156_v28 = vmul.f32 %v1221_v19, %v1213_v36  ;;  %2207 = vrot.lane.b32.xlu1 %v3203_v54, %s2614_s11  ;;  %vm4220_vm7 = vmand %vm525_vm12, %vm5572_vm2  ;;  %s4569_s20 = sld [smem:[#allocation3 + $0x4a]] }
 0x47b   :  { %v4158_v51 = vmul.f32 %v1221_v19, %v1212_v27  ;;  %v1312_v33 = vsel %vm1310_vm1, %v3217_v49, %v3219_v50  ;;  %v1519_v24 = vstv %s4063_s23  ;;  %v4173_v8 = vmul.f32 %v1254_v38, %v1246_v1  ;;  %2205 = vrot.lane.b32.xlu0 %v3198_v0, %s2614_s11  ;;  %s4226_s11 = sld [smem:[#allocation3 + $0x46]] }
 0x47c   :  { %v4177_v23 = vmul.f32 %v1254_v38, %v1245_v39  ;;  %vm1376_vm0 = vcmp.lt.s32.totalorder %v2773_v45, 1  ;;  %v1127_v2 = vmul.f32 %v1126_v55, %v1120_v40  ;;  %v1160_v12 = vmul.f32 %v1159_v6, %v1153_v63  ;;  %v1217_v21 = vpop.permute.xlu1 %1216  ;;  %s4625_s22 = sld [smem:[#allocation3 + $0x4b]] }
 0x47d   :  { %v4180_v19 = vmul.f32 %v1287_v43, %v1279_v53  ;;  %v4182_v13 = vmul.f32 %v1287_v43, %v1278_v52  ;;  %v1130_v61 = vadd.f32 %v1128_v5, %v1124_v41  ;;  %v1161_v62 = vmul.f32 %v1159_v6, %v1152_v15  ;;  %v5722_v43 = vld [vmem:[#allocation27_spill] sm:$0xff]  ;;  %s4659_s23 = sld [smem:[#allocation3 + $0x4c]] }
 0x47e   :  { %v1311_v29 = vsel %vm1310_vm1, %v3219_v50, %v3217_v49  ;;  %v4190_v38 = vmul.f32 %v1320_v16, %v1312_v33  ;;  %v1192_v18 = vstv %s4100_s28  ;;  %v1186_v25 = vsel %vm1178_vm13, %v1184_v3, %v1182_v46  ;;  %s4387_s28 = sld [smem:[#allocation3 + $0x2e]] }
 0x47f   :  { %v1344_v17 = vsel %vm1343_vm5, %v5722_v43, %v3225_v9  ;;  %v1225_v26 = vstv %s4117_s24  ;;  %v1218_v49 = vsel %vm1211_vm10, %v1215_v30, %v1217_v21  ;;  %v1219_v50 = vsel %vm1211_vm10, %v1217_v21, %v1215_v30  ;;  %vm4236_vm10 = vmand %vm525_vm12, %vm5573_vm8  ;;  %s4395_s24 = sld [smem:[#allocation3 + $0x2f]] }
 0x480   :  { %v1345_v57 = vsel %vm1343_vm5, %v3225_v9, %v5722_v43  ;;  %v1129_v4 = vadd.f32 %v1127_v2, %v4088_v32  ;;  %v1162_v34 = vadd.f32 %v1160_v12, %v1156_v60  ;;  %v1258_v54 = vstv %s4135_s12  ;;  %v1250_v41 = vpop.permute.xlu1 %1249  ;;  %v1248_v60 = vpop.permute.xlu0 %1247  ;;  %v5727_v12 = vld [vmem:[#allocation28_spill] sm:$0xff]  ;;  %s4399_s12 = sld [smem:[#allocation3 + $0x30]] }
 0x481   :  { %v1138_v0 = vsel %vm5575_vm6, %v1130_v61, 0.0  ;;  %v1163_v32 = vadd.f32 %v1161_v62, %v1157_v7  ;;  %v1185_v35 = vsel %vm1178_vm13, %v1182_v46, %v1184_v3  ;;  %v1193_v56 = vmul.f32 %v1192_v18, %v1186_v25  ;;  %v5728_v61 = vld [vmem:[#allocation29_spill] sm:$0xff] }
 0x482   :  { %v1226_v55 = vmul.f32 %v1225_v26, %v1219_v50  ;;  %v1227_v22 = vmul.f32 %v1225_v26, %v1218_v49  ;;  %v1251_v10 = vsel %vm1244_vm15, %v1248_v60, %v1250_v41  ;;  %v1252_v27 = vsel %vm1244_vm15, %v1250_v41, %v1248_v60 }
 0x483   :  { %v1322_v36 = vmul.f32 %v1320_v16, %v1311_v29  ;;  %v4252_v7 = vmul.f32 %v1353_v48, %v1345_v57  ;;  %v4256_v39 = vmul.f32 %v1353_v48, %v1344_v17  ;;  %v1291_v1 = vstv %s4169_s29  ;;  %s4697_s29 = sld [smem:[#allocation3 + $0x4d]] }
 0x484   :  { %v1137_v40 = vsel %vm4220_vm7, %v1129_v4, 0.0  ;;  %v1140_v5 = vadd.f32 %v1138_v0, %v4084_v59  ;;  %v1170_v6 = vsel %vm4236_vm10, %v1162_v34, 0.0  ;;  %v1194_v63 = vmul.f32 %v1192_v18, %v1185_v35  ;;  %v1283_v52 = vpop.permute.xlu1 %1282  ;;  %v1281_v53 = vpop.permute.xlu0 %1280 }
 0x485   :  { %v1171_v16 = vsel %vm5574_vm11, %v1163_v32, 0.0  ;;  %v1195_v48 = vadd.f32 %v1193_v56, %v4110_v47  ;;  %v1259_v3 = vmul.f32 %v1258_v54, %v1252_v27  ;;  %v1260_v46 = vmul.f32 %v1258_v54, %v1251_v10 }
 0x486   :  { %v1228_v59 = vadd.f32 %v1226_v55, %v4156_v28  ;;  %v1229_v15 = vadd.f32 %v1227_v22, %v4158_v51  ;;  %v1284_v33 = vsel %vm1277_vm9, %v1281_v53, %v1283_v52  ;;  %v1285_v2 = vsel %vm1277_vm9, %v1283_v52, %v1281_v53 }
 0x487   :  { %v1377_v47 = vsel %vm1376_vm0, %v5728_v61, %v5727_v12  ;;  %v1139_v62 = vadd.f32 %v1137_v40, %v4082_v44  ;;  %vm5729_vm13 = vcmp.lt.s32.totalorder %v3494_v31, 15  ;;  %v1292_v51 = vmul.f32 %v1291_v1, %v1285_v2 }
 0x488   :  { %vm4292_vm15 = vmand %vm525_vm12, %vm5729_vm13  ;;  %v1293_v21 = vmul.f32 %v1291_v1, %v1284_v33  ;;  %v1378_v30 = vsel %vm1376_vm0, %v5727_v12, %v5728_v61  ;;  %v1173_v29 = vadd.f32 %v1171_v16, %v1140_v5  ;;  %v1196_v18 = vadd.f32 %v1194_v63, %v4144_v42  ;;  %v1316_v49 = vpop.permute.xlu1 %1315  ;;  %v1314_v50 = vpop.permute.xlu0 %1313 }
 0x489   :  { %v1324_v25 = vstv %s4226_s11  ;;  %v1172_v44 = vadd.f32 %v1170_v6, %v1139_v62  ;;  %v1203_v43 = vsel %vm525_vm12, %v1195_v48, 0.0  ;;  %v1261_v17 = vadd.f32 %v1259_v3, %v4173_v8  ;;  %vm4340_vm13 = vmand %vm525_vm12, %vm5578_vm14  ;;  %s4809_s11 = sld [smem:[#allocation3 + $0x50]] }
 0x48a   :  { %v1262_v26 = vadd.f32 %v1260_v46, %v4177_v23  ;;  %v1236_v42 = vsel %vm4292_vm15, %v1228_v59, 0.0  ;;  %vm5732_vm9 = vcmp.lt.s32.totalorder %v3515_v37, 15  ;;  %vm5733_vm7 = vcmp.lt.s32.totalorder %v3494_v31, 14 }
 0x48b   :  { %v1237_v57 = vsel %vm5732_vm9, %v1229_v15, 0.0  ;;  %vm4320_vm10 = vmand %vm525_vm12, %vm5733_vm7  ;;  %v1317_v8 = vsel %vm1310_vm1, %v1314_v50, %v1316_v49  ;;  %v1318_v23 = vsel %vm1310_vm1, %v1316_v49, %v1314_v50  ;;  %v1294_v4 = vadd.f32 %v1292_v51, %v4180_v19 }
 0x48c   :  { %v1295_v34 = vadd.f32 %v1293_v21, %v4182_v13  ;;  %v1325_v54 = vmul.f32 %v1324_v25, %v1318_v23  ;;  %v1326_v0 = vmul.f32 %v1324_v25, %v1317_v8  ;;  %v1387_v9 = vmul.f32 %v1386_v11, %v1378_v30  ;;  %v1349_v22 = vpop.permute.xlu1 %1348  ;;  %v1347_v10 = vpop.permute.xlu0 %1346 }
 0x48d   :  { %v1205_v32 = vadd.f32 %v1203_v43, %v1172_v44  ;;  %v1206_v35 = vadd.f32 %v1196_v18, %v1173_v29  ;;  %v1357_v41 = vstv %s4266_s8  ;;  %v1269_v19 = vsel %vm4320_vm10, %v1261_v17, 0.0  ;;  %s4899_s8 = sld [smem:[#allocation3 + $0x54]] }
 0x48e   :  { %vm5738_vm1 = vcmp.lt.s32.totalorder %v3515_v37, 14  ;;  %v1327_v60 = vadd.f32 %v1325_v54, %v4190_v38  ;;  %v1328_v55 = vadd.f32 %v1326_v0, %v1322_v36  ;;  %v1350_v40 = vsel %vm1343_vm5, %v1347_v10, %v1349_v22 }
 0x48f   :  { %v1270_v13 = vsel %vm5738_vm1, %v1262_v26, 0.0  ;;  %v1238_v27 = vadd.f32 %v1236_v42, %v1205_v32  ;;  %v1239_v1 = vadd.f32 %v1237_v57, %v1206_v35  ;;  %v1351_v5 = vsel %vm1343_vm5, %v1349_v22, %v1347_v10  ;;  %v5742_v10 = vld [vmem:[#allocation30_spill] sm:$0xff] }
 0x490   :  { %v1302_v6 = vsel %vm4340_vm13, %v1294_v4, 0.0  ;;  %v1303_v38 = vsel %vm5576_vm3, %v1295_v34, 0.0  ;;  %v1358_v36 = vmul.f32 %v1357_v41, %v1351_v5  ;;  %v1359_v63 = vmul.f32 %v1357_v41, %v1350_v40  ;;  %v1380_v33 = vpop.permute.xlu0 %1379 }
 0x491   :  { %v1388_v16 = vmul.f32 %v1386_v11, %v1377_v47  ;;  %vm1443_vm12 = vcmp.lt.s32.totalorder %v2773_v45, 127  ;;  %v1271_v48 = vadd.f32 %v1269_v19, %v1238_v27  ;;  %v1272_v3 = vadd.f32 %v1270_v13, %v1239_v1  ;;  %v1382_v11 = vpop.permute.xlu1 %1381  ;;  %v5740_v13 = vld [vmem:[#allocation25_spill] sm:$0xff]  ;;  %v5743_v27 = vld [vmem:[#allocation31_spill] sm:$0xff] }
 0x492   :  { %v1390_v46 = vstv %s4302_s13  ;;  %vm5739_vm5 = vcmp.ge.s32.totalorder %v3494_v31, 3  ;;  %v1336_v53 = vsel %vm5577_vm4, %v1328_v55, 0.0  ;;  %v1360_v59 = vadd.f32 %v1358_v36, %v4252_v7  ;;  %v5741_v55 = vld [vmem:[#allocation26_spill] sm:$0xff]  ;;  %s4998_s13 = sld [smem:[#allocation3 + $0x58]] }
 0x493   :  { %v1335_v52 = vsel %vm5739_vm5, %v1327_v60, 0.0  ;;  %v1361_v15 = vadd.f32 %v1359_v63, %v4256_v39  ;;  %vm1476_vm15 = vcmp.lt.s32.totalorder %v2773_v45, 126  ;;  %v1304_v2 = vadd.f32 %v1302_v6, %v1271_v48  ;;  %v5744_v48 = vld [vmem:[#allocation32_spill] sm:$0xff]  ;;  %v5776_v63 = vld [vmem:[#allocation63_spill] sm:$0xff] }
 0x494   :  { %v1305_v12 = vadd.f32 %v1303_v38, %v1272_v3  ;;  %v1383_v61 = vsel %vm1376_vm0, %v1380_v33, %v1382_v11  ;;  %v1384_v47 = vsel %vm1376_vm0, %v1382_v11, %v1380_v33  ;;  %vm1509_vm9 = vcmp.lt.s32.totalorder %v2773_v45, 125  ;;  %v4403_v43 = vpop.permute.xlu0 %1446  ;;  %v5745_v3 = vld [vmem:[#allocation33_spill] sm:$0xff] }
 0x495   :  { %vm1542_vm7 = vcmp.lt.s32.totalorder %v2773_v45, 115  ;;  %v1368_v7 = vsel %vm5572_vm2, %v1360_v59, 0.0  ;;  %v1369_v39 = vsel %vm5575_vm6, %v1361_v15, 0.0  ;;  %v1391_v62 = vmul.f32 %v1390_v46, %v1384_v47  ;;  %v4401_v44 = vpop.permute.xlu1 %1448 }
 0x496   :  { %v1392_v28 = vmul.f32 %v1390_v46, %v1383_v61  ;;  %v1552_v51 = vstv %s4192_s1  ;;  %vm5579_vm10 = vcmp.lt.s32.totalorder %v2773_v45, 114  ;;  %v1337_v21 = vadd.f32 %v1335_v52, %v1304_v2  ;;  %v5746_v2 = vld [vmem:[#allocation34_spill] sm:$0xff]  ;;  %s4728_s1 = sld [smem:[#allocation3 + $0x4e]] }
 0x497   :  { %v1338_v30 = vadd.f32 %v1336_v53, %v1305_v12  ;;  %v1585_v29 = vstv %s4201_s30  ;;  %vm1608_vm0 = vcmp.lt.s32.totalorder %v2773_v45, 113  ;;  %v1393_v18 = vadd.f32 %v1391_v62, %v1387_v9  ;;  %v5747_v12 = vld [vmem:[#allocation35_spill] sm:$0xff]  ;;  %s4776_s30 = sld [smem:[#allocation3 + $0x4f]] }
 0x498   :  { %v1394_v25 = vadd.f32 %v1392_v28, %v1388_v16  ;;  %v1618_v17 = vstv %s4228_s3  ;;  %vm1641_vm13 = vcmp.lt.s32.totalorder %v2773_v45, 112  ;;  %v1370_v26 = vadd.f32 %v1368_v7, %v1337_v21  ;;  %v4424_v56 = vpop.permute.xlu0 %1479  ;;  %v5748_v7 = vld [vmem:[#allocation36_spill] sm:$0xff]  ;;  %s4823_s3 = sld [smem:[#allocation3 + $0x51]] }
 0x499   :  { %v1371_v49 = vadd.f32 %v1369_v39, %v1338_v30  ;;  %v1651_v50 = vstv %s4242_s6  ;;  %v1684_v42 = vstv %s4258_s7  ;;  %v1401_v57 = vsel %vm5573_vm8, %v1393_v18, 0.0  ;;  %v4422_v35 = vpop.permute.xlu1 %1481  ;;  %v5749_v39 = vld [vmem:[#allocation37_spill] sm:$0xff]  ;;  %v5750_v30 = vld [vmem:[#allocation38_spill] sm:$0xff]  ;;  %v5751_v18 = vld [vmem:[#allocation39_spill] sm:$0xff]  ;;  %s4831_s6 = sld [smem:[#allocation3 + $0x52]] }
 0x49a   :  { %v1402_v58 = vsel %vm5574_vm11, %v1394_v25, 0.0  ;;  %vm5580_vm1 = vcmp.lt.s32.totalorder %v2773_v45, 111  ;;  %v1717_v8 = vstv %s4268_s9  ;;  %v1750_v23 = vstv %s4273_s10  ;;  %s4869_s7 = sld [smem:[#allocation3 + $0x53]] }
 0x49b   :  { %v1403_v4 = vadd.f32 %v1401_v57, %v1370_v26  ;;  %v1404_v34 = vadd.f32 %v1402_v58, %v1371_v49  ;;  %vm1707_vm5 = vcmp.lt.s32.totalorder %v2773_v45, 110  ;;  %vm1740_vm2 = vcmp.lt.s32.totalorder %v2773_v45, 109  ;;  %v5752_v57 = vld [vmem:[#allocation40_spill] sm:$0xff]  ;;  %v5753_v58 = vld [vmem:[#allocation41_spill] sm:$0xff]  ;;  %s4929_s9 = sld [smem:[#allocation3 + $0x55]] }
 0x49c   :  { %v1783_v54 = vstv %s4285_s2  ;;  %v1816_v0 = vstv %s4304_s14  ;;  %v1849_v9 = vstv %s4310_s15  ;;  %v1882_v32 = vstv %s4328_s16  ;;  %v4463_v11 = vpop.permute.xlu0 %1512  ;;  %s4940_s10 = sld [smem:[#allocation3 + $0x56]] }
 0x49d   :  { %vm5581_vm8 = vcmp.lt.s32.totalorder %v2773_v45, 99  ;;  %v1915_v41 = vstv %s4334_s17  ;;  %v1948_v19 = vstv %s4345_s18  ;;  %v4430_v60 = vadd.f32 %v5740_v13, %v1403_v4  ;;  %v4461_v15 = vpop.permute.xlu1 %1514  ;;  %s4990_s2 = sld [smem:[#allocation3 + $0x57]] }
 0x49e   :  { %v4433_v22 = vadd.f32 %v5741_v55, %v1404_v34  ;;  %v1444_v1 = vsel %vm1443_vm12, %v5743_v27, %v5742_v10  ;;  %vm1806_vm11 = vcmp.lt.s32.totalorder %v2773_v45, 98  ;;  %v1981_v40 = vstv %s4352_s21  ;;  %s5004_s14 = sld [smem:[#allocation3 + $0x59]] }
 0x49f   :  { %v1445_v38 = vsel %vm1443_vm12, %v5742_v10, %v5743_v27  ;;  %vm1839_vm6 = vcmp.lt.s32.totalorder %v2773_v45, 97  ;;  %v1477_v46 = vsel %vm1476_vm15, %v5745_v3, %v5744_v48  ;;  %v1478_v52 = vsel %vm1476_vm15, %v5744_v48, %v5745_v3  ;;  %v5754_v10 = vld [vmem:[#allocation42_spill] sm:$0xff]  ;;  %v5755_v27 = vld [vmem:[#allocation43_spill] sm:$0xff]  ;;  %s5047_s15 = sld [smem:[#allocation3 + $0x5a]] }
 0x4a0   :  { %v4467_v33 = vmul.f32 %v1453_v14, %v1444_v1  ;;  %v1510_v61 = vsel %vm1509_vm9, %v5747_v12, %v5746_v2  ;;  %v1511_v47 = vsel %vm1509_vm9, %v5746_v2, %v5747_v12  ;;  %v1543_v62 = vsel %vm1542_vm7, %v5749_v39, %v5748_v7  ;;  %v4535_v48 = vpop.permute.xlu0 %1545  ;;  %s5080_s16 = sld [smem:[#allocation3 + $0x5b]] }
 0x4a1   :  { %vm1872_vm3 = vcmp.lt.s32.totalorder %v2773_v45, 96  ;;  %v4484_v28 = vmul.f32 %v1453_v14, %v1445_v38  ;;  %v1544_v21 = vsel %vm1542_vm7, %v5748_v7, %v5749_v39  ;;  %v1576_v25 = vsel %vm5579_vm10, %v5751_v18, %v5750_v30  ;;  %v4533_v38 = vpop.permute.xlu1 %1547  ;;  %v5758_v39 = vld [vmem:[#allocation46_spill] sm:$0xff]  ;;  %s5107_s17 = sld [smem:[#allocation3 + $0x5c]] }
 0x4a2   :  { %v1577_v26 = vsel %vm5579_vm10, %v5750_v30, %v5751_v18  ;;  %vm1905_vm4 = vcmp.lt.s32.totalorder %v2773_v45, 95  ;;  %vm5582_vm14 = vcmp.lt.s32.totalorder %v2773_v45, 94  ;;  %v4502_v14 = vmul.f32 %v1486_v20, %v1477_v46  ;;  %v5760_v30 = vld [vmem:[#allocation48_spill] sm:$0xff]  ;;  %v5761_v18 = vld [vmem:[#allocation49_spill] sm:$0xff]  ;;  %s5115_s18 = sld [smem:[#allocation3 + $0x5d]] }
 0x4a3   :  { %v4506_v49 = vmul.f32 %v1486_v20, %v1478_v52  ;;  %v1609_v4 = vsel %vm1608_vm0, %v5753_v58, %v5752_v57  ;;  %v1610_v34 = vsel %vm1608_vm0, %v5752_v57, %v5753_v58  ;;  %v4518_v13 = vmul.f32 %v1519_v24, %v1510_v61  ;;  %v5757_v61 = vld [vmem:[#allocation45_spill] sm:$0xff]  ;;  %v5762_v58 = vld [vmem:[#allocation50_spill] sm:$0xff]  ;;  %s5142_s21 = sld [smem:[#allocation3 + $0x5e]] }
 0x4a4   :  { %v4522_v55 = vmul.f32 %v1519_v24, %v1511_v47  ;;  %v4526_v20 = vmul.f32 %v1552_v51, %v1543_v62  ;;  %v1642_v1 = vsel %vm1641_vm13, %v5755_v27, %v5754_v10  ;;  %vm1971_vm10 = vcmp.lt.s32.totalorder %v2773_v45, 93  ;;  %v5759_v62 = vld [vmem:[#allocation47_spill] sm:$0xff] }
 0x4a5   :  { %v4539_v3 = vmul.f32 %v1552_v51, %v1544_v21  ;;  %v4543_v24 = vmul.f32 %v1585_v29, %v1576_v25  ;;  %v4547_v46 = vmul.f32 %v1585_v29, %v1577_v26  ;;  %v1643_v52 = vsel %vm1641_vm13, %v5754_v10, %v5755_v27  ;;  %v5756_v51 = vld [vmem:[#allocation44_spill] sm:$0xff]  ;;  %v4606_v27 = vpop.permute.xlu0 %1578 }
 0x4a6   :  { %v4555_v2 = vmul.f32 %v1618_v17, %v1609_v4  ;;  %v4559_v12 = vmul.f32 %v1618_v17, %v1610_v34  ;;  %v1675_v47 = vsel %vm5580_vm1, %v5757_v61, %v5756_v51  ;;  %v1676_v29 = vsel %vm5580_vm1, %v5756_v51, %v5757_v61  ;;  %v5763_v4 = vld [vmem:[#allocation51_spill] sm:$0xff]  ;;  %v5764_v51 = vld [vmem:[#allocation52_spill] sm:$0xff]  ;;  %v5765_v61 = vld [vmem:[#allocation53_spill] sm:$0xff] }
 0x4a7   :  { %v4573_v7 = vmul.f32 %v1651_v50, %v1642_v1  ;;  %v1708_v17 = vsel %vm1707_vm5, %v5759_v62, %v5758_v39  ;;  %v1709_v21 = vsel %vm1707_vm5, %v5758_v39, %v5759_v62  ;;  %v1741_v25 = vsel %vm1740_vm2, %v5761_v18, %v5760_v30 }
 0x4a8   :  { %vm2004_vm1 = vcmp.lt.s32.totalorder %v2773_v45, 83  ;;  %v4590_v26 = vmul.f32 %v1651_v50, %v1643_v52  ;;  %v1742_v57 = vsel %vm1740_vm2, %v5760_v30, %v5761_v18  ;;  %v1774_v34 = vsel %vm5581_vm8, %v5763_v4, %v5762_v58  ;;  %v4604_v50 = vpop.permute.xlu1 %1580  ;;  %v5766_v30 = vld [vmem:[#allocation54_spill] sm:$0xff]  ;;  %v5767_v18 = vld [vmem:[#allocation55_spill] sm:$0xff] }
 0x4a9   :  { %v1775_v10 = vsel %vm5581_vm8, %v5762_v58, %v5763_v4  ;;  %v4610_v1 = vmul.f32 %v1684_v42, %v1675_v47  ;;  %v4614_v52 = vmul.f32 %v1684_v42, %v1676_v29  ;;  %v1807_v39 = vsel %vm1806_vm11, %v5765_v61, %v5764_v51 }
 0x4aa   :  { %v1808_v62 = vsel %vm1806_vm11, %v5764_v51, %v5765_v61  ;;  %vm5583_vm8 = vcmp.lt.s32.totalorder %v2773_v45, 82  ;;  %v4629_v47 = vmul.f32 %v1717_v8, %v1708_v17  ;;  %v4633_v42 = vmul.f32 %v1717_v8, %v1709_v21  ;;  %v4679_v61 = vpop.permute.xlu0 %1611 }
 0x4ab   :  { %v4637_v29 = vmul.f32 %v1750_v23, %v1741_v25  ;;  %v1840_v58 = vsel %vm1839_vm6, %v5767_v18, %v5766_v30  ;;  %v4645_v4 = vmul.f32 %v1750_v23, %v1742_v57  ;;  %v4649_v51 = vmul.f32 %v1783_v54, %v1774_v34  ;;  %v5768_v25 = vld [vmem:[#allocation56_spill] sm:$0xff]  ;;  %v5769_v57 = vld [vmem:[#allocation57_spill] sm:$0xff] }
 0x4ac   :  { %v4653_v17 = vmul.f32 %v1783_v54, %v1775_v10  ;;  %v1841_v8 = vsel %vm1839_vm6, %v5766_v30, %v5767_v18  ;;  %v4663_v21 = vmul.f32 %v1816_v0, %v1807_v39  ;;  %v4667_v23 = vmul.f32 %v1816_v0, %v1808_v62  ;;  %v4677_v10 = vpop.permute.xlu1 %1613  ;;  %v5770_v0 = vld [vmem:[#allocation58_spill] sm:$0xff]  ;;  %v5771_v62 = vld [vmem:[#allocation59_spill] sm:$0xff] }
 0x4ad   :  { %v1873_v54 = vsel %vm1872_vm3, %v5769_v57, %v5768_v25  ;;  %v1874_v34 = vsel %vm1872_vm3, %v5768_v25, %v5769_v57  ;;  %v4683_v39 = vmul.f32 %v1849_v9, %v1840_v58  ;;  %v1906_v30 = vsel %vm1905_vm4, %v5771_v62, %v5770_v0  ;;  %v5772_v25 = vld [vmem:[#allocation60_spill] sm:$0xff]  ;;  %v5773_v57 = vld [vmem:[#allocation61_spill] sm:$0xff] }
 0x4ae   :  { %v1907_v18 = vsel %vm1905_vm4, %v5770_v0, %v5771_v62  ;;  %v1939_v59 = vsel %vm5582_vm14, %v5773_v57, %v5772_v25  ;;  %v4701_v58 = vmul.f32 %v1849_v9, %v1841_v8  ;;  %v1940_v53 = vsel %vm5582_vm14, %v5772_v25, %v5773_v57  ;;  %v5775_v8 = vld [vmem:[#allocation62_spill] sm:$0xff] }
 0x4af   :  { %v1457_v16 = vstv %s4569_s20  ;;  %v1450_v0 = vsel %vm1443_vm12, %v4403_v43, %v4401_v44  ;;  %v4714_v62 = vmul.f32 %v1882_v32, %v1873_v54  ;;  %v4718_v9 = vmul.f32 %v1882_v32, %v1874_v34 }
 0x4b0   :  { %v1972_v25 = vsel %vm1971_vm10, %v5776_v63, %v5775_v8  ;;  %v1973_v57 = vsel %vm1971_vm10, %v5775_v8, %v5776_v63  ;;  %v4732_v54 = vmul.f32 %v1915_v41, %v1906_v30  ;;  %v4736_v36 = vmul.f32 %v1915_v41, %v1907_v18  ;;  %v4747_v63 = vpop.permute.xlu1 %1646  ;;  %v4749_v8 = vpop.permute.xlu0 %1644 }
 0x4b1   :  { %5774 = vst [vmem:[#allocation27_spill] sm:$0xff] %v4714_v62  ;;  %v4740_v32 = vmul.f32 %v1948_v19, %v1939_v59  ;;  %vm2070_vm14 = vcmp.lt.s32.totalorder %v2773_v45, 81  ;;  %v1451_v34 = vsel %vm1443_vm12, %v4401_v44, %v4403_v43  ;;  %v4753_v30 = vmul.f32 %v1948_v19, %v1940_v53  ;;  %v5782_v44 = vld [vmem:[#allocation64_spill] sm:$0xff]  ;;  %v5783_v43 = vld [vmem:[#allocation65_spill] sm:$0xff] }
 0x4b2   :  { %5777 = vst [vmem:[#allocation28_spill] sm:$0xff] %v4736_v36  ;;  %v1458_v41 = vmul.f32 %v1457_v16, %v1450_v0  ;;  %v1490_v18 = vstv %s4625_s22  ;;  %v1483_v59 = vsel %vm1476_vm15, %v4424_v56, %v4422_v35  ;;  %v4762_v6 = vmul.f32 %v1981_v40, %v1972_v25 }
 0x4b3   :  { %5778 = vst [vmem:[#allocation29_spill] sm:$0xff] %v4740_v32  ;;  %5779 = vst [vmem:[#allocation25_spill] sm:$0xff] %v4753_v30  ;;  %v4766_v5 = vmul.f32 %v1981_v40, %v1973_v57  ;;  %v2005_v19 = vsel %vm2004_vm1, %v5783_v43, %v5782_v44  ;;  %v1484_v53 = vsel %vm1476_vm15, %v4422_v35, %v4424_v56  ;;  %v1523_v25 = vstv %s4659_s23 }
 0x4b4   :  { %5780 = vst [vmem:[#allocation26_spill] sm:$0xff] %v4762_v6  ;;  %v2006_v40 = vsel %vm2004_vm1, %v5782_v44, %v5783_v43  ;;  %v1459_v0 = vmul.f32 %v1457_v16, %v1451_v34  ;;  %v1516_v57 = vsel %vm1509_vm9, %v4463_v11, %v4461_v15  ;;  %v5785_v6 = vld [vmem:[#allocation67_spill] sm:$0xff]  ;;  %v1491_v30 = vmul.f32 %v1490_v18, %v1483_v59  ;;  %v4799_v34 = vpop.permute.xlu1 %1679  ;;  %v4801_v44 = vpop.permute.xlu0 %1677 }
 0x4b5   :  { %5781 = vst [vmem:[#allocation30_spill] sm:$0xff] %v4766_v5  ;;  %v5784_v5 = vld [vmem:[#allocation66_spill] sm:$0xff]  ;;  %v1517_v16 = vsel %vm1509_vm9, %v4461_v15, %v4463_v11  ;;  %v1460_v43 = vadd.f32 %v1458_v41, %v4467_v33  ;;  %v1492_v32 = vmul.f32 %v1490_v18, %v1484_v53  ;;  %v1556_v36 = vstv %s4697_s29 }
 0x4b6   :  { %v2038_v35 = vsel %vm5583_vm8, %v5785_v6, %v5784_v5  ;;  %v2039_v56 = vsel %vm5583_vm8, %v5784_v5, %v5785_v6  ;;  %v1549_v5 = vsel %vm1542_vm7, %v4535_v48, %v4533_v38  ;;  %v5786_v6 = vstv %s4358_s25  ;;  %s5177_s25 = sld [smem:[#allocation3 + $0x5f]] }
 0x4b7   :  { %v4813_v59 = vmul.f32 %v5786_v6, %v2005_v19  ;;  %v5787_v15 = vmov %v5786_v6  ;;  %v1524_v62 = vmul.f32 %v1523_v25, %v1516_v57  ;;  %v1550_v33 = vsel %vm1542_vm7, %v4533_v38, %v4535_v48 }
 0x4b8   :  { %v4817_v11 = vmul.f32 %v5787_v15, %v2006_v40  ;;  %v1461_v41 = vadd.f32 %v1459_v0, %v4484_v28  ;;  %v1525_v18 = vmul.f32 %v1523_v25, %v1517_v16  ;;  %v1589_v53 = vstv %s4728_s1  ;;  %v4842_v28 = vpop.permute.xlu1 %1712  ;;  %v4844_v0 = vpop.permute.xlu0 %1710 }
 0x4b9   :  { %vm5789_vm12 = vcmp.lt.s32.totalorder %v2773_v45, 114  ;;  %v5790_v40 = vstv %s4367_s26  ;;  %v1493_v38 = vadd.f32 %v1491_v30, %v4502_v14  ;;  %v1557_v48 = vmul.f32 %v1556_v36, %v1549_v5  ;;  %v5794_v5 = vld [vmem:[#allocation68_spill] sm:$0xff]  ;;  %s5218_s26 = sld [smem:[#allocation3 + $0x60]] }
 0x4ba   :  { %5788 = vst [vmem:[#allocation31_spill] sm:$0xff] %v4817_v11  ;;  %v1582_v19 = vsel %vm5789_vm12, %v4606_v27, %v4604_v50  ;;  %v4835_v57 = vmul.f32 %v5790_v40, %v2038_v35  ;;  %v5791_v6 = vmov %v5790_v40  ;;  %vm5792_vm15 = vcmp.lt.s32.totalorder %v3494_v31, 15  ;;  %vm5793_vm9 = vmmov %vm5789_vm12 }
 0x4bb   :  { %v4839_v15 = vmul.f32 %v5791_v6, %v2039_v56  ;;  %v1468_v25 = vsel %vm5792_vm15, %v1460_v43, 0.0  ;;  %v1494_v16 = vadd.f32 %v1492_v32, %v4506_v49  ;;  %v1558_v11 = vmul.f32 %v1556_v36, %v1550_v33  ;;  %v5795_v6 = vld [vmem:[#allocation69_spill] sm:$0xff] }
 0x4bc   :  { %v1583_v35 = vsel %vm5793_vm9, %v4604_v50, %v4606_v27  ;;  %v1526_v56 = vadd.f32 %v1524_v62, %v4518_v13  ;;  %v1590_v40 = vmul.f32 %v1589_v53, %v1582_v19  ;;  %v1622_v14 = vstv %s4776_s30  ;;  %v5797_v27 = vld [vmem:[#allocation78_spill] sm:$0xff]  ;;  %v1746_v33 = vpop.permute.xlu1 %1745  ;;  %v1744_v19 = vpop.permute.xlu0 %1743 }
 0x4bd   :  { %v1615_v30 = vsel %vm1608_vm0, %v4679_v61, %v4677_v10  ;;  %v4863_v49 = vsel %vm2070_vm14, %v5795_v6, %v5794_v5  ;;  %vm5796_vm7 = vcmp.lt.s32.totalorder %v3515_v37, 15  ;;  %v1527_v50 = vadd.f32 %v1525_v18, %v4522_v55 }
 0x4be   :  { %v1469_v36 = vsel %vm5796_vm7, %v1461_v41, 0.0  ;;  %vm540_vm12 = vcmp.lt.s32.totalorder %v5797_v27, 240  ;;  %v1470_v13 = vadd.f32 %v1468_v25, %v4430_v60  ;;  %vm5798_vm15 = vcmp.lt.s32.totalorder %v3494_v31, 14 }
 0x4bf   :  { %v1501_v62 = vsel %vm5798_vm15, %v1493_v38, 0.0  ;;  %v1559_v32 = vadd.f32 %v1557_v48, %v4526_v20  ;;  %v1591_v43 = vmul.f32 %v1589_v53, %v1583_v35  ;;  %vm5799_vm9 = vcmp.lt.s32.totalorder %v3515_v37, 14 }
 0x4c0   :  { %v1502_v55 = vsel %vm5799_vm9, %v1494_v16, 0.0  ;;  %v1560_v41 = vadd.f32 %v1558_v11, %v4539_v3  ;;  %v1616_v60 = vsel %vm1608_vm0, %v4677_v10, %v4679_v61  ;;  %v1623_v18 = vmul.f32 %v1622_v14, %v1615_v30  ;;  %v1779_v30 = vpop.permute.xlu1 %1778 }
 0x4c1   :  { %v1471_v38 = vadd.f32 %v1469_v36, %v4433_v22  ;;  %vm5800_vm7 = vcmp.lt.s32.totalorder %v3494_v31, 13  ;;  %vm5801_vm15 = vcmp.ge.s32.totalorder %v3515_v37, 3  ;;  %v1592_v3 = vadd.f32 %v1590_v40, %v4543_v24  ;;  %v1777_v36 = vpop.permute.xlu0 %1776 }
 0x4c2   :  { %v1534_v20 = vsel %vm5800_vm7, %v1526_v56, 0.0  ;;  %vm4889_vm8 = vmand %vm540_vm12, %vm5801_vm15  ;;  %v1655_v11 = vstv %s4809_s11  ;;  %v1503_v48 = vadd.f32 %v1501_v62, %v1470_v13  ;;  %vm5804_vm0 = vcmp.lt.s32.totalorder %v3515_v37, 13 }
 0x4c3   :  { %v1535_v10 = vsel %vm5804_vm0, %v1527_v50, 0.0  ;;  %v1688_v61 = vstv %s4823_s3  ;;  %v1721_v22 = vstv %s4831_s6  ;;  %v1504_v25 = vadd.f32 %v1502_v55, %v1471_v38 }
 0x4c4   :  { %vm5805_vm9 = vcmp.ge.s32.totalorder %v3494_v31, 3  ;;  %v1593_v35 = vadd.f32 %v1591_v43, %v4547_v46  ;;  %v1624_v56 = vmul.f32 %v1622_v14, %v1616_v60  ;;  %v1536_v24 = vadd.f32 %v1534_v20, %v1503_v48  ;;  %v1812_v20 = vpop.permute.xlu1 %1811 }
 0x4c5   :  { %v1567_v16 = vsel %vm5805_vm9, %v1559_v32, 0.0  ;;  %v1568_v40 = vsel %vm4889_vm8, %v1560_v41, 0.0  ;;  %vm5806_vm7 = vcmp.ge.s32.totalorder %v3515_v37, 2  ;;  %v1625_v13 = vadd.f32 %v1623_v18, %v4555_v2  ;;  %v1810_v53 = vpop.permute.xlu0 %1809 }
 0x4c6   :  { %vm4910_vm15 = vmand %vm540_vm12, %vm5806_vm7  ;;  %v1649_v46 = vsel %vm1641_vm13, %v4747_v63, %v4749_v8  ;;  %v1537_v14 = vadd.f32 %v1535_v10, %v1504_v25  ;;  %vm5809_vm0 = vcmp.ge.s32.totalorder %v3494_v31, 2  ;;  %v1648_v32 = vsel %vm1641_vm13, %v4749_v8, %v4747_v63 }
 0x4c7   :  { %v1600_v62 = vsel %vm5809_vm0, %v1592_v3, 0.0  ;;  %vm5810_vm8 = vcmp.lt.s32.totalorder %v2773_v45, 111  ;;  %v1569_v2 = vadd.f32 %v1567_v16, %v1536_v24  ;;  %v1714_v41 = vsel %vm1707_vm5, %v4844_v0, %v4842_v28 }
 0x4c8   :  { %v1681_v43 = vsel %vm5810_vm8, %v4801_v44, %v4799_v34  ;;  %vm5811_vm9 = vmmov %vm5810_vm8  ;;  %v1754_v60 = vstv %s4869_s7  ;;  %v1570_v63 = vadd.f32 %v1568_v40, %v1537_v14  ;;  %v1601_v8 = vsel %vm4910_vm15, %v1593_v35, 0.0 }
 0x4c9   :  { %v1682_v55 = vsel %vm5811_vm9, %v4799_v34, %v4801_v44  ;;  %v1626_v18 = vadd.f32 %v1624_v56, %v4559_v12  ;;  %v1657_v38 = vmul.f32 %v1655_v11, %v1649_v46  ;;  %v1602_v3 = vadd.f32 %v1600_v62, %v1569_v2  ;;  %v1843_v46 = vpop.permute.xlu0 %1842 }
 0x4ca   :  { %vm5812_vm13 = vcmp.ge.s32.totalorder %v3515_v37, 1  ;;  %vm5815_vm0 = vcmp.ge.s32.totalorder %v3494_v31, 1  ;;  %v1656_v48 = vmul.f32 %v1655_v11, %v1648_v32  ;;  %v1689_v10 = vmul.f32 %v1688_v61, %v1681_v43 }
 0x4cb   :  { %vm4949_vm7 = vmand %vm540_vm12, %vm5812_vm13  ;;  %v1633_v44 = vsel %vm5815_vm0, %v1625_v13, 0.0  ;;  %v1690_v25 = vmul.f32 %v1688_v61, %v1682_v55  ;;  %v1715_v12 = vsel %vm1707_vm5, %v4842_v28, %v4844_v0  ;;  %v1722_v16 = vmul.f32 %v1721_v22, %v1714_v41  ;;  %v1845_v13 = vpop.permute.xlu1 %1844 }
 0x4cc   :  { %v1747_v35 = vsel %vm1740_vm2, %v1744_v19, %v1746_v33  ;;  %v2072_v56 = vsel %vm2070_vm14, %v5794_v5, %v5795_v6  ;;  %v1603_v24 = vadd.f32 %v1601_v8, %v1570_v63  ;;  %v1748_v11 = vsel %vm1740_vm2, %v1746_v33, %v1744_v19 }
 0x4cd   :  { %v1787_v40 = vstv %s4899_s8  ;;  %v1634_v61 = vsel %vm4949_vm7, %v1626_v18, 0.0  ;;  %v1635_v50 = vadd.f32 %v1633_v44, %v1602_v3  ;;  %v1659_v28 = vadd.f32 %v1657_v38, %v4590_v26  ;;  %v1876_v55 = vpop.permute.xlu0 %1875 }
 0x4ce   :  { %vm5816_vm5 = vcmp.lt.s32.totalorder %v2773_v45, 99  ;;  %v1658_v5 = vadd.f32 %v1656_v48, %v4573_v7  ;;  %v1691_v6 = vadd.f32 %v1689_v10, %v4610_v1  ;;  %v1723_v14 = vmul.f32 %v1721_v22, %v1715_v12 }
 0x4cf   :  { %v1780_v0 = vsel %vm5816_vm5, %v1777_v36, %v1779_v30  ;;  %v1755_v33 = vmul.f32 %v1754_v60, %v1747_v35  ;;  %v1692_v19 = vadd.f32 %v1690_v25, %v4614_v52  ;;  %v1724_v62 = vadd.f32 %v1722_v16, %v4629_v47  ;;  %vm5817_vm2 = vmmov %vm5816_vm5  ;;  %v1878_v2 = vpop.permute.xlu1 %1877 }
 0x4d0   :  { %v1756_v32 = vmul.f32 %v1754_v60, %v1748_v11  ;;  %v1781_v26 = vsel %vm5817_vm2, %v1779_v30, %v1777_v36  ;;  %vm5818_vm15 = vcmp.lt.s32.totalorder %v3515_v37, 15  ;;  %vm546_vm9 = vcmp.lt.s32.totalorder %v5797_v27, 224 }
 0x4d1   :  { %vm4983_vm8 = vmand %vm540_vm12, %vm5818_vm15  ;;  %v1788_v7 = vmul.f32 %v1787_v40, %v1780_v0  ;;  %v1820_v1 = vstv %s4929_s9  ;;  %v1853_v22 = vstv %s4940_s10  ;;  %v1636_v52 = vadd.f32 %v1634_v61, %v1603_v24  ;;  %v1909_v24 = vpop.permute.xlu0 %1908 }
 0x4d2   :  { %v1667_v47 = vsel %vm540_vm12, %v1659_v28, 0.0  ;;  %v1813_v30 = vsel %vm1806_vm11, %v1810_v53, %v1812_v20  ;;  %v1814_v36 = vsel %vm1806_vm11, %v1812_v20, %v1810_v53  ;;  %vm5821_vm13 = vcmp.lt.s32.totalorder %v3494_v31, 15 }
 0x4d3   :  { %v1699_v41 = vsel %vm5821_vm13, %v1691_v6, 0.0  ;;  %v1725_v60 = vadd.f32 %v1723_v14, %v4633_v42  ;;  %v1757_v63 = vadd.f32 %v1755_v33, %v4637_v29  ;;  %v1789_v8 = vmul.f32 %v1787_v40, %v1781_v26  ;;  %v1911_v35 = vpop.permute.xlu1 %1910 }
 0x4d4   :  { %v1668_v18 = vadd.f32 %v1658_v5, %v1635_v50  ;;  %v1700_v38 = vsel %vm4983_vm8, %v1692_v19, 0.0  ;;  %vm5822_vm11 = vcmp.lt.s32.totalorder %v3515_v37, 14  ;;  %vm5825_vm0 = vcmp.lt.s32.totalorder %v3494_v31, 14  ;;  %v5850_v19 = vld [vmem:[#allocation28_spill] sm:$0xff] }
 0x4d5   :  { %vm5012_vm7 = vmand %vm540_vm12, %vm5822_vm11  ;;  %v1732_v42 = vsel %vm5825_vm0, %v1724_v62, 0.0  ;;  %v1758_v29 = vadd.f32 %v1756_v32, %v4645_v4  ;;  %vm2103_vm5 = vcmp.lt.s32.totalorder %v2773_v45, 80  ;;  %vm5826_vm2 = vcmp.lt.s32.totalorder %v3515_v37, 13  ;;  %v1942_v43 = vpop.permute.xlu0 %1941 }
 0x4d6   :  { %vm5024_vm15 = vmand %vm540_vm12, %vm5826_vm2  ;;  %v1790_v3 = vadd.f32 %v1788_v7, %v4649_v51  ;;  %v1821_v34 = vmul.f32 %v1820_v1, %v1813_v30  ;;  %v1822_v44 = vmul.f32 %v1820_v1, %v1814_v36  ;;  %v1846_v48 = vsel %vm1839_vm6, %v1843_v46, %v1845_v13 }
 0x4d7   :  { %v5829_v10 = vstv %s4370_s27  ;;  %v1669_v25 = vadd.f32 %v1667_v47, %v1636_v52  ;;  %v1701_v12 = vadd.f32 %v1699_v41, %v1668_v18  ;;  %v1847_v16 = vsel %vm1839_vm6, %v1845_v13, %v1843_v46  ;;  %v1944_v26 = vpop.permute.xlu1 %1943  ;;  %s5248_s27 = sld [smem:[#allocation3 + $0x61]] }
 0x4d8   :  { %v5034_v4 = vmul.f32 %v5829_v10, %v4863_v49  ;;  %v5830_v11 = vmov %v5829_v10  ;;  %v1733_v51 = vsel %vm5012_vm7, %v1725_v60, 0.0  ;;  %vm5831_vm12 = vcmp.lt.s32.totalorder %v3494_v31, 13 }
 0x4d9   :  { %v5040_v40 = vmul.f32 %v5830_v11, %v2072_v56  ;;  %v1765_v61 = vsel %vm5831_vm12, %v1757_v63, 0.0  ;;  %v1791_v49 = vadd.f32 %v1789_v8, %v4653_v17  ;;  %v1702_v50 = vadd.f32 %v1700_v38, %v1669_v25  ;;  %v1975_v20 = vpop.permute.xlu0 %1974  ;;  %v5848_v56 = vld [vmem:[#allocation27_spill] sm:$0xff] }
 0x4da   :  { %v1734_v28 = vadd.f32 %v1732_v42, %v1701_v12  ;;  %v1766_v0 = vsel %vm5024_vm15, %v1758_v29, 0.0  ;;  %vm5832_vm6 = vcmp.ge.s32.totalorder %v3515_v37, 3  ;;  %v1854_v13 = vmul.f32 %v1853_v22, %v1846_v48 }
 0x4db   :  { %vm5055_vm8 = vmand %vm546_vm9, %vm5832_vm6  ;;  %vm5835_vm13 = vcmp.ge.s32.totalorder %v3494_v31, 3  ;;  %v1823_v46 = vadd.f32 %v1821_v34, %v4663_v21  ;;  %v1824_v5 = vadd.f32 %v1822_v44, %v4667_v23  ;;  %v1855_v6 = vmul.f32 %v1853_v22, %v1847_v16  ;;  %v1977_v38 = vpop.permute.xlu1 %1976  ;;  %v5846_v34 = vld [vmem:[#allocation71_spill] sm:$0xff] }
 0x4dc   :  { %v1798_v17 = vsel %vm5835_vm13, %v1790_v3, 0.0  ;;  %v1735_v14 = vadd.f32 %v1733_v51, %v1702_v50  ;;  %v1767_v33 = vadd.f32 %v1765_v61, %v1734_v28  ;;  %vm5836_vm11 = vcmp.ge.s32.totalorder %v3515_v37, 2  ;;  %v5845_v3 = vld [vmem:[#allocation70_spill] sm:$0xff] }
 0x4dd   :  { %vm5067_vm7 = vmand %vm546_vm9, %vm5836_vm11  ;;  %v1886_v62 = vstv %s4990_s2  ;;  %v1880_v32 = vsel %vm1872_vm3, %v1878_v2, %v1876_v55  ;;  %v1799_v21 = vsel %vm5055_vm8, %v1791_v49, 0.0  ;;  %v1919_v23 = vstv %s4998_s13  ;;  %v2008_v28 = vpop.permute.xlu0 %2007 }
 0x4de   :  { %v1912_v7 = vsel %vm1905_vm4, %v1909_v24, %v1911_v35  ;;  %v1952_v1 = vstv %s5004_s14  ;;  %v1768_v22 = vadd.f32 %v1766_v0, %v1735_v14  ;;  %v1800_v52 = vadd.f32 %v1798_v17, %v1767_v33 }
 0x4df   :  { %v1856_v47 = vadd.f32 %v1854_v13, %v4683_v39  ;;  %v1879_v30 = vsel %vm1872_vm3, %v1876_v55, %v1878_v2  ;;  %vm5839_vm0 = vcmp.ge.s32.totalorder %v3494_v31, 2  ;;  %v1832_v41 = vsel %vm5067_vm7, %v1824_v5, 0.0  ;;  %v2010_v50 = vpop.permute.xlu1 %2009 }
 0x4e0   :  { %v1831_v36 = vsel %vm5839_vm0, %v1823_v46, 0.0  ;;  %v1857_v60 = vadd.f32 %v1855_v6, %v4701_v58  ;;  %v1888_v63 = vmul.f32 %v1886_v62, %v1880_v32  ;;  %v1801_v8 = vadd.f32 %v1799_v21, %v1768_v22  ;;  %v5851_v32 = vld [vmem:[#allocation29_spill] sm:$0xff]  ;;  %v5857_v22 = vld [vmem:[#allocation26_spill] sm:$0xff] }
 0x4e1   :  { %vm5840_vm2 = vcmp.ge.s32.totalorder %v3515_v37, 1  ;;  %v1913_v39 = vsel %vm1905_vm4, %v1911_v35, %v1909_v24  ;;  %v1920_v2 = vmul.f32 %v1919_v23, %v1912_v7  ;;  %vm5843_vm3 = vcmp.lt.s32.totalorder %v2773_v45, 94  ;;  %v5856_v7 = vld [vmem:[#allocation25_spill] sm:$0xff] }
 0x4e2   :  { %vm5094_vm15 = vmand %vm546_vm9, %vm5840_vm2  ;;  %v1945_v55 = vsel %vm5843_vm3, %v1942_v43, %v1944_v26  ;;  %v1887_v58 = vmul.f32 %v1886_v62, %v1879_v30  ;;  %v1985_v29 = vstv %s5047_s15  ;;  %v1978_v53 = vsel %vm1971_vm10, %v1975_v20, %v1977_v38 }
 0x4e3   :  { %vm5844_vm12 = vmmov %vm5843_vm3  ;;  %v2104_v44 = vsel %vm2103_vm5, %v5846_v34, %v5845_v3  ;;  %v1833_v48 = vadd.f32 %v1831_v36, %v1800_v52  ;;  %v1834_v10 = vadd.f32 %v1832_v41, %v1801_v8  ;;  %vm5847_vm4 = vcmp.ge.s32.totalorder %v3494_v31, 1  ;;  %v2043_v30 = vpop.permute.xlu1 %2042  ;;  %v2041_v36 = vpop.permute.xlu0 %2040 }
 0x4e4   :  { %v1946_v42 = vsel %vm5844_vm12, %v1944_v26, %v1942_v43  ;;  %v1864_v25 = vsel %vm5847_vm4, %v1856_v47, 0.0  ;;  %v1865_v12 = vsel %vm5094_vm15, %v1857_v60, 0.0  ;;  %v1890_v16 = vadd.f32 %v1888_v63, %v4718_v9 }
 0x4e5   :  { %v1921_v35 = vmul.f32 %v1919_v23, %v1913_v39  ;;  %v1953_v24 = vmul.f32 %v1952_v1, %v1945_v55  ;;  %vm2136_vm6 = vcmp.lt.s32.totalorder %v2773_v45, 79  ;;  %v1922_v11 = vadd.f32 %v1920_v2, %v4732_v54 }
 0x4e6   :  { %v1954_v51 = vmul.f32 %v1952_v1, %v1946_v42  ;;  %v1979_v61 = vsel %vm1971_vm10, %v1977_v38, %v1975_v20  ;;  %v1986_v49 = vmul.f32 %v1985_v29, %v1978_v53  ;;  %v1866_v0 = vadd.f32 %v1864_v25, %v1833_v48  ;;  %v5864_v42 = vld [vmem:[#allocation30_spill] sm:$0xff] }
 0x4e7   :  { %v1889_v13 = vadd.f32 %v1887_v58, %v5848_v56  ;;  %v2018_v17 = vstv %s5080_s16  ;;  %v2011_v9 = vsel %vm2004_vm1, %v2008_v28, %v2010_v50  ;;  %v2105_v46 = vsel %vm2103_vm5, %v5845_v3, %v5846_v34  ;;  %v2074_v25 = vpop.permute.xlu0 %2073  ;;  %v5875_v56 = vld [vmem:[#allocation73_spill] sm:$0xff] }
 0x4e8   :  { %v5849_v54 = vstv %s4379_s19  ;;  %v1867_v6 = vadd.f32 %v1865_v12, %v1834_v10  ;;  %v2012_v14 = vsel %vm2004_vm1, %v2010_v50, %v2008_v28  ;;  %v1898_v33 = vsel %vm546_vm9, %v1890_v16, 0.0  ;;  %v2076_v10 = vpop.permute.xlu1 %2075  ;;  %v5869_v12 = vld [vmem:[#allocation31_spill] sm:$0xff] }
 0x4e9   :  { %v5134_v5 = vmul.f32 %v5849_v54, %v2104_v44  ;;  %v1923_v62 = vadd.f32 %v1921_v35, %v5850_v19  ;;  %v1955_v26 = vadd.f32 %v1953_v24, %v5851_v32  ;;  %v1987_v43 = vmul.f32 %v1985_v29, %v1979_v61 }
 0x4ea   :  { %vm2169_vm10 = vcmp.lt.s32.totalorder %v2773_v45, 78  ;;  %vm5852_vm8 = vcmp.lt.s32.totalorder %v3515_v37, 15  ;;  %vm5855_vm1 = vcmp.lt.s32.totalorder %v3494_v31, 15  ;;  %v1956_v1 = vadd.f32 %v1954_v51, %v5856_v7 }
 0x4eb   :  { %vm5149_vm13 = vmand %vm546_vm9, %vm5852_vm8  ;;  %v1930_v23 = vsel %vm5855_vm1, %v1922_v11, 0.0  ;;  %v1988_v52 = vadd.f32 %v1986_v49, %v5857_v22  ;;  %v2019_v47 = vmul.f32 %v2018_v17, %v2011_v9  ;;  %v1899_v41 = vadd.f32 %v1889_v13, %v1866_v0  ;;  %v5874_v0 = vld [vmem:[#allocation72_spill] sm:$0xff] }
 0x4ec   :  { %vm5858_vm11 = vcmp.lt.s32.totalorder %v3515_v37, 14  ;;  %v2020_v63 = vmul.f32 %v2018_v17, %v2012_v14  ;;  %v2051_v8 = vstv %s5107_s17  ;;  %vm5861_vm0 = vcmp.lt.s32.totalorder %v2773_v45, 82  ;;  %v2109_v19 = vpop.permute.xlu1 %2108 }
 0x4ed   :  { %vm5161_vm7 = vmand %vm546_vm9, %vm5858_vm11  ;;  %v2044_v18 = vsel %vm5861_vm0, %v2041_v36, %v2043_v30  ;;  %v1900_v39 = vadd.f32 %v1898_v33, %v1867_v6  ;;  %vm552_vm2 = vcmp.lt.s32.totalorder %v5797_v27, 208  ;;  %v2084_v55 = vstv %s5115_s18 }
 0x4ee   :  { %vm5862_vm15 = vmmov %vm5861_vm0  ;;  %v1931_v38 = vsel %vm5149_vm13, %v1923_v62, 0.0  ;;  %v1932_v20 = vadd.f32 %v1930_v23, %v1899_v41  ;;  %vm5863_vm3 = vcmp.lt.s32.totalorder %v3494_v31, 14  ;;  %v1989_v29 = vadd.f32 %v1987_v43, %v5864_v42  ;;  %v2107_v62 = vpop.permute.xlu0 %2106  ;;  %v5883_v41 = vld [vmem:[#allocation75_spill] sm:$0xff] }
 0x4ef   :  { %v2045_v2 = vsel %vm5862_vm15, %v2043_v30, %v2041_v36  ;;  %v1963_v58 = vsel %vm5863_vm3, %v1955_v26, 0.0  ;;  %v1964_v53 = vsel %vm5161_vm7, %v1956_v1, 0.0  ;;  %vm5865_vm12 = vcmp.lt.s32.totalorder %v3515_v37, 13  ;;  %v5882_v36 = vld [vmem:[#allocation74_spill] sm:$0xff] }
 0x4f0   :  { %vm5185_vm4 = vmand %vm546_vm9, %vm5865_vm12  ;;  %vm5868_vm8 = vcmp.lt.s32.totalorder %v3494_v31, 13  ;;  %v2021_v44 = vadd.f32 %v2019_v47, %v4813_v59  ;;  %v2052_v48 = vmul.f32 %v2051_v8, %v2044_v18  ;;  %v2022_v16 = vadd.f32 %v2020_v63, %v5869_v12  ;;  %v5909_v59 = vld [vmem:[#allocation8_spill] sm:$0xff] }
 0x4f1   :  { %v1996_v34 = vsel %vm5868_vm8, %v1988_v52, 0.0  ;;  %v2053_v35 = vmul.f32 %v2051_v8, %v2045_v2  ;;  %v2077_v24 = vsel %vm2070_vm14, %v2074_v25, %v2076_v10  ;;  %v2078_v11 = vsel %vm2070_vm14, %v2076_v10, %v2074_v25  ;;  %v2142_v2 = vpop.permute.xlu1 %2141 }
 0x4f2   :  { %v5870_v51 = vmov %v5849_v54  ;;  %v1933_v49 = vadd.f32 %v1931_v38, %v1900_v39  ;;  %v1965_v50 = vadd.f32 %v1963_v58, %v1932_v20  ;;  %vm5871_vm9 = vcmp.ge.s32.totalorder %v3515_v37, 3 }
 0x4f3   :  { %v2115_v61 = vmul.f32 %v5870_v51, %v2105_v46  ;;  %vm5203_vm13 = vmand %vm552_vm2, %vm5871_vm9  ;;  %v2085_v28 = vmul.f32 %v2084_v55, %v2077_v24  ;;  %v2137_v13 = vsel %vm2136_vm6, %v5875_v56, %v5874_v0  ;;  %v2138_v17 = vsel %vm2136_vm6, %v5874_v0, %v5875_v56 }
 0x4f4   :  { %v1997_v9 = vsel %vm5185_vm4, %v1989_v29, 0.0  ;;  %v2117_v46 = vstv %s5142_s21  ;;  %v1966_v54 = vadd.f32 %v1964_v53, %v1933_v49  ;;  %v1998_v6 = vadd.f32 %v1996_v34, %v1965_v50 }
 0x4f5   :  { %v2054_v14 = vadd.f32 %v2052_v48, %v4835_v57  ;;  %v2086_v33 = vmul.f32 %v2084_v55, %v2078_v11  ;;  %vm5876_vm14 = vcmp.ge.s32.totalorder %v3494_v31, 3  ;;  %v2030_v26 = vsel %vm5203_vm13, %v2022_v16, 0.0  ;;  %v2140_v55 = vpop.permute.xlu0 %2139  ;;  %v2175_v51 = vpop.permute.xlu1 %2174 }
 0x4f6   :  { %v2029_v32 = vsel %vm5876_vm14, %v2021_v44, 0.0  ;;  %v2055_v43 = vadd.f32 %v2053_v35, %v4839_v15  ;;  %v2111_v21 = vsel %vm2103_vm5, %v2109_v19, %v2107_v62  ;;  %v1999_v23 = vadd.f32 %v1997_v9, %v1966_v54 }
 0x4f7   :  { %vm5877_vm1 = vcmp.ge.s32.totalorder %v3515_v37, 2  ;;  %v2087_v7 = vadd.f32 %v2085_v28, %v5034_v4  ;;  %v2110_v1 = vsel %vm2103_vm5, %v2107_v62, %v2109_v19  ;;  %v2119_v22 = vmul.f32 %v2117_v46, %v2111_v21 }
 0x4f8   :  { %vm5232_vm11 = vmand %vm552_vm2, %vm5877_vm1  ;;  %v5880_v52 = vstv %s4387_s28  ;;  %v2170_v60 = vsel %vm2169_vm10, %v5883_v41, %v5882_v36  ;;  %v2150_v63 = vstv %s5177_s25  ;;  %v2031_v8 = vadd.f32 %v2029_v32, %v1998_v6 }
 0x4f9   :  { %v2147_v15 = vmul.f32 %v5880_v52, %v2137_v13  ;;  %v5881_v47 = vmov %v5880_v52  ;;  %v2032_v18 = vadd.f32 %v2030_v26, %v1999_v23  ;;  %vm5884_vm7 = vcmp.ge.s32.totalorder %v3494_v31, 2 }
 0x4fa   :  { %v2148_v30 = vmul.f32 %v5881_v47, %v2138_v17  ;;  %v2062_v4 = vsel %vm5884_vm7, %v2054_v14, 0.0  ;;  %v2088_v39 = vadd.f32 %v2086_v33, %v5040_v40  ;;  %v2063_v38 = vsel %vm5232_vm11, %v2055_v43, 0.0  ;;  %v5896_v14 = vld [vmem:[#allocation77_spill] sm:$0xff] }
 0x4fb   :  { %vm5885_vm5 = vcmp.ge.s32.totalorder %v3515_v37, 1  ;;  %v2118_v58 = vmul.f32 %v2117_v46, %v2110_v1  ;;  %v2143_v42 = vsel %vm2136_vm6, %v2140_v55, %v2142_v2  ;;  %v2144_v40 = vsel %vm2136_vm6, %v2142_v2, %v2140_v55  ;;  %v5894_v46 = vld [vmem:[#allocation76_spill] sm:$0xff] }
 0x4fc   :  { %vm5259_vm0 = vmand %vm552_vm2, %vm5885_vm5  ;;  %vm5888_vm15 = vcmp.ge.s32.totalorder %v3494_v31, 1  ;;  %v2121_v53 = vadd.f32 %v2119_v22, %v2115_v61  ;;  %v2151_v3 = vmul.f32 %v2150_v63, %v2143_v42  ;;  %v2152_v34 = vmul.f32 %v2150_v63, %v2144_v40  ;;  %v2173_v61 = vpop.permute.xlu0 %2172 }
 0x4fd   :  { %v2095_v29 = vsel %vm5888_vm15, %v2087_v7, 0.0  ;;  %v2171_v44 = vsel %vm2169_vm10, %v5882_v36, %v5883_v41  ;;  %v5889_v48 = vstv %s4395_s24  ;;  %v2064_v25 = vadd.f32 %v2062_v4, %v2031_v8  ;;  %v2208_v7 = vpop.permute.xlu1 %2207 }
 0x4fe   :  { %v2180_v10 = vmul.f32 %v5889_v48, %v2170_v60  ;;  %v2183_v12 = vstv %s5218_s26  ;;  %v2065_v16 = vadd.f32 %v2063_v38, %v2032_v18  ;;  %v2096_v35 = vsel %vm5259_vm0, %v2088_v39, 0.0 }
 0x4ff   :  { %v2153_v24 = vadd.f32 %v2151_v3, %v2147_v15  ;;  %v2154_v11 = vadd.f32 %v2152_v34, %v2148_v30  ;;  %v2097_v49 = vadd.f32 %v2095_v29, %v2064_v25  ;;  %v2120_v50 = vadd.f32 %v2118_v58, %v5134_v5  ;;  %v5907_v25 = vld [vmem:[#allocation6_spill] sm:$0xff] }
 0x500   :  { %vm5890_vm6 = vcmp.lt.s32.totalorder %v3515_v37, 15  ;;  %v2176_v28 = vsel %vm2169_vm10, %v2173_v61, %v2175_v51  ;;  %v2177_v0 = vsel %vm2169_vm10, %v2175_v51, %v2173_v61  ;;  %v5893_v56 = vmov %v5889_v48  ;;  %v2206_v1 = vpop.permute.xlu0 %2205 }
 0x501   :  { %vm5283_vm3 = vmand %vm552_vm2, %vm5890_vm6  ;;  %v2181_v13 = vmul.f32 %v5893_v56, %v2171_v44  ;;  %v2129_v17 = vsel %vm552_vm2, %v2121_v53, 0.0  ;;  %v2184_v5 = vmul.f32 %v2183_v12, %v2176_v28  ;;  %v2185_v9 = vmul.f32 %v2183_v12, %v2177_v0 }
 0x502   :  { %v5895_v54 = vstv %s4399_s12  ;;  %v2098_v62 = vadd.f32 %v2096_v35, %v2065_v16  ;;  %vm5898_vm12 = vcmp.lt.s32.totalorder %v3515_v37, 14  ;;  %v2216_v26 = vstv %s5248_s27 }
 0x503   :  { %v2213_v6 = vmul.f32 %v5895_v54, %v5894_v46  ;;  %v5897_v33 = vmov %v5895_v54  ;;  %vm5305_vm4 = vmand %vm552_vm2, %vm5898_vm12  ;;  %vm5901_vm10 = vcmp.lt.s32.totalorder %v3494_v31, 15  ;;  %v2162_v21 = vsel %vm5283_vm3, %v2154_v11, 0.0  ;;  %v5912_v46 = vld [vmem:[#allocation9_spill] sm:$0xff] }
 0x504   :  { %v2214_v19 = vmul.f32 %v5897_v33, %v5896_v14  ;;  %v2161_v43 = vsel %vm5901_vm10, %v2153_v24, 0.0  ;;  %v2186_v23 = vadd.f32 %v2184_v5, %v2180_v10  ;;  %v2187_v57 = vadd.f32 %v2185_v9, %v2181_v13  ;;  %v5910_v13 = vld [vmem:[#allocation11_spill] sm:$0xff]  ;;  %v5911_v5 = vld [vmem:[#allocation12_spill] sm:$0xff]  ;;  %v5914_v33 = vld [vmem:[#allocation13_spill] sm:$0xff] }
 0x505   :  { %v2130_v22 = vadd.f32 %v2120_v50, %v2097_v49  ;;  %v2131_v52 = vadd.f32 %v2129_v17, %v2098_v62  ;;  %vm5902_vm8 = vcmp.lt.s32.totalorder %v2773_v45, 77  ;;  %vm5904_vm13 = vcmp.lt.s32.totalorder %v3494_v31, 14  ;;  %v5908_v49 = vld [vmem:[#allocation7_spill] sm:$0xff]  ;;  %v5915_v62 = vld [vmem:[#allocation14_spill] sm:$0xff] }
 0x506   :  { %v2209_v15 = vsel %vm5902_vm8, %v2206_v1, %v2208_v7  ;;  %vm5903_vm9 = vmmov %vm5902_vm8  ;;  %v2194_v30 = vsel %vm5904_vm13, %v2186_v23, 0.0  ;;  %v2195_v36 = vsel %vm5305_vm4, %v2187_v57, 0.0  ;;  %vm5905_vm14 = vcmp.lt.s32.totalorder %v3515_v37, 13  ;;  %v5918_v57 = vld [vmem:[#allocation17_spill] sm:$0xff] }
 0x507   :  { %v2210_v47 = vsel %vm5903_vm9, %v2208_v7, %v2206_v1  ;;  %v2217_v41 = vmul.f32 %v2216_v26, %v2209_v15  ;;  %v2163_v63 = vadd.f32 %v2161_v43, %v2130_v22  ;;  %v2164_v8 = vadd.f32 %v2162_v21, %v2131_v52  ;;  %vm2222_vm1 = vmand %vm552_vm2, %vm5905_vm14  ;;  %v5917_v21 = vld [vmem:[#allocation16_spill] sm:$0xff]  ;;  %v5919_v1 = vld [vmem:[#allocation18_spill] sm:$0xff] }
 0x508   :  { %v2218_v60 = vmul.f32 %v2216_v26, %v2210_v47  ;;  %v2232_v2 = vstv %s5452_s4  ;;  %vm5906_vm11 = vcmp.lt.s32.totalorder %v3494_v31, 13  ;;  %v2615_v44 = vmov 1966171168   ;;  %v5916_v26 = vld [vmem:[#allocation15_spill] sm:$0xff]  ;;  %v5920_v52 = vld [vmem:[#allocation21_spill] sm:$0xff]  ;;  %v5921_v47 = vld [vmem:[#allocation22_spill] sm:$0xff] }
 0x509   :  { %v2219_v18 = vadd.f32 %v2217_v41, %v2213_v6  ;;  %v2196_v39 = vadd.f32 %v2194_v30, %v2163_v63  ;;  %v2197_v45 = vadd.f32 %v2195_v36, %v2164_v8  ;;  %v2251_v48 = vunpack.c.l.s4 %v2615_v44  ;;  %v5913_v6 = vld [vmem:[#allocation10_spill] sm:$0xff]  ;;  %v5922_v36 = vld [vmem:[#allocation19_spill] sm:$0xff]  ;;  %v2541_v44 = vld [vmem:[%s5448_s0 + $0x38] sm:$0xff] }
 0x50a   :  { %v2220_v4 = vadd.f32 %v2218_v60, %v2214_v19  ;;  %v5923_v60 = vld [vmem:[#allocation20_spill] sm:$0xff]  ;;  %v5924_v8 = vld [vmem:[#allocation23_spill] sm:$0xff] }
 0x50b   :  { %v2227_v55 = vsel %vm5906_vm11, %v2219_v18, 0.0  ;;  %v2252_v10 = vunpack.c.0.s8 %v2251_v48 }
 0x50c   :  { %v2228_v38 = vsel %vm2222_vm1, %v2220_v4, 0.0  ;;  %v2229_v20 = vadd.f32 %v2227_v55, %v2196_v39  ;;  %v5925_v4 = vld [vmem:[#allocation24_spill] sm:$0xff]  ;;  %v2535_v55 = vld [vmem:[%s5448_s0 + $0x8] sm:$0xff] }
 0x50d   :  { %v2230_v58 = vadd.f32 %v2228_v38, %v2197_v45  ;;  %v2255_v12 = vsub.s32 %v2252_v10, %v5907_v25  ;;  %v2534_v45 = vld [vmem:[%s5448_s0] sm:$0xff]  ;;  %v2543_v25 = vld [vmem:[%s5448_s0 + $0x48] sm:$0xff] }
 0x50e   :  { %v2233_v42 = vadd.f32 %v2232_v2, %v2229_v20  ;;  %v2536_v20 = vld [vmem:[%s5448_s0 + $0x10] sm:$0xff]  ;;  %v2542_v10 = vld [vmem:[%s5448_s0 + $0x40] sm:$0xff] }
 0x50f   :  { %v2234_v40 = vadd.f32 %v2232_v2, %v2230_v58 }
 0x510   :  { %v2445_v37 = vmul.f32 -1.442695, %v2233_v42  ;;  %v2537_v42 = vld [vmem:[%s5448_s0 + $0x18] sm:$0xff] }
 0x511   :  { %v2446_v29 = vmul.f32 -1.442695, %v2234_v40 }
 0x512   :  { %2526 = vpow2.f32 %v2445_v37  ;;  %v2538_v37 = vld [vmem:[%s5448_s0 + $0x20] sm:$0xff] }
 0x513   :  { %2528 = vpow2.f32 %v2446_v29 }
 0x51f   :  { %v2527_v27 = vpop.eup %2526 }
 0x520   :  { %v2529_v53 = vpop.eup %2528  ;;  %v2241_v3 = vadd.f32 1.0, %v2527_v27  ;;  %v2539_v27 = vld [vmem:[%s5448_s0 + $0x28] sm:$0xff] }
 0x521   :  { %v2242_v34 = vadd.f32 1.0, %v2529_v53 }
 0x522   :  { %2530 = vrcp.f32 %v2241_v3  ;;  %v2540_v3 = vld [vmem:[%s5448_s0 + $0x30] sm:$0xff] }
 0x523   :  { %2532 = vrcp.f32 %v2242_v34 }
 0x52f   :  { %v2531_v31 = vpop.eup %2530 }
 0x530   :  { %v2533_v16 = vpop.eup %2532 }
 0x531   :  { %v2249_v35 = vcombine.low %v2531_v31, %v2533_v16  ;;  %v2544_v16 = vld [vmem:[%s5448_s0 + $0x50] sm:$0xff] }
 0x533   :  { %v2256_v24 = vrot.slane %v2249_v35, %v2255_v12 }
 0x535   :  { %v2257_v11 = vcombine.high %v2256_v24, %v2256_v24  ;;  %v2264_v51 = vrot.slane %v2256_v24, %v2255_v12  ;;  %v2545_v24 = vld [vmem:[%s5448_s0 + $0x58] sm:$0xff] }
 0x537   :  { %v2271_v61 = vrot.slane %v2257_v11, %v2255_v12  ;;  %v2275_v50 = vrot.slane %v2264_v51, %v5908_v49  ;;  %v2279_v28 = vrot.slane %v2264_v51, %v5909_v59  ;;  %v2546_v51 = vld [vmem:[%s5448_s0 + $0x60] sm:$0xff] }
 0x539   :  { %v2283_v0 = vrot.slane %v2271_v61, %v5908_v49  ;;  %v2287_v56 = vrot.slane %v2271_v61, %v5909_v59  ;;  %v2292_v17 = vmul.f32 %v2275_v50, %v5910_v13  ;;  %v2293_v9 = vmul.f32 %v2279_v28, %v5911_v5  ;;  %v2547_v49 = vld [vmem:[%s5448_s0 + $0x68] sm:$0xff]  ;;  %v2548_v59 = vld [vmem:[%s5448_s0 + $0x70] sm:$0xff] }
 0x53a   :  { %v2294_v54 = vmul.f32 %v2275_v50, %v5912_v46  ;;  %v2295_v14 = vmul.f32 %v2279_v28, %v5913_v6  ;;  %v2296_v19 = vmul.f32 %v2275_v50, %v5914_v33  ;;  %v2297_v32 = vmul.f32 %v2279_v28, %v5915_v62 }
 0x53b   :  { %v2298_v43 = vmul.f32 %v2275_v50, %v5916_v26  ;;  %v2299_v23 = vmul.f32 %v2279_v28, %v5917_v21  ;;  %v2300_v7 = vmul.f32 %v2283_v0, %v5918_v57  ;;  %v2301_v22 = vmul.f32 %v2287_v56, %v5919_v1 }
 0x53c   :  { %v2302_v15 = vmul.f32 %v2283_v0, %v5920_v52  ;;  %v2303_v30 = vmul.f32 %v2287_v56, %v5921_v47  ;;  %v2304_v41 = vmul.f32 %v2283_v0, %v5922_v36  ;;  %v2305_v63 = vmul.f32 %v2287_v56, %v5923_v60 }
 0x53d   :  { %v2306_v18 = vmul.f32 %v2283_v0, %v5924_v8  ;;  %v2307_v39 = vmul.f32 %v2287_v56, %v5925_v4  ;;  %v2308_v2 = vadd.f32 %v2534_v45, %v2292_v17  ;;  %v2309_v38 = vadd.f32 %v2535_v55, %v2293_v9  ;;  %v2549_v0 = vld [vmem:[%s5448_s0 + $0x78] sm:$0xff] }
 0x53e   :  { %v2310_v58 = vadd.f32 %v2536_v20, %v2294_v54  ;;  %v2311_v40 = vadd.f32 %v2537_v42, %v2295_v14  ;;  %v2312_v29 = vadd.f32 %v2538_v37, %v2296_v19  ;;  %v2313_v53 = vadd.f32 %v2539_v27, %v2297_v32 }
 0x53f   :  { %v2314_v34 = vadd.f32 %v2540_v3, %v2298_v43  ;;  %v2315_v48 = vadd.f32 %v2541_v44, %v2299_v23  ;;  %v2316_v31 = vadd.f32 %v2542_v10, %v2300_v7  ;;  %v2317_v12 = vadd.f32 %v2543_v25, %v2301_v22  ;;  %2324 = vst [vmem:[%s5453_s5] sm:$0xff] %v2308_v2 }
 0x540   :  { %2325 = vst [vmem:[%s5453_s5 + $0x8] sm:$0xff] %v2309_v38  ;;  %v2318_v35 = vadd.f32 %v2544_v16, %v2302_v15  ;;  %v2319_v11 = vadd.f32 %v2545_v24, %v2303_v30  ;;  %v2320_v61 = vadd.f32 %v2546_v51, %v2304_v41  ;;  %v2321_v50 = vadd.f32 %v2547_v49, %v2305_v63 }
 0x541   :  { %2326 = vst [vmem:[%s5453_s5 + $0x10] sm:$0xff] %v2310_v58  ;;  %2327 = vst [vmem:[%s5453_s5 + $0x18] sm:$0xff] %v2311_v40  ;;  %v2322_v28 = vadd.f32 %v2548_v59, %v2306_v18  ;;  %v2323_v56 = vadd.f32 %v2549_v0, %v2307_v39 }
 0x542   :  { %2328 = vst [vmem:[%s5453_s5 + $0x20] sm:$0xff] %v2312_v29  ;;  %2329 = vst [vmem:[%s5453_s5 + $0x28] sm:$0xff] %v2313_v53 }
 0x543   :  { %2330 = vst [vmem:[%s5453_s5 + $0x30] sm:$0xff] %v2314_v34  ;;  %2331 = vst [vmem:[%s5453_s5 + $0x38] sm:$0xff] %v2315_v48 }
 0x544   :  { %2332 = vst [vmem:[%s5453_s5 + $0x40] sm:$0xff] %v2316_v31  ;;  %2333 = vst [vmem:[%s5453_s5 + $0x48] sm:$0xff] %v2317_v12 }
 0x545   :  { %2334 = vst [vmem:[%s5453_s5 + $0x50] sm:$0xff] %v2318_v35  ;;  %2335 = vst [vmem:[%s5453_s5 + $0x58] sm:$0xff] %v2319_v11 }
 0x546   :  { %2336 = vst [vmem:[%s5453_s5 + $0x60] sm:$0xff] %v2320_v61  ;;  %2337 = vst [vmem:[%s5453_s5 + $0x68] sm:$0xff] %v2321_v50 }
 0x547   :  { %2338 = vst [vmem:[%s5453_s5 + $0x70] sm:$0xff] %v2322_v28  ;;  %2339 = vst [vmem:[%s5453_s5 + $0x78] sm:$0xff] %v2323_v56 }
 0x548   :  { %2344 = vsyncpa [#allocation4], 1 }

</bundles_post_ra>
